<compile_context>
chip_gen: v7x
topology: tpu7x:2x2x1
jax: 0.10.0
libtpu: 0.0.40
codegen_flags: <defaults>
</compile_context>

<pallas_src>
import functools

import jax
import jax.numpy as jnp
from jax.experimental import pallas as pl
from jax.experimental.pallas import tpu as pltpu


def rcab_kernel(x_ref, w1_ref, b1_ref, w2_ref, b2_ref, wd_ref, wu_ref,
                o_ref, pad_ref, *, height, width, res_scale):
    H, W = height, width
    HW, C = x_ref.shape
    PW = (H + 2) * W                       # rows of the H-padded scratch

    # ---- zero the two halo row-bands (aligned writes; redone every step so a
    #      batch axis sharded across cores stays correct) ----
    halo = jnp.zeros((W, C), jnp.float32)
    pad_ref[0:W, :] = halo
    pad_ref[(H + 1) * W:PW, :] = halo

    # ---- 0/1 column masks for the dx = -1 / +1 taps (zero the wrapped col) ----
    col = jax.lax.broadcasted_iota(jnp.int32, (PW, 1), 0) % W
    mask_l = (col > 0).astype(jnp.float32)          # valid where w-1 >= 0
    mask_r = (col < (W - 1)).astype(jnp.float32)    # valid where w+1 <  W

    def conv3x3(w_ref, b_ref):
        """3x3 'SAME' conv = 9 accumulated MXU dots; dx shifts via XLU roll."""
        acc = jnp.zeros((HW, C), jnp.float32)
        # (row shift, mask) per kernel column dx: dx=0 -> w-1, 1 -> w, 2 -> w+1
        variants = ((1, mask_l), (None, None), (PW - 1, mask_r))
        for dx in range(3):
            shift, mask = variants[dx]
            base = pad_ref[...]                                    # ((H+2)*W, C) f32
            if shift is None:
                shifted = base.astype(jnp.bfloat16)
            else:
                shifted = (pltpu.roll(base, shift, 0) * mask).astype(jnp.bfloat16)
            for dy in range(3):
                tap = shifted[dy * W:dy * W + HW, :]               # aligned slice
                acc += jnp.dot(tap, w_ref[dy * 3 + dx],
                               preferred_element_type=jnp.float32)
        return acc + b_ref[...]

    # ---- conv1: 3x3, pad=1, bias, ReLU ----
    pad_ref[W:W + HW, :] = x_ref[...]                               # aligned write
    y1 = jnp.maximum(conv3x3(w1_ref, b1_ref), 0.0)                  # (HW, C) f32

    # ---- conv2: 3x3, pad=1, bias (reuse the same padded scratch) ----
    pad_ref[W:W + HW, :] = y1
    y2 = conv3x3(w2_ref, b2_ref)                                    # (HW, C) f32

    # ---- channel attention: tiny projections, keep them off the MXU ----
    pooled = jnp.mean(y2, axis=0, keepdims=True)                    # (1, C)
    hidden = jnp.sum(wd_ref[...] * pooled, axis=1, keepdims=True)   # (Cr, 1)
    hidden = jnp.maximum(hidden, 0.0)
    att = jax.nn.sigmoid(jnp.sum(hidden * wu_ref[...], axis=0,
                                 keepdims=True))                    # (1, C)

    # ---- residual ----
    o_ref[...] = (x_ref[...] + (y2 * att) * res_scale).astype(o_ref.dtype)


def rcab_forward(x, params, res_scale=1.0):
    """x: (B, H, W, C) float32 NHWC.

    params = (w1, b1, w2, b2, wd, wu):
      w1, w2: (3, 3, C, C) HWIO 3x3 conv weights
              (PyTorch OIHW weights must be pre-transposed: w.transpose(2, 3, 1, 0))
      b1, b2: (C,) biases
      wd:     (C//r, C)  channel-attention down proj ([out, in], no bias)
      wu:     (C//r, C)  channel-attention up   proj ([in, out], no bias)
    """
    w1, b1, w2, b2, wd, wu = params
    B, H, W, C = x.shape
    Cr = wd.shape[0]
    HW = H * W
    assert w1.shape == (3, 3, C, C) and w2.shape == (3, 3, C, C), "conv weights must be HWIO"
    assert W % 8 == 0, "W must be a multiple of 8 (sublane tile)"

    # Flatten spatial dims outside the kernel (free in XLA); weights packed to
    # bf16 and indexed as (dy*3+dx, C_in, C_out) to match the in-kernel taps.
    x2 = x.reshape(B, HW, C)
    w1f = w1.reshape(9, C, C).astype(jnp.bfloat16)
    w2f = w2.reshape(9, C, C).astype(jnp.bfloat16)
    b1r = b1.reshape(1, C).astype(jnp.float32)
    b2r = b2.reshape(1, C).astype(jnp.float32)
    wdr = wd.astype(jnp.float32)
    wur = wu.astype(jnp.float32)

    kern = functools.partial(rcab_kernel, height=H, width=W, res_scale=res_scale)

    cost = pl.CostEstimate(
        flops=4 * B * HW * 9 * C * C,            # two 3x3 convs, 2 flops/MAC
        transcendentals=B * (C + Cr),            # sigmoid/exp in the CA mlp
        bytes_accessed=(2 * B * HW * C * 4
                        + (w1f.size + w2f.size) * 2
                        + (b1.size + b2.size + wd.size + wu.size) * 4))

    out = pl.pallas_call(
        kern,
        out_shape=jax.ShapeDtypeStruct((B, HW, C), x.dtype),
        grid_spec=pltpu.PrefetchScalarGridSpec(
            num_scalar_prefetch=0,
            grid=(B,),
            in_specs=[
                pl.BlockSpec((pl.Squeezed(), HW, C), lambda b: (b, 0, 0)),  # x
                pl.BlockSpec((9, C, C), lambda b: (0, 0, 0)),               # conv1 w (bf16)
                pl.BlockSpec((1, C), lambda b: (0, 0)),                     # conv1 b
                pl.BlockSpec((9, C, C), lambda b: (0, 0, 0)),               # conv2 w (bf16)
                pl.BlockSpec((1, C), lambda b: (0, 0)),                     # conv2 b
                pl.BlockSpec((Cr, C), lambda b: (0, 0)),                    # CA down
                pl.BlockSpec((Cr, C), lambda b: (0, 0)),                    # CA up
            ],
            out_specs=pl.BlockSpec((pl.Squeezed(), HW, C), lambda b: (b, 0, 0)),
            scratch_shapes=[pltpu.VMEM(((H + 2) * W, C), jnp.float32)],
        ),
        compiler_params=pltpu.CompilerParams(
            dimension_semantics=("parallel",)),
        cost_estimate=cost,
    )(x2, w1f, b1r, w2f, b2r, wdr, wur)
    return out.reshape(B, H, W, C)


def rcab_reference(x, params, res_scale=1.0, conv_dtype=jnp.float32):
    """Pure-JAX NHWC reference matching PyTorch RCAB semantics.

    conv_dtype=jnp.bfloat16 mirrors the kernel's bf16 MXU operands (f32 accum).
    """
    w1, b1, w2, b2, wd, wu = params
    dn = ('NHWC', 'HWIO', 'NHWC')

    def conv(v, w, b):
        y = jax.lax.conv_general_dilated(
            v.astype(conv_dtype), w.astype(conv_dtype), (1, 1), 'SAME',
            dimension_numbers=dn, preferred_element_type=jnp.float32)
        return y + b.reshape(1, 1, 1, -1)

    y = jnp.maximum(conv(x, w1, b1), 0.0)
    y = conv(y, w2, b2)
    pooled = jnp.mean(y, axis=(1, 2))                 # (B, C)  AdaptiveAvgPool2d(1)
    h = jnp.maximum(pooled @ wd.T, 0.0)               # (B, Cr)
    att = jax.nn.sigmoid(h @ wu)                      # (B, C)
    return x + (y * att[:, None, None, :]) * res_scale


if __name__ == "__main__":
    # Small shapes consistent with the module: planes=32, reduction=16 -> hidden=2.
    B, H, W, C = 2, 16, 16, 32
    reduction = 16
    Cr = C // reduction
    res_scale = 1.0

    key = jax.random.PRNGKey(0)
    kx, k1, kb1, k2, kb2, kd, ku = jax.random.split(key, 7)

    x = jax.random.normal(kx, (B, H, W, C), jnp.float32)

    # deterministic synthetic parameters
    w1 = 0.1 * jax.random.normal(k1, (3, 3, C, C), jnp.float32)   # HWIO
    b1 = 0.1 * jax.random.normal(kb1, (C,), jnp.float32)
    w2 = 0.1 * jax.random.normal(k2, (3, 3, C, C), jnp.float32)   # HWIO
    b2 = 0.1 * jax.random.normal(kb2, (C,), jnp.float32)
    wd = 0.1 * jax.random.normal(kd, (Cr, C), jnp.float32)        # CA down, [out, in]
    wu = 0.1 * jax.random.normal(ku, (Cr, C), jnp.float32)        # CA up,   [in, out]
    params = (w1, b1, w2, b2, wd, wu)

    out = jax.block_until_ready(rcab_forward(x, params, res_scale=res_scale))
    assert out.shape == (B, H, W, C)

    # Tight check against a bf16-conv reference (same operand quantization as
    # the kernel), loose check against the pure-f32 module reference.
    ref_bf16 = jax.block_until_ready(
        rcab_reference(x, params, res_scale, conv_dtype=jnp.bfloat16))
    ref_f32 = jax.block_until_ready(
        rcab_reference(x, params, res_scale, conv_dtype=jnp.float32))

    err_bf16 = float(jnp.max(jnp.abs(out - ref_bf16)))
    err_f32 = float(jnp.max(jnp.abs(out - ref_f32)))
    assert jnp.allclose(out, ref_bf16, atol=2e-3, rtol=2e-3), f"bf16-ref max abs err {err_bf16}"
    assert jnp.allclose(out, ref_f32, atol=1e-1, rtol=1e-1), f"f32-ref max abs err {err_f32}"

    print("KERNEL_OK")
</pallas_src>

<mosaic_0001>
module attributes {stable_mosaic.version = 11 : i64} {
  func.func @rcab_kernel(%arg0: i32, %arg1: memref<1x256x32xf32, #tpu.memory_space<vmem>>, %arg2: memref<9x32x32xbf16, #tpu.memory_space<vmem>>, %arg3: memref<1x32xf32, #tpu.memory_space<vmem>>, %arg4: memref<9x32x32xbf16, #tpu.memory_space<vmem>>, %arg5: memref<1x32xf32, #tpu.memory_space<vmem>>, %arg6: memref<2x32xf32, #tpu.memory_space<vmem>>, %arg7: memref<2x32xf32, #tpu.memory_space<vmem>>, %arg8: memref<1x256x32xf32, #tpu.memory_space<vmem>>, %arg9: memref<288x32xf32, #tpu.memory_space<vmem>>) attributes {dimension_semantics = [#tpu.dimension_semantics<parallel>], iteration_bounds = array<i64: 2>, scalar_prefetch = 0 : i64, scratch_operands = 1 : i64, tpu.core_type = #tpu.core_type<tc>, window_params = [{transform_indices = @transform_0, window_bounds = array<i64: 1, 256, 32>}, {pipeline_mode = #tpu.pipeline_mode<synchronous>, transform_indices = @transform_1, window_bounds = array<i64: 9, 32, 32>}, {pipeline_mode = #tpu.pipeline_mode<synchronous>, transform_indices = @transform_2, window_bounds = array<i64: 1, 32>}, {pipeline_mode = #tpu.pipeline_mode<synchronous>, transform_indices = @transform_3, window_bounds = array<i64: 9, 32, 32>}, {pipeline_mode = #tpu.pipeline_mode<synchronous>, transform_indices = @transform_4, window_bounds = array<i64: 1, 32>}, {pipeline_mode = #tpu.pipeline_mode<synchronous>, transform_indices = @transform_5, window_bounds = array<i64: 2, 32>}, {pipeline_mode = #tpu.pipeline_mode<synchronous>, transform_indices = @transform_6, window_bounds = array<i64: 2, 32>}, {transform_indices = @transform_7, window_bounds = array<i64: 1, 256, 32>}]} {
    %cst = arith.constant 0.000000e+00 : f32
    %0 = vector.broadcast %cst : f32 to vector<16x32xf32>
    %c0 = arith.constant 0 : index
    %c0_0 = arith.constant 0 : index
    %1 = vector.load %arg9[%c0, %c0_0] : memref<288x32xf32, #tpu.memory_space<vmem>>, vector<16x32xf32>
    tpu.vector_store %arg9[%c0, %c0_0], %0 {strides = array<i32>} : memref<288x32xf32, #tpu.memory_space<vmem>>, vector<16x32xf32>,
    %c272 = arith.constant 272 : index
    %c0_1 = arith.constant 0 : index
    %2 = vector.load %arg9[%c272, %c0_1] : memref<288x32xf32, #tpu.memory_space<vmem>>, vector<16x32xf32>
    tpu.vector_store %arg9[%c272, %c0_1], %0 {strides = array<i32>} : memref<288x32xf32, #tpu.memory_space<vmem>>, vector<16x32xf32>,
    %3 = tpu.iota {dimensions = array<i32: 0>} : vector<288x1xi32>
    %c16_i32 = arith.constant 16 : i32
    %c0_i32 = arith.constant 0 : i32
    %4 = arith.cmpi eq, %c16_i32, %c0_i32 : i32
    %c1_i32 = arith.constant 1 : i32
    %5 = arith.select %4, %c1_i32, %c16_i32 : i32
    %6 = vector.broadcast %5 : i32 to vector<288x1xi32>
    %7 = arith.remsi %3, %6 : vector<288x1xi32>
    %c0_i32_2 = arith.constant 0 : i32
    %8 = vector.broadcast %c0_i32_2 : i32 to vector<288x1xi32>
    %9 = arith.cmpi ne, %7, %8 : vector<288x1xi32>
    %c0_i32_3 = arith.constant 0 : i32
    %10 = vector.broadcast %c0_i32_3 : i32 to vector<288x1xi32>
    %11 = arith.cmpi slt, %7, %10 : vector<288x1xi32>
    %c0_i32_4 = arith.constant 0 : i32
    %12 = arith.cmpi slt, %5, %c0_i32_4 : i32
    %13 = vector.broadcast %12 : i1 to vector<288x1xi1>
    %14 = vector.broadcast %13 : vector<288x1xi1> to vector<288x1xi1>
    %15 = arith.xori %11, %14 : vector<288x1xi1>
    %16 = arith.andi %15, %9 : vector<288x1xi1>
    %17 = vector.broadcast %5 : i32 to vector<288x1xi32>
    %18 = arith.addi %7, %17 : vector<288x1xi32>
    %19 = arith.select %16, %18, %7 : vector<288x1xi1>, vector<288x1xi32>
    %c0_i32_5 = arith.constant 0 : i32
    %20 = vector.broadcast %c0_i32_5 : i32 to vector<288x1xi32>
    %21 = arith.cmpi sgt, %19, %20 : vector<288x1xi32>
    %22 = arith.extui %21 : vector<288x1xi1> to vector<288x1xi32>
    %23 = arith.sitofp %22 : vector<288x1xi32> to vector<288x1xf32>
    %c15_i32 = arith.constant 15 : i32
    %24 = vector.broadcast %c15_i32 : i32 to vector<288x1xi32>
    %25 = arith.cmpi slt, %19, %24 : vector<288x1xi32>
    %26 = arith.extui %25 : vector<288x1xi1> to vector<288x1xi32>
    %27 = arith.sitofp %26 : vector<288x1xi32> to vector<288x1xf32>
    %c0_6 = arith.constant 0 : index
    %c0_7 = arith.constant 0 : index
    %c0_8 = arith.constant 0 : index
    %28 = vector.load %arg1[%c0_6, %c0_7, %c0_8] : memref<1x256x32xf32, #tpu.memory_space<vmem>>, vector<1x256x32xf32>
    %29 = vector.shape_cast %28 : vector<1x256x32xf32> to vector<256x32xf32>
    %c16 = arith.constant 16 : index
    %c0_9 = arith.constant 0 : index
    %30 = vector.load %arg9[%c16, %c0_9] : memref<288x32xf32, #tpu.memory_space<vmem>>, vector<256x32xf32>
    tpu.vector_store %arg9[%c16, %c0_9], %29 {strides = array<i32>} : memref<288x32xf32, #tpu.memory_space<vmem>>, vector<256x32xf32>,
    %cst_10 = arith.constant 0.000000e+00 : f32
    %31 = vector.broadcast %cst_10 : f32 to vector<256x32xf32>
    %c0_11 = arith.constant 0 : index
    %c0_12 = arith.constant 0 : index
    %32 = vector.load %arg9[%c0_11, %c0_12] : memref<288x32xf32, #tpu.memory_space<vmem>>, vector<288x32xf32>
    %c1_i32_13 = arith.constant 1 : i32
    %33 = tpu.dynamic_rotate %32 by %c1_i32_13 dim 0 : vector<288x32xf32>, i32 -> vector<288x32xf32>
    %34 = vector.broadcast %23 : vector<288x1xf32> to vector<288x32xf32>
    %35 = arith.mulf %33, %34 : vector<288x32xf32>
    %36 = arith.truncf %35 : vector<288x32xf32> to vector<288x32xbf16>
    %37 = vector.extract_strided_slice %36 {offsets = [0, 0], sizes = [256, 32], strides = [1, 1]} : vector<288x32xbf16> to vector<256x32xbf16>
    %c0_14 = arith.constant 0 : index
    %c0_15 = arith.constant 0 : index
    %c0_16 = arith.constant 0 : index
    %38 = vector.load %arg2[%c0_14, %c0_15, %c0_16] : memref<9x32x32xbf16, #tpu.memory_space<vmem>>, vector<1x32x32xbf16>
    %39 = vector.shape_cast %38 : vector<1x32x32xbf16> to vector<32x32xbf16>
    %cst_17 = arith.constant dense<0.000000e+00> : vector<256x32xf32>
    %40 = tpu.matmul %37, %39, %cst_17 {dimension_numbers = #tpu.dot_dimension_numbers<[1], [0], [0], [1], [0, 0, 1, 1], [], []>} : vector<256x32xbf16>, vector<32x32xbf16>, vector<256x32xf32> -> vector<256x32xf32>
    %41 = arith.addf %31, %40 : vector<256x32xf32>
    %42 = vector.extract_strided_slice %36 {offsets = [16, 0], sizes = [256, 32], strides = [1, 1]} : vector<288x32xbf16> to vector<256x32xbf16>
    %c3 = arith.constant 3 : index
    %c0_18 = arith.constant 0 : index
    %c0_19 = arith.constant 0 : index
    %43 = vector.load %arg2[%c3, %c0_18, %c0_19] : memref<9x32x32xbf16, #tpu.memory_space<vmem>>, vector<1x32x32xbf16>
    %44 = vector.shape_cast %43 : vector<1x32x32xbf16> to vector<32x32xbf16>
    %cst_20 = arith.constant dense<0.000000e+00> : vector<256x32xf32>
    %45 = tpu.matmul %42, %44, %cst_20 {dimension_numbers = #tpu.dot_dimension_numbers<[1], [0], [0], [1], [0, 0, 1, 1], [], []>} : vector<256x32xbf16>, vector<32x32xbf16>, vector<256x32xf32> -> vector<256x32xf32>
    %46 = arith.addf %41, %45 : vector<256x32xf32>
    %47 = vector.extract_strided_slice %36 {offsets = [32, 0], sizes = [256, 32], strides = [1, 1]} : vector<288x32xbf16> to vector<256x32xbf16>
    %c6 = arith.constant 6 : index
    %c0_21 = arith.constant 0 : index
    %c0_22 = arith.constant 0 : index
    %48 = vector.load %arg2[%c6, %c0_21, %c0_22] : memref<9x32x32xbf16, #tpu.memory_space<vmem>>, vector<1x32x32xbf16>
    %49 = vector.shape_cast %48 : vector<1x32x32xbf16> to vector<32x32xbf16>
    %cst_23 = arith.constant dense<0.000000e+00> : vector<256x32xf32>
    %50 = tpu.matmul %47, %49, %cst_23 {dimension_numbers = #tpu.dot_dimension_numbers<[1], [0], [0], [1], [0, 0, 1, 1], [], []>} : vector<256x32xbf16>, vector<32x32xbf16>, vector<256x32xf32> -> vector<256x32xf32>
    %51 = arith.addf %46, %50 : vector<256x32xf32>
    %c0_24 = arith.constant 0 : index
    %c0_25 = arith.constant 0 : index
    %52 = vector.load %arg9[%c0_24, %c0_25] : memref<288x32xf32, #tpu.memory_space<vmem>>, vector<288x32xf32>
    %53 = arith.truncf %52 : vector<288x32xf32> to vector<288x32xbf16>
    %54 = vector.extract_strided_slice %53 {offsets = [0, 0], sizes = [256, 32], strides = [1, 1]} : vector<288x32xbf16> to vector<256x32xbf16>
    %c1 = arith.constant 1 : index
    %c0_26 = arith.constant 0 : index
    %c0_27 = arith.constant 0 : index
    %55 = vector.load %arg2[%c1, %c0_26, %c0_27] : memref<9x32x32xbf16, #tpu.memory_space<vmem>>, vector<1x32x32xbf16>
    %56 = vector.shape_cast %55 : vector<1x32x32xbf16> to vector<32x32xbf16>
    %cst_28 = arith.constant dense<0.000000e+00> : vector<256x32xf32>
    %57 = tpu.matmul %54, %56, %cst_28 {dimension_numbers = #tpu.dot_dimension_numbers<[1], [0], [0], [1], [0, 0, 1, 1], [], []>} : vector<256x32xbf16>, vector<32x32xbf16>, vector<256x32xf32> -> vector<256x32xf32>
    %58 = arith.addf %51, %57 : vector<256x32xf32>
    %59 = vector.extract_strided_slice %53 {offsets = [16, 0], sizes = [256, 32], strides = [1, 1]} : vector<288x32xbf16> to vector<256x32xbf16>
    %c4 = arith.constant 4 : index
    %c0_29 = arith.constant 0 : index
    %c0_30 = arith.constant 0 : index
    %60 = vector.load %arg2[%c4, %c0_29, %c0_30] : memref<9x32x32xbf16, #tpu.memory_space<vmem>>, vector<1x32x32xbf16>
    %61 = vector.shape_cast %60 : vector<1x32x32xbf16> to vector<32x32xbf16>
    %cst_31 = arith.constant dense<0.000000e+00> : vector<256x32xf32>
    %62 = tpu.matmul %59, %61, %cst_31 {dimension_numbers = #tpu.dot_dimension_numbers<[1], [0], [0], [1], [0, 0, 1, 1], [], []>} : vector<256x32xbf16>, vector<32x32xbf16>, vector<256x32xf32> -> vector<256x32xf32>
    %63 = arith.addf %58, %62 : vector<256x32xf32>
    %64 = vector.extract_strided_slice %53 {offsets = [32, 0], sizes = [256, 32], strides = [1, 1]} : vector<288x32xbf16> to vector<256x32xbf16>
    %c7 = arith.constant 7 : index
    %c0_32 = arith.constant 0 : index
    %c0_33 = arith.constant 0 : index
    %65 = vector.load %arg2[%c7, %c0_32, %c0_33] : memref<9x32x32xbf16, #tpu.memory_space<vmem>>, vector<1x32x32xbf16>
    %66 = vector.shape_cast %65 : vector<1x32x32xbf16> to vector<32x32xbf16>
    %cst_34 = arith.constant dense<0.000000e+00> : vector<256x32xf32>
    %67 = tpu.matmul %64, %66, %cst_34 {dimension_numbers = #tpu.dot_dimension_numbers<[1], [0], [0], [1], [0, 0, 1, 1], [], []>} : vector<256x32xbf16>, vector<32x32xbf16>, vector<256x32xf32> -> vector<256x32xf32>
    %68 = arith.addf %63, %67 : vector<256x32xf32>
    %c0_35 = arith.constant 0 : index
    %c0_36 = arith.constant 0 : index
    %69 = vector.load %arg9[%c0_35, %c0_36] : memref<288x32xf32, #tpu.memory_space<vmem>>, vector<288x32xf32>
    %c287_i32 = arith.constant 287 : i32
    %70 = tpu.dynamic_rotate %69 by %c287_i32 dim 0 : vector<288x32xf32>, i32 -> vector<288x32xf32>
    %71 = vector.broadcast %27 : vector<288x1xf32> to vector<288x32xf32>
    %72 = arith.mulf %70, %71 : vector<288x32xf32>
    %73 = arith.truncf %72 : vector<288x32xf32> to vector<288x32xbf16>
    %74 = vector.extract_strided_slice %73 {offsets = [0, 0], sizes = [256, 32], strides = [1, 1]} : vector<288x32xbf16> to vector<256x32xbf16>
    %c2 = arith.constant 2 : index
    %c0_37 = arith.constant 0 : index
    %c0_38 = arith.constant 0 : index
    %75 = vector.load %arg2[%c2, %c0_37, %c0_38] : memref<9x32x32xbf16, #tpu.memory_space<vmem>>, vector<1x32x32xbf16>
    %76 = vector.shape_cast %75 : vector<1x32x32xbf16> to vector<32x32xbf16>
    %cst_39 = arith.constant dense<0.000000e+00> : vector<256x32xf32>
    %77 = tpu.matmul %74, %76, %cst_39 {dimension_numbers = #tpu.dot_dimension_numbers<[1], [0], [0], [1], [0, 0, 1, 1], [], []>} : vector<256x32xbf16>, vector<32x32xbf16>, vector<256x32xf32> -> vector<256x32xf32>
    %78 = arith.addf %68, %77 : vector<256x32xf32>
    %79 = vector.extract_strided_slice %73 {offsets = [16, 0], sizes = [256, 32], strides = [1, 1]} : vector<288x32xbf16> to vector<256x32xbf16>
    %c5 = arith.constant 5 : index
    %c0_40 = arith.constant 0 : index
    %c0_41 = arith.constant 0 : index
    %80 = vector.load %arg2[%c5, %c0_40, %c0_41] : memref<9x32x32xbf16, #tpu.memory_space<vmem>>, vector<1x32x32xbf16>
    %81 = vector.shape_cast %80 : vector<1x32x32xbf16> to vector<32x32xbf16>
    %cst_42 = arith.constant dense<0.000000e+00> : vector<256x32xf32>
    %82 = tpu.matmul %79, %81, %cst_42 {dimension_numbers = #tpu.dot_dimension_numbers<[1], [0], [0], [1], [0, 0, 1, 1], [], []>} : vector<256x32xbf16>, vector<32x32xbf16>, vector<256x32xf32> -> vector<256x32xf32>
    %83 = arith.addf %78, %82 : vector<256x32xf32>
    %84 = vector.extract_strided_slice %73 {offsets = [32, 0], sizes = [256, 32], strides = [1, 1]} : vector<288x32xbf16> to vector<256x32xbf16>
    %c8 = arith.constant 8 : index
    %c0_43 = arith.constant 0 : index
    %c0_44 = arith.constant 0 : index
    %85 = vector.load %arg2[%c8, %c0_43, %c0_44] : memref<9x32x32xbf16, #tpu.memory_space<vmem>>, vector<1x32x32xbf16>
    %86 = vector.shape_cast %85 : vector<1x32x32xbf16> to vector<32x32xbf16>
    %cst_45 = arith.constant dense<0.000000e+00> : vector<256x32xf32>
    %87 = tpu.matmul %84, %86, %cst_45 {dimension_numbers = #tpu.dot_dimension_numbers<[1], [0], [0], [1], [0, 0, 1, 1], [], []>} : vector<256x32xbf16>, vector<32x32xbf16>, vector<256x32xf32> -> vector<256x32xf32>
    %88 = arith.addf %83, %87 : vector<256x32xf32>
    %c0_46 = arith.constant 0 : index
    %c0_47 = arith.constant 0 : index
    %89 = vector.load %arg3[%c0_46, %c0_47] : memref<1x32xf32, #tpu.memory_space<vmem>>, vector<1x32xf32>
    %90 = vector.broadcast %89 : vector<1x32xf32> to vector<256x32xf32>
    %91 = arith.addf %88, %90 : vector<256x32xf32>
    %cst_48 = arith.constant 0.000000e+00 : f32
    %92 = vector.broadcast %cst_48 : f32 to vector<256x32xf32>
    %93 = arith.maximumf %91, %92 : vector<256x32xf32>
    %c16_49 = arith.constant 16 : index
    %c0_50 = arith.constant 0 : index
    %94 = vector.load %arg9[%c16_49, %c0_50] : memref<288x32xf32, #tpu.memory_space<vmem>>, vector<256x32xf32>
    tpu.vector_store %arg9[%c16_49, %c0_50], %93 {strides = array<i32>} : memref<288x32xf32, #tpu.memory_space<vmem>>, vector<256x32xf32>,
    %cst_51 = arith.constant 0.000000e+00 : f32
    %95 = vector.broadcast %cst_51 : f32 to vector<256x32xf32>
    %c0_52 = arith.constant 0 : index
    %c0_53 = arith.constant 0 : index
    %96 = vector.load %arg9[%c0_52, %c0_53] : memref<288x32xf32, #tpu.memory_space<vmem>>, vector<288x32xf32>
    %c1_i32_54 = arith.constant 1 : i32
    %97 = tpu.dynamic_rotate %96 by %c1_i32_54 dim 0 : vector<288x32xf32>, i32 -> vector<288x32xf32>
    %98 = vector.broadcast %23 : vector<288x1xf32> to vector<288x32xf32>
    %99 = arith.mulf %97, %98 : vector<288x32xf32>
    %100 = arith.truncf %99 : vector<288x32xf32> to vector<288x32xbf16>
    %101 = vector.extract_strided_slice %100 {offsets = [0, 0], sizes = [256, 32], strides = [1, 1]} : vector<288x32xbf16> to vector<256x32xbf16>
    %c0_55 = arith.constant 0 : index
    %c0_56 = arith.constant 0 : index
    %c0_57 = arith.constant 0 : index
    %102 = vector.load %arg4[%c0_55, %c0_56, %c0_57] : memref<9x32x32xbf16, #tpu.memory_space<vmem>>, vector<1x32x32xbf16>
    %103 = vector.shape_cast %102 : vector<1x32x32xbf16> to vector<32x32xbf16>
    %cst_58 = arith.constant dense<0.000000e+00> : vector<256x32xf32>
    %104 = tpu.matmul %101, %103, %cst_58 {dimension_numbers = #tpu.dot_dimension_numbers<[1], [0], [0], [1], [0, 0, 1, 1], [], []>} : vector<256x32xbf16>, vector<32x32xbf16>, vector<256x32xf32> -> vector<256x32xf32>
    %105 = arith.addf %95, %104 : vector<256x32xf32>
    %106 = vector.extract_strided_slice %100 {offsets = [16, 0], sizes = [256, 32], strides = [1, 1]} : vector<288x32xbf16> to vector<256x32xbf16>
    %c3_59 = arith.constant 3 : index
    %c0_60 = arith.constant 0 : index
    %c0_61 = arith.constant 0 : index
    %107 = vector.load %arg4[%c3_59, %c0_60, %c0_61] : memref<9x32x32xbf16, #tpu.memory_space<vmem>>, vector<1x32x32xbf16>
    %108 = vector.shape_cast %107 : vector<1x32x32xbf16> to vector<32x32xbf16>
    %cst_62 = arith.constant dense<0.000000e+00> : vector<256x32xf32>
    %109 = tpu.matmul %106, %108, %cst_62 {dimension_numbers = #tpu.dot_dimension_numbers<[1], [0], [0], [1], [0, 0, 1, 1], [], []>} : vector<256x32xbf16>, vector<32x32xbf16>, vector<256x32xf32> -> vector<256x32xf32>
    %110 = arith.addf %105, %109 : vector<256x32xf32>
    %111 = vector.extract_strided_slice %100 {offsets = [32, 0], sizes = [256, 32], strides = [1, 1]} : vector<288x32xbf16> to vector<256x32xbf16>
    %c6_63 = arith.constant 6 : index
    %c0_64 = arith.constant 0 : index
    %c0_65 = arith.constant 0 : index
    %112 = vector.load %arg4[%c6_63, %c0_64, %c0_65] : memref<9x32x32xbf16, #tpu.memory_space<vmem>>, vector<1x32x32xbf16>
    %113 = vector.shape_cast %112 : vector<1x32x32xbf16> to vector<32x32xbf16>
    %cst_66 = arith.constant dense<0.000000e+00> : vector<256x32xf32>
    %114 = tpu.matmul %111, %113, %cst_66 {dimension_numbers = #tpu.dot_dimension_numbers<[1], [0], [0], [1], [0, 0, 1, 1], [], []>} : vector<256x32xbf16>, vector<32x32xbf16>, vector<256x32xf32> -> vector<256x32xf32>
    %115 = arith.addf %110, %114 : vector<256x32xf32>
    %c0_67 = arith.constant 0 : index
    %c0_68 = arith.constant 0 : index
    %116 = vector.load %arg9[%c0_67, %c0_68] : memref<288x32xf32, #tpu.memory_space<vmem>>, vector<288x32xf32>
    %117 = arith.truncf %116 : vector<288x32xf32> to vector<288x32xbf16>
    %118 = vector.extract_strided_slice %117 {offsets = [0, 0], sizes = [256, 32], strides = [1, 1]} : vector<288x32xbf16> to vector<256x32xbf16>
    %c1_69 = arith.constant 1 : index
    %c0_70 = arith.constant 0 : index
    %c0_71 = arith.constant 0 : index
    %119 = vector.load %arg4[%c1_69, %c0_70, %c0_71] : memref<9x32x32xbf16, #tpu.memory_space<vmem>>, vector<1x32x32xbf16>
    %120 = vector.shape_cast %119 : vector<1x32x32xbf16> to vector<32x32xbf16>
    %cst_72 = arith.constant dense<0.000000e+00> : vector<256x32xf32>
    %121 = tpu.matmul %118, %120, %cst_72 {dimension_numbers = #tpu.dot_dimension_numbers<[1], [0], [0], [1], [0, 0, 1, 1], [], []>} : vector<256x32xbf16>, vector<32x32xbf16>, vector<256x32xf32> -> vector<256x32xf32>
    %122 = arith.addf %115, %121 : vector<256x32xf32>
    %123 = vector.extract_strided_slice %117 {offsets = [16, 0], sizes = [256, 32], strides = [1, 1]} : vector<288x32xbf16> to vector<256x32xbf16>
    %c4_73 = arith.constant 4 : index
    %c0_74 = arith.constant 0 : index
    %c0_75 = arith.constant 0 : index
    %124 = vector.load %arg4[%c4_73, %c0_74, %c0_75] : memref<9x32x32xbf16, #tpu.memory_space<vmem>>, vector<1x32x32xbf16>
    %125 = vector.shape_cast %124 : vector<1x32x32xbf16> to vector<32x32xbf16>
    %cst_76 = arith.constant dense<0.000000e+00> : vector<256x32xf32>
    %126 = tpu.matmul %123, %125, %cst_76 {dimension_numbers = #tpu.dot_dimension_numbers<[1], [0], [0], [1], [0, 0, 1, 1], [], []>} : vector<256x32xbf16>, vector<32x32xbf16>, vector<256x32xf32> -> vector<256x32xf32>
    %127 = arith.addf %122, %126 : vector<256x32xf32>
    %128 = vector.extract_strided_slice %117 {offsets = [32, 0], sizes = [256, 32], strides = [1, 1]} : vector<288x32xbf16> to vector<256x32xbf16>
    %c7_77 = arith.constant 7 : index
    %c0_78 = arith.constant 0 : index
    %c0_79 = arith.constant 0 : index
    %129 = vector.load %arg4[%c7_77, %c0_78, %c0_79] : memref<9x32x32xbf16, #tpu.memory_space<vmem>>, vector<1x32x32xbf16>
    %130 = vector.shape_cast %129 : vector<1x32x32xbf16> to vector<32x32xbf16>
    %cst_80 = arith.constant dense<0.000000e+00> : vector<256x32xf32>
    %131 = tpu.matmul %128, %130, %cst_80 {dimension_numbers = #tpu.dot_dimension_numbers<[1], [0], [0], [1], [0, 0, 1, 1], [], []>} : vector<256x32xbf16>, vector<32x32xbf16>, vector<256x32xf32> -> vector<256x32xf32>
    %132 = arith.addf %127, %131 : vector<256x32xf32>
    %c0_81 = arith.constant 0 : index
    %c0_82 = arith.constant 0 : index
    %133 = vector.load %arg9[%c0_81, %c0_82] : memref<288x32xf32, #tpu.memory_space<vmem>>, vector<288x32xf32>
    %c287_i32_83 = arith.constant 287 : i32
    %134 = tpu.dynamic_rotate %133 by %c287_i32_83 dim 0 : vector<288x32xf32>, i32 -> vector<288x32xf32>
    %135 = vector.broadcast %27 : vector<288x1xf32> to vector<288x32xf32>
    %136 = arith.mulf %134, %135 : vector<288x32xf32>
    %137 = arith.truncf %136 : vector<288x32xf32> to vector<288x32xbf16>
    %138 = vector.extract_strided_slice %137 {offsets = [0, 0], sizes = [256, 32], strides = [1, 1]} : vector<288x32xbf16> to vector<256x32xbf16>
    %c2_84 = arith.constant 2 : index
    %c0_85 = arith.constant 0 : index
    %c0_86 = arith.constant 0 : index
    %139 = vector.load %arg4[%c2_84, %c0_85, %c0_86] : memref<9x32x32xbf16, #tpu.memory_space<vmem>>, vector<1x32x32xbf16>
    %140 = vector.shape_cast %139 : vector<1x32x32xbf16> to vector<32x32xbf16>
    %cst_87 = arith.constant dense<0.000000e+00> : vector<256x32xf32>
    %141 = tpu.matmul %138, %140, %cst_87 {dimension_numbers = #tpu.dot_dimension_numbers<[1], [0], [0], [1], [0, 0, 1, 1], [], []>} : vector<256x32xbf16>, vector<32x32xbf16>, vector<256x32xf32> -> vector<256x32xf32>
    %142 = arith.addf %132, %141 : vector<256x32xf32>
    %143 = vector.extract_strided_slice %137 {offsets = [16, 0], sizes = [256, 32], strides = [1, 1]} : vector<288x32xbf16> to vector<256x32xbf16>
    %c5_88 = arith.constant 5 : index
    %c0_89 = arith.constant 0 : index
    %c0_90 = arith.constant 0 : index
    %144 = vector.load %arg4[%c5_88, %c0_89, %c0_90] : memref<9x32x32xbf16, #tpu.memory_space<vmem>>, vector<1x32x32xbf16>
    %145 = vector.shape_cast %144 : vector<1x32x32xbf16> to vector<32x32xbf16>
    %cst_91 = arith.constant dense<0.000000e+00> : vector<256x32xf32>
    %146 = tpu.matmul %143, %145, %cst_91 {dimension_numbers = #tpu.dot_dimension_numbers<[1], [0], [0], [1], [0, 0, 1, 1], [], []>} : vector<256x32xbf16>, vector<32x32xbf16>, vector<256x32xf32> -> vector<256x32xf32>
    %147 = arith.addf %142, %146 : vector<256x32xf32>
    %148 = vector.extract_strided_slice %137 {offsets = [32, 0], sizes = [256, 32], strides = [1, 1]} : vector<288x32xbf16> to vector<256x32xbf16>
    %c8_92 = arith.constant 8 : index
    %c0_93 = arith.constant 0 : index
    %c0_94 = arith.constant 0 : index
    %149 = vector.load %arg4[%c8_92, %c0_93, %c0_94] : memref<9x32x32xbf16, #tpu.memory_space<vmem>>, vector<1x32x32xbf16>
    %150 = vector.shape_cast %149 : vector<1x32x32xbf16> to vector<32x32xbf16>
    %cst_95 = arith.constant dense<0.000000e+00> : vector<256x32xf32>
    %151 = tpu.matmul %148, %150, %cst_95 {dimension_numbers = #tpu.dot_dimension_numbers<[1], [0], [0], [1], [0, 0, 1, 1], [], []>} : vector<256x32xbf16>, vector<32x32xbf16>, vector<256x32xf32> -> vector<256x32xf32>
    %152 = arith.addf %147, %151 : vector<256x32xf32>
    %c0_96 = arith.constant 0 : index
    %c0_97 = arith.constant 0 : index
    %153 = vector.load %arg5[%c0_96, %c0_97] : memref<1x32xf32, #tpu.memory_space<vmem>>, vector<1x32xf32>
    %154 = vector.broadcast %153 : vector<1x32xf32> to vector<256x32xf32>
    %155 = arith.addf %152, %154 : vector<256x32xf32>
    %cst_98 = arith.constant dense<0.000000e+00> : vector<32xf32>
    %156 = vector.multi_reduction <add>, %155, %cst_98 [0] : vector<256x32xf32> to vector<32xf32>
    %157 = vector.shape_cast %156 : vector<32xf32> to vector<1x32xf32>
    %cst_99 = arith.constant 2.560000e+02 : f32
    %158 = vector.broadcast %cst_99 : f32 to vector<1x32xf32>
    %159 = arith.divf %157, %158 : vector<1x32xf32>
    %c0_100 = arith.constant 0 : index
    %c0_101 = arith.constant 0 : index
    %160 = vector.load %arg6[%c0_100, %c0_101] : memref<2x32xf32, #tpu.memory_space<vmem>>, vector<2x32xf32>
    %161 = vector.broadcast %159 : vector<1x32xf32> to vector<2x32xf32>
    %162 = arith.mulf %160, %161 : vector<2x32xf32>
    %cst_102 = arith.constant dense<0.000000e+00> : vector<2xf32>
    %163 = vector.multi_reduction <add>, %162, %cst_102 [1] : vector<2x32xf32> to vector<2xf32>
    %164 = vector.shape_cast %163 : vector<2xf32> to vector<2x1xf32>
    %cst_103 = arith.constant 0.000000e+00 : f32
    %165 = vector.broadcast %cst_103 : f32 to vector<2x1xf32>
    %166 = arith.maximumf %164, %165 : vector<2x1xf32>
    %c0_104 = arith.constant 0 : index
    %c0_105 = arith.constant 0 : index
    %167 = vector.load %arg7[%c0_104, %c0_105] : memref<2x32xf32, #tpu.memory_space<vmem>>, vector<2x32xf32>
    %168 = vector.broadcast %166 : vector<2x1xf32> to vector<2x32xf32>
    %169 = arith.mulf %168, %167 : vector<2x32xf32>
    %cst_106 = arith.constant dense<0.000000e+00> : vector<32xf32>
    %170 = vector.multi_reduction <add>, %169, %cst_106 [0] : vector<2x32xf32> to vector<32xf32>
    %171 = vector.shape_cast %170 : vector<32xf32> to vector<1x32xf32>
    %172 = arith.negf %171 : vector<1x32xf32>
    %173 = math.exp %172 : vector<1x32xf32>
    %cst_107 = arith.constant 1.000000e+00 : f32
    %174 = vector.broadcast %cst_107 : f32 to vector<1x32xf32>
    %175 = arith.addf %174, %173 : vector<1x32xf32>
    %176 = arith.divf %174, %175 : vector<1x32xf32>
    %c0_108 = arith.constant 0 : index
    %c0_109 = arith.constant 0 : index
    %c0_110 = arith.constant 0 : index
    %177 = vector.load %arg1[%c0_108, %c0_109, %c0_110] : memref<1x256x32xf32, #tpu.memory_space<vmem>>, vector<1x256x32xf32>
    %178 = vector.shape_cast %177 : vector<1x256x32xf32> to vector<256x32xf32>
    %179 = vector.broadcast %176 : vector<1x32xf32> to vector<256x32xf32>
    %180 = arith.mulf %155, %179 : vector<256x32xf32>
    %cst_111 = arith.constant 1.000000e+00 : f32
    %181 = vector.broadcast %cst_111 : f32 to vector<256x32xf32>
    %182 = arith.mulf %180, %181 : vector<256x32xf32>
    %183 = arith.addf %178, %182 : vector<256x32xf32>
    %c0_112 = arith.constant 0 : index
    %c0_113 = arith.constant 0 : index
    %c0_114 = arith.constant 0 : index
    %184 = vector.load %arg8[%c0_112, %c0_113, %c0_114] : memref<1x256x32xf32, #tpu.memory_space<vmem>>, vector<1x256x32xf32>
    %185 = vector.shape_cast %184 : vector<1x256x32xf32> to vector<256x32xf32>
    %186 = vector.shape_cast %183 : vector<256x32xf32> to vector<1x256x32xf32>
    tpu.vector_store %arg8[%c0_112, %c0_113, %c0_114], %186 {strides = array<i32>} : memref<1x256x32xf32, #tpu.memory_space<vmem>>, vector<1x256x32xf32>,
    return
  }
  func.func @transform_0(%arg0: i32) -> (i32, i32, i32) {
    %c0_i32 = arith.constant 0 : i32
    %c0_i32_0 = arith.constant 0 : i32
    %c0_i32_1 = arith.constant 0 : i32
    return %arg0, %c0_i32, %c0_i32_0 : i32, i32, i32
  }
  func.func @transform_1(%arg0: i32) -> (i32, i32, i32) {
    %c0_i32 = arith.constant 0 : i32
    %c0_i32_0 = arith.constant 0 : i32
    %c0_i32_1 = arith.constant 0 : i32
    %c0_i32_2 = arith.constant 0 : i32
    return %c0_i32, %c0_i32_0, %c0_i32_1 : i32, i32, i32
  }
  func.func @transform_2(%arg0: i32) -> (i32, i32) {
    %c0_i32 = arith.constant 0 : i32
    %c0_i32_0 = arith.constant 0 : i32
    %c0_i32_1 = arith.constant 0 : i32
    return %c0_i32, %c0_i32_0 : i32, i32
  }
  func.func @transform_3(%arg0: i32) -> (i32, i32, i32) {
    %c0_i32 = arith.constant 0 : i32
    %c0_i32_0 = arith.constant 0 : i32
    %c0_i32_1 = arith.constant 0 : i32
    %c0_i32_2 = arith.constant 0 : i32
    return %c0_i32, %c0_i32_0, %c0_i32_1 : i32, i32, i32
  }
  func.func @transform_4(%arg0: i32) -> (i32, i32) {
    %c0_i32 = arith.constant 0 : i32
    %c0_i32_0 = arith.constant 0 : i32
    %c0_i32_1 = arith.constant 0 : i32
    return %c0_i32, %c0_i32_0 : i32, i32
  }
  func.func @transform_5(%arg0: i32) -> (i32, i32) {
    %c0_i32 = arith.constant 0 : i32
    %c0_i32_0 = arith.constant 0 : i32
    %c0_i32_1 = arith.constant 0 : i32
    return %c0_i32, %c0_i32_0 : i32, i32
  }
  func.func @transform_6(%arg0: i32) -> (i32, i32) {
    %c0_i32 = arith.constant 0 : i32
    %c0_i32_0 = arith.constant 0 : i32
    %c0_i32_1 = arith.constant 0 : i32
    return %c0_i32, %c0_i32_0 : i32, i32
  }
  func.func @transform_7(%arg0: i32) -> (i32, i32, i32) {
    %c0_i32 = arith.constant 0 : i32
    %c0_i32_0 = arith.constant 0 : i32
    %c0_i32_1 = arith.constant 0 : i32
    return %arg0, %c0_i32, %c0_i32_0 : i32, i32, i32
  }
}

</mosaic_0001>

<bundles_post_ra>
// kernel: tpu_custom_call.1
= control target key start
LH: loop header
LB: loop body
LE: loop exit
PB: predicated region body
PF: predicated region fallthrough
CT: control target
= control target key end

     0   :  { %s8064_s24 = smov 0   ;;  %s10264_s0 = inlined_call_operand.vmem [shape: f32[2,256,32], index: 0, kind: input, shape index: {}]   ;;  %s10265_s1 = inlined_call_operand.vmem [shape: bf16[9,32,32], index: 1, kind: input, shape index: {}]   ;;  %s10266_s2 = inlined_call_operand.vmem [shape: f32[1,32], index: 2, kind: input, shape index: {}]   ;;  %s10267_s3 = inlined_call_operand.vmem [shape: bf16[9,32,32], index: 3, kind: input, shape index: {}]   ;;  %s10268_s4 = inlined_call_operand.vmem [shape: f32[1,32], index: 4, kind: input, shape index: {}]   ;;  %s10269_s5 = inlined_call_operand.vmem [shape: f32[2,32], index: 5, kind: input, shape index: {}]   ;;  %s10270_s6 = inlined_call_operand.vmem [shape: f32[2,32], index: 6, kind: input, shape index: {}]   ;;  %s10271_s7 = inlined_call_operand.vmem [shape: f32[2,256,32], index: 7, kind: output, shape index: {}]  }
   0x1 LB: > { %s6040_s25 = sadd.s32 4294967295, %s8021_s24   ;;  %p6044_p0 = scmp.ge.s32.totalorder %s8021_s24, 1  ;;  %s8021_s24 = sphi %s8064_s24, %s17_s24  }
   0x2   : > { %p237_p1 = scmp.lt.s32.totalorder %s8021_s24, 3 }
   0x4   : > { %p238_p2 = pnand %p6044_p0, %p237_p1 }
   0x6   : > { %241 = sbr.rel (%p238_p2) target bundleno = 1805 (0x70d), region = 48 }
   0xd   : > { %v7973_v0 = vld [vmem:[%s10265_s1 + $0x30] sm:$0xff]   ;;  %p269_p3 = scmp.lt.s32.totalorder %s6040_s25, 1  ;;  %v285_v1 = vlaneseq  ;;  %v7974_v2 = vld [vmem:[%s10265_s1 + $0x38] sm:$0xff]   ;;  %vm280_vm0 = vcmask 261120   ;;  %v10273_v4 = vmov 0.0   ;;  %v8095_v6 = vld [vmem:[%s10265_s1] sm:$0xff]  }
   0xe   : > { %6804 = vmatprep.subr.bf16.mxu0 %v7973_v0  ;;  %282 = vst.msk [vmem:[#allocation2 + $0x8] sm:$0xff] %vm280_vm0, %v10273_v4  ;;  %281 = vst.msk [vmem:[#allocation2] sm:$0xff] %vm280_vm0, %v10273_v4  ;;  %v7976_v30 = vld [vmem:[%s10265_s1 + $0x8] sm:$0xff]  }
   0xf   : > { %s10437_s25 = smov (!%p269_p3, %s6040_s25), 1  ;;  %v8080_v3 = vshrl.u32 %v285_v1, 7  ;;  %6805 = vmatpush3.bf16.msra.mxu0 %v7973_v0  ;;  %283 = vst.msk [vmem:[#allocation2 + $0x110] sm:$0xff] %vm280_vm0, %v10273_v4  ;;  %284 = vst.msk [vmem:[#allocation2 + $0x118] sm:$0xff] %vm280_vm0, %v10273_v4 }
  0x10   : > { %6806 = vmatprep.subr.bf16.mxu0 %v7974_v2  ;;  %s6478_s30 = sshll.u32 %s10437_s25, 8 }
  0x11   : > { %v288_v5 = vadd.s32 16, %v8080_v3  ;;  %v290_v7 = vadd.s32 32, %v8080_v3  ;;  %v292_v8 = vadd.s32 48, %v8080_v3  ;;  %s8104_s12 = scalar_lea.vmem %s10264_s0, %s6478_s30  ;;  %v8110_v12 = vadd.s32 64, %v8080_v3  ;;  %s10149_s13 = scalar_lea.vmem %s10271_s7, %s6478_s30 }
  0x12   : > { %v970_v9 = vld [vmem:[%s8104_s12] sm:$0xff]  ;;  %v971_v10 = vld [vmem:[%s8104_s12 + $0x8] sm:$0xff]  ;;  %v972_v11 = vld [vmem:[%s8104_s12 + $0x10] sm:$0xff]  ;;  %v296_v21 = vadd.s32 80, %v8080_v3  ;;  %v8131_v24 = vadd.s32 96, %v8080_v3  ;;  %vm1106_vm4 = vcmp.lt.s32.totalorder %v8080_v3, 1 }
  0x13   : > { %6807 = vmatpush3.bf16.msra.mxu0 %v7974_v2  ;;  %v340_v13 = vand.u32 15, %v288_v5  ;;  %1002 = vst.msk [vmem:[#allocation2 + $0x10] sm:$0xff] %vm280_vm0, %v970_v9  ;;  %1003 = vst.msk [vmem:[#allocation2 + $0x18] sm:$0xff] %vm280_vm0, %v971_v10  ;;  %v354_v14 = vand.u32 15, %v290_v7  ;;  %v973_v15 = vld [vmem:[%s8104_s12 + $0x18] sm:$0xff]  ;;  %v368_v16 = vand.u32 15, %v292_v8 }
  0x14   : > { %1004 = vst.msk [vmem:[#allocation2 + $0x20] sm:$0xff] %vm280_vm0, %v972_v11  ;;  %v974_v17 = vld [vmem:[%s8104_s12 + $0x20] sm:$0xff]  ;;  %v975_v18 = vld [vmem:[%s8104_s12 + $0x28] sm:$0xff]  ;;  %6840 = vmatprep.subr.bf16.mxu0 %v8095_v6  ;;  %1005 = vst.msk [vmem:[#allocation2 + $0x28] sm:$0xff] %vm280_vm0, %v973_v15  ;;  %v382_v31 = vand.u32 15, %v8110_v12  ;;  %v396_v34 = vand.u32 15, %v296_v21 }
  0x15   : > { %1006 = vst.msk [vmem:[#allocation2 + $0x30] sm:$0xff] %vm280_vm0, %v974_v17  ;;  %1007 = vst.msk [vmem:[#allocation2 + $0x38] sm:$0xff] %vm280_vm0, %v975_v18  ;;  %v976_v19 = vld [vmem:[%s8104_s12 + $0x30] sm:$0xff]  ;;  %v977_v20 = vld [vmem:[%s8104_s12 + $0x38] sm:$0xff]  ;;  %vm8139_vm1 = vcmp.gt.s32.totalorder %v340_v13, 0  ;;  %vm8143_vm2 = vcmp.gt.s32.totalorder %v354_v14, 0 }
  0x16   : > { %v978_v22 = vld [vmem:[%s8104_s12 + $0x40] sm:$0xff]  ;;  %1008 = vst.msk [vmem:[#allocation2 + $0x40] sm:$0xff] %vm280_vm0, %v976_v19  ;;  %1009 = vst.msk [vmem:[#allocation2 + $0x48] sm:$0xff] %vm280_vm0, %v977_v20  ;;  %v979_v23 = vld [vmem:[%s8104_s12 + $0x48] sm:$0xff]  ;;  %vm8147_vm3 = vcmp.gt.s32.totalorder %v368_v16, 0  ;;  %v410_v39 = vand.u32 15, %v8131_v24 }
  0x17   : > { %1010 = vst.msk [vmem:[#allocation2 + $0x50] sm:$0xff] %vm280_vm0, %v978_v22  ;;  %v980_v25 = vld [vmem:[%s8104_s12 + $0x50] sm:$0xff]  ;;  %v8134_v26 = vld [vmem:[#allocation2 + $0x8] sm:$0xff]  ;;  %1011 = vst.msk [vmem:[#allocation2 + $0x58] sm:$0xff] %vm280_vm0, %v979_v23  ;;  %v8164_v40 = vadd.s32 112, %v8080_v3  ;;  %v8175_v44 = vsel %vm8139_vm1, 1.0, %v10273_v4 }
  0x18   : > { %v981_v27 = vld [vmem:[%s8104_s12 + $0x58] sm:$0xff]  ;;  %1012 = vst.msk [vmem:[#allocation2 + $0x60] sm:$0xff] %vm280_vm0, %v980_v25  ;;  %v982_v32 = vld [vmem:[%s8104_s12 + $0x60] sm:$0xff]  ;;  %v983_v33 = vld [vmem:[%s8104_s12 + $0x68] sm:$0xff]  ;;  %v10272_v38 = vrot.slane %v8134_v26, 7  ;;  %v8184_v47 = vsel %vm8143_vm2, 1.0, %v10273_v4 }
  0x19   : > { %1013 = vst.msk [vmem:[#allocation2 + $0x68] sm:$0xff] %vm280_vm0, %v981_v27  ;;  %1014 = vst.msk [vmem:[#allocation2 + $0x70] sm:$0xff] %vm280_vm0, %v982_v32  ;;  %v984_v35 = vld [vmem:[%s8104_s12 + $0x70] sm:$0xff]  ;;  %v985_v36 = vld [vmem:[%s8104_s12 + $0x78] sm:$0xff]  ;;  %v8191_v49 = vsel %vm8147_vm3, 1.0, %v10273_v4  ;;  %vm8204_vm5 = vcmp.gt.s32.totalorder %v382_v31, 0 }
  0x1a   : > { %1015 = vst.msk [vmem:[#allocation2 + $0x78] sm:$0xff] %vm280_vm0, %v983_v33  ;;  %v986_v37 = vld [vmem:[%s8104_s12 + $0x80] sm:$0xff]  ;;  %1016 = vst.msk [vmem:[#allocation2 + $0x80] sm:$0xff] %vm280_vm0, %v984_v35  ;;  %v987_v41 = vld [vmem:[%s8104_s12 + $0x88] sm:$0xff]  ;;  %vm8213_vm6 = vcmp.gt.s32.totalorder %v396_v34, 0  ;;  %v8247_v16 = vsel %vm8204_vm5, 1.0, %v10273_v4 }
  0x1b   : > { %1017 = vst.msk [vmem:[#allocation2 + $0x88] sm:$0xff] %vm280_vm0, %v985_v36  ;;  %1018 = vst.msk [vmem:[#allocation2 + $0x90] sm:$0xff] %vm280_vm0, %v986_v37  ;;  %v988_v42 = vld [vmem:[%s8104_s12 + $0x90] sm:$0xff]  ;;  %v989_v43 = vld [vmem:[%s8104_s12 + $0x98] sm:$0xff]  ;;  %v8266_v25 = vsel %vm8213_vm6, 1.0, %v10273_v4  ;;  %v424_v33 = vand.u32 15, %v8164_v40 }
  0x1c   : > { %10333 = vst [vmem:[#allocation3_spill] sm:$0xff] %v8175_v44  ;;  %v8177_v45 = vld [vmem:[#allocation2 + $0x10] sm:$0xff]  ;;  %v8179_v46 = vld [vmem:[#allocation2 + $0x18] sm:$0xff]  ;;  %10334 = vst [vmem:[#allocation4_spill] sm:$0xff] %v8184_v47  ;;  %vm8291_vm7 = vcmp.gt.s32.totalorder %v410_v39, 0  ;;  %v304_v55 = vadd.s32 144, %v8080_v3 }
  0x1d   : > { %v8186_v48 = vld [vmem:[#allocation2 + $0x20] sm:$0xff]  ;;  %10335 = vst [vmem:[#allocation5_spill] sm:$0xff] %v8191_v49  ;;  %1019 = vst.msk [vmem:[#allocation2 + $0x98] sm:$0xff] %vm280_vm0, %v987_v41  ;;  %v1072_v50 = vrot.slane %v8177_v45, 7  ;;  %v1073_v51 = vrot.slane %v8179_v46, 7  ;;  %v8198_v52 = vld [vmem:[#allocation2 + $0x28] sm:$0xff] }
  0x1e   : > { %1020 = vst.msk [vmem:[#allocation2 + $0xa0] sm:$0xff] %vm280_vm0, %v988_v42  ;;  %1021 = vst.msk [vmem:[#allocation2 + $0xa8] sm:$0xff] %vm280_vm0, %v989_v43  ;;  %v8200_v53 = vld [vmem:[#allocation2 + $0x30] sm:$0xff]  ;;  %v8202_v54 = vld [vmem:[#allocation2 + $0x38] sm:$0xff]  ;;  %v1074_v56 = vrot.slane %v8186_v48, 7  ;;  %v1075_v57 = vrot.slane %v8198_v52, 7 }
  0x1f   : > { %v1076_v58 = vrot.slane %v8200_v53, 7  ;;  %v8211_v59 = vld [vmem:[#allocation2 + $0x40] sm:$0xff]  ;;  %v1139_v61 = vsel %vm1106_vm4, %v1072_v50, %v1073_v51  ;;  %v1140_v62 = vsel %vm1106_vm4, %v10272_v38, %v1072_v50  ;;  %v1077_v63 = vrot.slane %v8202_v54, 7  ;;  %v8224_v0 = vld [vmem:[#allocation2 + $0x48] sm:$0xff]  ;;  %v8227_v2 = vld [vmem:[#allocation2 + $0x50] sm:$0xff]  ;;  %10340 = vst [vmem:[#allocation6_spill] sm:$0xff] %v8247_v16 }
  0x20   : > { %v1078_v1 = vrot.slane %v8211_v59, 7  ;;  %v1145_v5 = vmul.f32 %v8175_v44, %v1140_v62  ;;  %v1137_v7 = vsel %vm1106_vm4, %v1074_v56, %v1075_v57  ;;  %v1138_v8 = vsel %vm1106_vm4, %v1073_v51, %v1074_v56  ;;  %v8236_v10 = vld [vmem:[#allocation2 + $0x58] sm:$0xff]  ;;  %v990_v11 = vld [vmem:[%s8104_s12 + $0xa0] sm:$0xff]  ;;  %v991_v12 = vld [vmem:[%s8104_s12 + $0xa8] sm:$0xff]  ;;  %10341 = vst [vmem:[#allocation7_spill] sm:$0xff] %v8266_v25 }
  0x21   : > { %v1136_v9 = vsel %vm1106_vm4, %v1075_v57, %v1076_v58  ;;  %v1147_v13 = vmul.f32 %v8184_v47, %v1138_v8  ;;  %v1135_v14 = vsel %vm1106_vm4, %v1076_v58, %v1077_v63  ;;  %1022 = vst.msk [vmem:[#allocation2 + $0xb0] sm:$0xff] %vm280_vm0, %v990_v11  ;;  %1023 = vst.msk [vmem:[#allocation2 + $0xb8] sm:$0xff] %vm280_vm0, %v991_v12  ;;  %v992_v17 = vld [vmem:[%s8104_s12 + $0xb0] sm:$0xff]  ;;  %v1079_v19 = vrot.slane %v8224_v0, 7  ;;  %v8269_v28 = vld [vmem:[#allocation2 + $0x60] sm:$0xff] }
  0x22   : > { %v1149_v15 = vmul.f32 %v8191_v49, %v1136_v9  ;;  %v8252_v18 = vpack.c.bf16 %v1139_v61, %v1145_v5  ;;  %v1134_v20 = vsel %vm1106_vm4, %v1077_v63, %v1078_v1  ;;  %v1080_v21 = vrot.slane %v8227_v2, 7  ;;  %1024 = vst.msk [vmem:[#allocation2 + $0xc0] sm:$0xff] %vm280_vm0, %v992_v17  ;;  %v8271_v29 = vld [vmem:[#allocation2 + $0x70] sm:$0xff]  ;;  %v8280_v32 = vld [vmem:[#allocation2 + $0x68] sm:$0xff]  ;;  %v993_v34 = vld [vmem:[%s8104_s12 + $0xb8] sm:$0xff] }
  0x23   : > { %v8259_v22 = vpack.c.bf16 %v1137_v7, %v1147_v13  ;;  %v1081_v27 = vrot.slane %v8236_v10, 7  ;;  %v994_v35 = vld [vmem:[%s8104_s12 + $0xc0] sm:$0xff]  ;;  %v995_v36 = vld [vmem:[%s8104_s12 + $0xc8] sm:$0xff]  ;;  %v1151_v37 = vmul.f32 %v8247_v16, %v1134_v20  ;;  %v302_v42 = vadd.s32 128, %v8080_v3  ;;  %1025 = vst.msk [vmem:[#allocation2 + $0xc8] sm:$0xff] %vm280_vm0, %v993_v34  ;;  %v996_v40 = vld [vmem:[%s8104_s12 + $0xd0] sm:$0xff] }
  0x24   : > { %v8261_v23 = vpack.c.bf16 %v1135_v14, %v1149_v15  ;;  %6808 = vmatprep.mubr.msk.bf16.mxu0 %vm280_vm0, %v8252_v18  ;;  %v1132_v31 = vsel %vm1106_vm4, %v1079_v19, %v1080_v21  ;;  %1026 = vst.msk [vmem:[#allocation2 + $0xd0] sm:$0xff] %vm280_vm0, %v994_v35  ;;  %1027 = vst.msk [vmem:[#allocation2 + $0xd8] sm:$0xff] %vm280_vm0, %v995_v36  ;;  %v997_v43 = vld [vmem:[%s8104_s12 + $0xd8] sm:$0xff]  ;;  %v998_v50 = vld [vmem:[%s8104_s12 + $0xe0] sm:$0xff]  ;;  %v1133_v24 = vsel %vm1106_vm4, %v1078_v1, %v1079_v19 }
  0x25   : > { %6809 = vmatmul.mubr.msk.bf16.vlgmr.msra.gmra.mrb[0].mxu0 %vm280_vm0, %v8259_v22  ;;  %v1153_v39 = vmul.f32 %v8266_v25, %v1132_v31  ;;  %v1082_v51 = vrot.slane %v8269_v28, 7  ;;  %1028 = vst.msk [vmem:[#allocation2 + $0xe0] sm:$0xff] %vm280_vm0, %v996_v40  ;;  %1029 = vst.msk [vmem:[#allocation2 + $0xe8] sm:$0xff] %vm280_vm0, %v997_v43  ;;  %v999_v56 = vld [vmem:[%s8104_s12 + $0xe8] sm:$0xff]  ;;  %v1001_v57 = vld [vmem:[%s8104_s12 + $0xf8] sm:$0xff]  ;;  %v1131_v58 = vsel %vm1106_vm4, %v1080_v21, %v1081_v27  ;;  %v1084_v60 = vrot.slane %v8271_v29, 7 }
  0x26   : > { %6841 = vmatpush3.bf16.msra.mxu0 %v8095_v6  ;;  %6812 = vmatprep.mubr.msk.bf16.mxu0 %vm280_vm0, %v8261_v23  ;;  %1030 = vst.msk [vmem:[#allocation2 + $0xf0] sm:$0xff] %vm280_vm0, %v998_v50  ;;  %v1000_v6 = vld [vmem:[%s8104_s12 + $0xf0] sm:$0xff]  ;;  %1031 = vst.msk [vmem:[#allocation2 + $0xf8] sm:$0xff] %vm280_vm0, %v999_v56  ;;  %vm768_vm8 = vcmp.gt.s32.totalorder %v424_v33, 0  ;;  %v8322_v61 = vld [vmem:[#allocation2 + $0x78] sm:$0xff]  ;;  %v8329_v63 = vpack.c.bf16 %v1133_v24, %v1151_v37  ;;  %v8334_v1 = vsel %vm8291_vm7, 1.0, %v10273_v4 }
  0x27   : > { %6842 = vmatprep.subr.bf16.mxu0 %v7976_v30  ;;  %1032 = vst.msk [vmem:[#allocation2 + $0x100] sm:$0xff] %vm280_vm0, %v1000_v6  ;;  %1033 = vst.msk [vmem:[#allocation2 + $0x108] sm:$0xff] %vm280_vm0, %v1001_v57  ;;  %v8327_v62 = vld [vmem:[%s10265_s1 + $0x60] sm:$0xff]   ;;  %v1083_v5 = vrot.slane %v8280_v32, 7  ;;  %v438_v7 = vand.u32 15, %v302_v42  ;;  %v8337_v8 = vpack.c.bf16 %v1131_v58, %v1153_v39  ;;  %v1130_v9 = vsel %vm1106_vm4, %v1081_v27, %v1082_v51  ;;  %v8349_v17 = vld [vmem:[#allocation2 + $0x90] sm:$0xff] }
  0x28   : > { %10344 = vst [vmem:[#allocation8_spill] sm:$0xff] %v8334_v1  ;;  %v8341_v11 = vld [vmem:[#allocation2 + $0x80] sm:$0xff]  ;;  %v452_v12 = vand.u32 15, %v304_v55  ;;  %v8344_v13 = vsel %vm768_vm8, 1.0, %v10273_v4  ;;  %v1085_v14 = vrot.slane %v8322_v61, 7  ;;  %v306_v19 = vadd.s32 160, %v8080_v3 }
  0x29   : > { %10345 = vst [vmem:[#allocation9_spill] sm:$0xff] %v8344_v13  ;;  %v1128_v15 = vsel %vm1106_vm4, %v1083_v5, %v1084_v60  ;;  %v1129_v20 = vsel %vm1106_vm4, %v1082_v51, %v1083_v5  ;;  %v1155_v21 = vmul.f32 %v8334_v1, %v1130_v9  ;;  %v8358_v27 = vld [vmem:[#allocation2 + $0x88] sm:$0xff]  ;;  %v308_v31 = vadd.s32 176, %v8080_v3  ;;  %v8368_v36 = vld [vmem:[#allocation2 + $0x98] sm:$0xff]  ;;  %v8371_v42 = vld [vmem:[#allocation2 + $0xa0] sm:$0xff] }
  0x2a   : > { %6843 = vmatpush3.bf16.msra.mxu0 %v7976_v30  ;;  %v1086_v30 = vrot.slane %v8341_v11, 7  ;;  %v1157_v33 = vmul.f32 %v8344_v13, %v1128_v15  ;;  %vm770_vm9 = vcmp.gt.s32.totalorder %v438_v7, 0  ;;  %vm772_vm10 = vcmp.gt.s32.totalorder %v452_v12, 0  ;;  %v8390_v57 = vld [vmem:[#allocation2 + $0xa8] sm:$0xff]  ;;  %v8401_v15 = vld [vmem:[#allocation2 + $0xb8] sm:$0xff] }
  0x2b   : > { %6876 = vmatprep.subr.bf16.mxu0 %v8327_v62  ;;  %v1088_v34 = vrot.slane %v8349_v17, 7  ;;  %v1127_v35 = vsel %vm1106_vm4, %v1084_v60, %v1085_v14  ;;  %v466_v37 = vand.u32 15, %v306_v19  ;;  %v1087_v41 = vrot.slane %v8358_v27, 7  ;;  %v8392_v60 = vld [vmem:[#allocation2 + $0xb0] sm:$0xff]  ;;  %v8403_v19 = vld [vmem:[#allocation2 + $0xc0] sm:$0xff] }
  0x2c   : > { %v310_v40 = vadd.s32 192, %v8080_v3  ;;  %v8374_v43 = vpack.c.bf16 %v1129_v20, %v1155_v21  ;;  %v8377_v50 = vsel %vm770_vm9, 1.0, %v10273_v4  ;;  %v1126_v24 = vsel %vm1106_vm4, %v1085_v14, %v1086_v30 }
  0x2d   : > { %6813 = vmatmul.mubr.msk.bf16.gmra.mrb[4].mxu0 %vm280_vm0, %v8329_v63  ;;  %10346 = vst [vmem:[#allocation10_spill] sm:$0xff] %v8377_v50  ;;  %v8382_v39 = vsel %vm772_vm10, 1.0, %v10273_v4  ;;  %v8384_v51 = vpack.c.bf16 %v1127_v35, %v1157_v33  ;;  %v1089_v55 = vrot.slane %v8368_v36, 7  ;;  %v1124_v56 = vsel %vm1106_vm4, %v1087_v41, %v1088_v34 }
  0x2e   : > { %6816 = vmatprep.mubr.msk.bf16.mxu0 %vm280_vm0, %v8337_v8  ;;  %10347 = vst [vmem:[#allocation11_spill] sm:$0xff] %v8382_v39  ;;  %v312_v6 = vadd.s32 208, %v8080_v3  ;;  %vm774_vm11 = vcmp.gt.s32.totalorder %v466_v37, 0  ;;  %v480_v58 = vand.u32 15, %v308_v31  ;;  %v494_v5 = vand.u32 15, %v310_v40  ;;  %v8413_v31 = vld [vmem:[#allocation2 + $0xc8] sm:$0xff] }
  0x2f   : > { %v1125_v7 = vsel %vm1106_vm4, %v1086_v30, %v1087_v41  ;;  %v1159_v9 = vmul.f32 %v8377_v50, %v1126_v24  ;;  %v1161_v12 = vmul.f32 %v8382_v39, %v1124_v56  ;;  %v1090_v14 = vrot.slane %v8371_v42, 7  ;;  %v8416_v37 = vld [vmem:[#allocation2 + $0xd0] sm:$0xff]  ;;  %v8418_v41 = vld [vmem:[#allocation2 + $0xd8] sm:$0xff]  ;;  %v8421_v24 = vld [vmem:[#allocation2 + $0xe0] sm:$0xff] }
  0x30   : > { %v1123_v20 = vsel %vm1106_vm4, %v1088_v34, %v1089_v55  ;;  %v8410_v21 = vsel %vm774_vm11, 1.0, %v10273_v4  ;;  %v1091_v30 = vrot.slane %v8390_v57, 7  ;;  %v508_v33 = vand.u32 15, %v312_v6  ;;  %10349 = vst [vmem:[#allocation13_spill] sm:$0xff] %v8418_v41  ;;  %10350 = vst [vmem:[#allocation14_spill] sm:$0xff] %v8421_v24  ;;  %v8423_v34 = vld [vmem:[#allocation2 + $0xe8] sm:$0xff] }
  0x31   : > { %10348 = vst [vmem:[#allocation12_spill] sm:$0xff] %v8410_v21  ;;  %vm776_vm12 = vcmp.gt.s32.totalorder %v480_v58, 0  ;;  %v1092_v35 = vrot.slane %v8392_v60, 7  ;;  %v314_v40 = vadd.s32 224, %v8080_v3  ;;  %vm778_vm13 = vcmp.gt.s32.totalorder %v494_v5, 0  ;;  %10351 = vst [vmem:[#allocation15_spill] sm:$0xff] %v8423_v34 }
  0x32   : > { %v316_v56 = vadd.s32 240, %v8080_v3  ;;  %v8426_v38 = vpack.c.bf16 %v1125_v7, %v1159_v9  ;;  %v8428_v4 = vpack.c.bf16 %v1123_v20, %v1161_v12  ;;  %v1122_v6 = vsel %vm1106_vm4, %v1089_v55, %v1090_v14  ;;  %v8433_v39 = vld [vmem:[#allocation2 + $0xf0] sm:$0xff] }
  0x33   : > { %v1093_v58 = vrot.slane %v8401_v15, 7  ;;  %v10352_v50 = vmov 0.0   ;;  %v1094_v5 = vrot.slane %v8403_v19, 7  ;;  %v1095_v1 = vrot.slane %v8413_v31, 7 }
  0x34   : > { %v8436_v13 = vsel %vm776_vm12, 1.0, %v10352_v50  ;;  %vm780_vm14 = vcmp.gt.s32.totalorder %v508_v33, 0  ;;  %v1120_v7 = vsel %vm1106_vm4, %v1091_v30, %v1092_v35  ;;  %v8443_v9 = vsel %vm778_vm13, 1.0, %v10352_v50 }
  0x35   : > { %6817 = vmatmul.mubr.msk.bf16.gmra.mrb[8].mxu0 %vm280_vm0, %v8374_v43  ;;  %10353 = vst [vmem:[#allocation16_spill] sm:$0xff] %v8436_v13  ;;  %10354 = vst [vmem:[#allocation17_spill] sm:$0xff] %v8443_v9  ;;  %v522_v12 = vand.u32 15, %v314_v40  ;;  %v1096_v55 = vrot.slane %v8416_v37, 7  ;;  %v1097_v20 = vrot.slane %v8418_v41, 7  ;;  %v1098_v25 = vrot.slane %v8421_v24, 7 }
  0x36   : > { %6820 = vmatprep.mubr.msk.bf16.mxu0 %vm280_vm0, %v8384_v51  ;;  %v536_v16 = vand.u32 15, %v316_v56  ;;  %v1163_v49 = vmul.f32 %v8410_v21, %v1122_v6  ;;  %v8452_v33 = vsel %vm780_vm14, 1.0, %v10352_v50  ;;  %v1099_v47 = vrot.slane %v8423_v34, 7 }
  0x37   : > { %10355 = vst [vmem:[#allocation18_spill] sm:$0xff] %v8452_v33  ;;  %v1121_v40 = vsel %vm1106_vm4, %v1090_v14, %v1091_v30  ;;  %v1165_v44 = vmul.f32 %v8436_v13, %v1120_v7  ;;  %v1100_v56 = vrot.slane %v8433_v39, 7  ;;  %v318_v24 = vadd.s32 256, %v8080_v3 }
  0x38   : > { %v1119_v6 = vsel %vm1106_vm4, %v1092_v35, %v1093_v58  ;;  %vm782_vm15 = vcmp.gt.s32.totalorder %v522_v12, 0  ;;  %vm8464_vm1 = vcmp.gt.s32.totalorder %v536_v16, 0  ;;  %v8468_v34 = vpack.c.bf16 %v1121_v40, %v1163_v49  ;;  %v8484_v16 = vld [vmem:[#allocation2 + $0xf8] sm:$0xff] }
  0x39   : > { %v8470_v41 = vpack.c.bf16 %v1119_v6, %v1165_v44  ;;  %v1118_v14 = vsel %vm1106_vm4, %v1093_v58, %v1094_v5  ;;  %v1116_v30 = vsel %vm1106_vm4, %v1095_v1, %v1096_v55  ;;  %v1117_v49 = vsel %vm1106_vm4, %v1094_v5, %v1095_v1  ;;  %10358 = vst [vmem:[#allocation19_spill] sm:$0xff] %v8484_v16 }
  0x3a   : > { %v1167_v35 = vmul.f32 %v8443_v9, %v1118_v14  ;;  %v1169_v44 = vmul.f32 %v8452_v33, %v1116_v30  ;;  %v1115_v58 = vsel %vm1106_vm4, %v1096_v55, %v1097_v20  ;;  %v8493_v40 = vsel %vm782_vm15, 1.0, %v10352_v50  ;;  %v8505_v30 = vld [vmem:[#allocation2 + $0x100] sm:$0xff]  ;;  %v8523_v9 = vld [vmem:[#allocation2 + $0x108] sm:$0xff] }
  0x3b   : > { %10359 = vst [vmem:[#allocation20_spill] sm:$0xff] %v8493_v40  ;;  %v1114_v6 = vsel %vm1106_vm4, %v1097_v20, %v1098_v25  ;;  %v8500_v1 = vsel %vm8464_vm1, 1.0, %v10352_v50  ;;  %v1101_v5 = vrot.slane %v8484_v16, 7  ;;  %v1112_v55 = vsel %vm1106_vm4, %v1099_v47, %v1100_v56  ;;  %10362 = vst [vmem:[#allocation23_spill] sm:$0xff] %v8523_v9 }
  0x3c   : > { %v8488_v7 = vpack.c.bf16 %v1117_v49, %v1167_v35  ;;  %v8490_v12 = vpack.c.bf16 %v1115_v58, %v1169_v44  ;;  %10360 = vst [vmem:[#allocation21_spill] sm:$0xff] %v8500_v1  ;;  %v550_v14 = vand.u32 15, %v318_v24  ;;  %v326_v35 = vand.u32 15, %v8080_v3  ;;  %v8508_v49 = vld [vmem:[#allocation2] sm:$0xff]  ;;  %v8510_v44 = vld [vmem:[#allocation2 + $0x118] sm:$0xff] }
  0x3d   : > { %6821 = vmatmul.mubr.msk.bf16.gmra.mrb[12].mxu0 %vm280_vm0, %v8426_v38  ;;  %10361 = vst [vmem:[#allocation22_spill] sm:$0xff] %v8510_v44  ;;  %v1171_v21 = vmul.f32 %v8493_v40, %v1114_v6  ;;  %v1113_v20 = vsel %vm1106_vm4, %v1098_v25, %v1099_v47  ;;  %v1173_v24 = vmul.f32 %v8500_v1, %v1112_v55  ;;  %v1102_v58 = vrot.slane %v8505_v30, 7 }
  0x3e   : > { %6824 = vmatprep.mubr.msk.bf16.mxu0 %vm280_vm0, %v8428_v4  ;;  %v1111_v33 = vsel %vm1106_vm4, %v1100_v56, %v1101_v5  ;;  %vm786_vm2 = vcmp.gt.s32.totalorder %v550_v14, 0  ;;  %v1070_v13 = vrot.slane %v8508_v49, 7  ;;  %v1105_v6 = vrot.slane %v8510_v44, 7 }
  0x3f   : > { %vm754_vm3 = vcmp.gt.s32.totalorder %v326_v35, 0  ;;  %v8527_v40 = vpack.c.bf16 %v1113_v20, %v1171_v21  ;;  %v8529_v16 = vpack.c.bf16 %v1111_v33, %v1173_v24  ;;  %v8532_v47 = vsel %vm786_vm2, 1.0, %v10352_v50  ;;  %v8546_v20 = vld [vmem:[#allocation2 + $0x110] sm:$0xff] }
  0x40   : > { %10363 = vst [vmem:[#allocation24_spill] sm:$0xff] %v8532_v47  ;;  %v1103_v25 = vrot.slane %v8523_v9, 7  ;;  %v1110_v56 = vsel %vm1106_vm4, %v1101_v5, %v1102_v58  ;;  %v8538_v55 = vsel %vm754_vm3, 1.0, %v10352_v50  ;;  %v1142_v14 = vsel %vm1106_vm4, %v1105_v6, %v1070_v13  ;;  %10365 = vst [vmem:[#allocation26_spill] sm:$0xff] %v8546_v20 }
  0x41   : > { %10364 = vst [vmem:[#allocation25_spill] sm:$0xff] %v8538_v55  ;;  %v320_v35 = vadd.s32 272, %v8080_v3  ;;  %v1175_v33 = vmul.f32 %v8532_v47, %v1110_v56  ;;  %v1143_v24 = vmul.f32 %v8538_v55, %v1142_v14  ;;  %v1104_v1 = vrot.slane %v8546_v20, 7 }
  0x42   : > { %v1109_v5 = vsel %vm1106_vm4, %v1102_v58, %v1103_v25  ;;  %v10366_v44 = vrot.slane %v8134_v26, 7  ;;  %vm2554_vm7 = vcmp.lt.s32.totalorder %v8080_v3, 7 }
  0x43   : > { %v564_v21 = vand.u32 15, %v320_v35  ;;  %v1107_v35 = vsel %vm1106_vm4, %v1104_v1, %v1105_v6  ;;  %v1108_v47 = vsel %vm1106_vm4, %v1103_v25, %v1104_v1  ;;  %v1195_v58 = vpack.c.bf16 %v1109_v5, %v1175_v33  ;;  %v10369_v25 = vld [vmem:[#allocation15_spill] sm:$0xff] }
  0x44   : > { %v1141_v9 = vsel %vm1106_vm4, %v1070_v13, %v10366_v44  ;;  %v7978_v13 = vld [vmem:[%s10265_s1 + $0x68] sm:$0xff]   ;;  %v1828_v1 = vpack.c.bf16 %v8413_v31, %v8403_v19  ;;  %v10367_v44 = vld [vmem:[#allocation13_spill] sm:$0xff]  ;;  %v10370_v33 = vld [vmem:[#allocation19_spill] sm:$0xff] }
  0x45   : > { %6825 = vmatmul.mubr.msk.bf16.gmra.mrb[16].mxu0 %vm280_vm0, %v8468_v34  ;;  %vm788_vm5 = vcmp.gt.s32.totalorder %v564_v21, 0  ;;  %v1179_v55 = vpack.c.bf16 %v1141_v9, %v1143_v24  ;;  %v7979_v9 = vld [vmem:[%s10265_s1 + $0x10] sm:$0xff]   ;;  %v1829_v6 = vpack.c.bf16 %v10367_v44, %v8416_v37  ;;  %v1831_v21 = vpack.c.bf16 %v10370_v33, %v8433_v39  ;;  %v7985_v5 = vld [vmem:[%s10265_s1 + $0x20] sm:$0xff]  }
  0x46   : > { %6828 = vmatprep.mubr.msk.bf16.mxu0 %vm280_vm0, %v8470_v41  ;;  %v8559_v56 = vsel %vm788_vm5, 1.0, %v10352_v50  ;;  %v10371_v24 = vld [vmem:[#allocation23_spill] sm:$0xff] }
  0x47   : > { %v1177_v14 = vmul.f32 %v8559_v56, %v1108_v47  ;;  %v10368_v47 = vld [vmem:[#allocation14_spill] sm:$0xff] }
  0x49   : > { %v1196_v20 = vpack.c.bf16 %v1107_v35, %v1177_v14  ;;  %v1832_v35 = vpack.c.bf16 %v10371_v24, %v8505_v30  ;;  %v8728_v14 = vld [vmem:[%s10265_s1 + $0x50] sm:$0xff]  }
  0x4d   : > { %6829 = vmatmul.mubr.msk.bf16.gmra.mrb[20].mxu0 %vm280_vm0, %v8488_v7 }
  0x4e   : > { %6832 = vmatprep.mubr.msk.bf16.mxu0 %vm280_vm0, %v8490_v12 }
  0x55   : > { %6833 = vmatmul.mubr.msk.bf16.gmra.mrb[24].mxu0 %vm280_vm0, %v8527_v40 }
  0x56   : > { %6836 = vmatprep.mubr.msk.bf16.mxu0 %vm280_vm0, %v8529_v16 }
  0x5d   : > { %6837 = vmatmul.mubr.msk.bf16.gmra.mrb[28].mxu0 %vm280_vm0, %v1195_v58 }
  0x5e   : > { %6844 = vmatprep.mubr.msk.bf16.mxu0 %vm280_vm0, %v1179_v55  ;;  %v1830_v55 = vpack.c.bf16 %v10369_v25, %v10368_v47 }
  0x65   : > { %6845 = vmatmul.mubr.msk.bf16.vlgmr.msra.gmra.mrb[0].mxu0 %vm280_vm0, %v8252_v18  ;;  %v7980_v18 = vld [vmem:[%s10265_s1 + $0x18] sm:$0xff]  }
  0x66   : > { %6877 = vmatpush3.bf16.msra.mxu0 %v8327_v62  ;;  %6848 = vmatprep.mubr.msk.bf16.mxu0 %vm280_vm0, %v8259_v22  ;;  %v7981_v62 = vld [vmem:[%s10265_s1 + $0x40] sm:$0xff]  }
  0x67   : > { %6878 = vmatprep.subr.bf16.mxu0 %v7978_v13 }
  0x6a   : > { %6879 = vmatpush3.bf16.msra.mxu0 %v7978_v13  ;;  %v287_v13 = vadd.s32 8, %v8080_v3 }
  0x6b   : > { %6912 = vmatprep.subr.bf16.mxu0 %v7979_v9 }
  0x6d   : > { %6849 = vmatmul.mubr.msk.bf16.gmra.mrb[4].mxu0 %vm280_vm0, %v8261_v23 }
  0x6e   : > { %6852 = vmatprep.mubr.msk.bf16.mxu0 %vm280_vm0, %v8329_v63 }
  0x75   : > { %6853 = vmatmul.mubr.msk.bf16.gmra.mrb[8].mxu0 %vm280_vm0, %v8337_v8 }
  0x76   : > { %6856 = vmatprep.mubr.msk.bf16.mxu0 %vm280_vm0, %v8374_v43 }
  0x7d   : > { %6857 = vmatmul.mubr.msk.bf16.gmra.mrb[12].mxu0 %vm280_vm0, %v8384_v51 }
  0x7e   : > { %6860 = vmatprep.mubr.msk.bf16.mxu0 %vm280_vm0, %v8426_v38 }
  0x85   : > { %6861 = vmatmul.mubr.msk.bf16.gmra.mrb[16].mxu0 %vm280_vm0, %v8428_v4 }
  0x86   : > { %6864 = vmatprep.mubr.msk.bf16.mxu0 %vm280_vm0, %v8468_v34 }
  0x8d   : > { %6865 = vmatmul.mubr.msk.bf16.gmra.mrb[20].mxu0 %vm280_vm0, %v8470_v41 }
  0x8e   : > { %6868 = vmatprep.mubr.msk.bf16.mxu0 %vm280_vm0, %v8488_v7 }
  0x95   : > { %6869 = vmatmul.mubr.msk.bf16.gmra.mrb[24].mxu0 %vm280_vm0, %v8490_v12 }
  0x96   : > { %6872 = vmatprep.mubr.msk.bf16.mxu0 %vm280_vm0, %v8527_v40 }
  0x9d   : > { %6873 = vmatmul.mubr.msk.bf16.gmra.mrb[28].mxu0 %vm280_vm0, %v8529_v16 }
  0x9e   : > { %6880 = vmatprep.mubr.msk.bf16.mxu0 %vm280_vm0, %v8259_v22  ;;  %v1818_v22 = vpack.c.bf16 %v8198_v52, %v8186_v48 }
  0xa5   : > { %6881 = vmatmul.mubr.msk.bf16.vlgmr.msra.gmra.mrb[0].mxu0 %vm280_vm0, %v8261_v23  ;;  %v7982_v23 = vld [vmem:[%s10265_s1 + $0x48] sm:$0xff]  }
  0xa6   : > { %6913 = vmatpush3.bf16.msra.mxu0 %v7979_v9  ;;  %6884 = vmatprep.mubr.msk.bf16.mxu0 %vm280_vm0, %v8329_v63  ;;  %v7983_v63 = vld [vmem:[%s10265_s1 + $0x70] sm:$0xff]   ;;  %v333_v9 = vand.u32 15, %v287_v13 }
  0xa7   : > { %6914 = vmatprep.subr.bf16.mxu0 %v7980_v18 }
  0xa8   : > { %vm863_vm6 = vcmp.lt.s32.totalorder %v333_v9, 15  ;;  %v2525_v9 = vrot.slane %v8202_v54, 1 }
  0xaa   : > { %6915 = vmatpush3.bf16.msra.mxu0 %v7980_v18  ;;  %v2519_v18 = vrot.slane %v8134_v26, 1 }
  0xab   : > { %6948 = vmatprep.subr.bf16.mxu0 %v7981_v62 }
  0xad   : > { %6885 = vmatmul.mubr.msk.bf16.gmra.mrb[4].mxu0 %vm280_vm0, %v8337_v8  ;;  %v1819_v8 = vpack.c.bf16 %v8202_v54, %v8200_v53 }
  0xae   : > { %6888 = vmatprep.mubr.msk.bf16.mxu0 %vm280_vm0, %v8374_v43  ;;  %v1820_v43 = vpack.c.bf16 %v8224_v0, %v8211_v59 }
  0xb5   : > { %6889 = vmatmul.mubr.msk.bf16.gmra.mrb[8].mxu0 %vm280_vm0, %v8384_v51  ;;  %v1821_v51 = vpack.c.bf16 %v8236_v10, %v8227_v2 }
  0xb6   : > { %6892 = vmatprep.mubr.msk.bf16.mxu0 %vm280_vm0, %v8426_v38  ;;  %v1817_v38 = vpack.c.bf16 %v8179_v46, %v8177_v45 }
  0xbd   : > { %6893 = vmatmul.mubr.msk.bf16.gmra.mrb[12].mxu0 %vm280_vm0, %v8428_v4  ;;  %v1816_v4 = vpack.c.bf16 %v8134_v26, %v8508_v49  ;;  %v2521_v26 = vrot.slane %v8179_v46, 1  ;;  %v295_v46 = vadd.s32 72, %v8080_v3 }
  0xbe   : > { %6896 = vmatprep.mubr.msk.bf16.mxu0 %vm280_vm0, %v8468_v34  ;;  %v1823_v34 = vpack.c.bf16 %v8322_v61, %v8271_v29 }
  0xc5   : > { %6897 = vmatmul.mubr.msk.bf16.gmra.mrb[16].mxu0 %vm280_vm0, %v8470_v41  ;;  %v1822_v41 = vpack.c.bf16 %v8280_v32, %v8269_v28 }
  0xc6   : > { %6900 = vmatprep.mubr.msk.bf16.mxu0 %vm280_vm0, %v8488_v7  ;;  %v1825_v7 = vpack.c.bf16 %v8368_v36, %v8349_v17 }
  0xcd   : > { %6901 = vmatmul.mubr.msk.bf16.gmra.mrb[20].mxu0 %vm280_vm0, %v8490_v12  ;;  %v1826_v12 = vpack.c.bf16 %v8390_v57, %v8371_v42 }
  0xce   : > { %6904 = vmatprep.mubr.msk.bf16.mxu0 %vm280_vm0, %v8527_v40  ;;  %v1827_v40 = vpack.c.bf16 %v8401_v15, %v8392_v60 }
  0xd5   : > { %6905 = vmatmul.mubr.msk.bf16.gmra.mrb[24].mxu0 %vm280_vm0, %v8529_v16  ;;  %v1824_v16 = vpack.c.bf16 %v8358_v27, %v8341_v11 }
  0xd6   : > { %6908 = vmatprep.mubr.msk.bf16.mxu0 %vm280_vm0, %v1195_v58  ;;  %v7986_v58 = vld [vmem:[%s10265_s1 + $0x28] sm:$0xff]  }
  0xdd   : > { %6909 = vmatmul.mubr.msk.bf16.gmra.mrb[28].mxu0 %vm280_vm0, %v1196_v20  ;;  %v7984_v20 = vld [vmem:[%s10265_s1 + $0x78] sm:$0xff]  }
  0xde   : > { %6916 = vmatprep.mubr.msk.bf16.mxu0 %vm280_vm0, %v1816_v4  ;;  %v289_v4 = vadd.s32 24, %v8080_v3 }
  0xe5   : > { %6917 = vmatmul.mubr.msk.bf16.vlgmr.msra.gmra.mrb[0].mxu0 %vm280_vm0, %v1817_v38 }
  0xe6   : > { %6949 = vmatpush3.bf16.msra.mxu0 %v7981_v62  ;;  %6920 = vmatprep.mubr.msk.bf16.mxu0 %vm280_vm0, %v1818_v22  ;;  %v2520_v62 = vrot.slane %v8177_v45, 1  ;;  %v2522_v45 = vrot.slane %v8186_v48, 1  ;;  %v10373_v48 = vld [vmem:[#allocation26_spill] sm:$0xff] }
  0xe7   : > { %6950 = vmatprep.subr.bf16.mxu0 %v7982_v23 }
  0xea   : > { %6951 = vmatpush3.bf16.msra.mxu0 %v7982_v23  ;;  %v8749_v23 = vsel %vm863_vm6, 1.0, %v10352_v50 }
  0xeb   : > { %6984 = vmatprep.subr.bf16.mxu0 %v7983_v63  ;;  %10372 = vst [vmem:[#allocation13_spill] sm:$0xff] %v8749_v23 }
  0xed   : > { %6921 = vmatmul.mubr.msk.bf16.gmra.mrb[4].mxu0 %vm280_vm0, %v1819_v8 }
  0xee   : > { %6924 = vmatprep.mubr.msk.bf16.mxu0 %vm280_vm0, %v1820_v43 }
  0xf5   : > { %6925 = vmatmul.mubr.msk.bf16.gmra.mrb[8].mxu0 %vm280_vm0, %v1821_v51 }
  0xf6   : > { %6928 = vmatprep.mubr.msk.bf16.mxu0 %vm280_vm0, %v1822_v41 }
  0xfd   : > { %6929 = vmatmul.mubr.msk.bf16.gmra.mrb[12].mxu0 %vm280_vm0, %v1823_v34 }
  0xfe   : > { %6932 = vmatprep.mubr.msk.bf16.mxu0 %vm280_vm0, %v1824_v16 }
 0x105   : > { %6933 = vmatmul.mubr.msk.bf16.gmra.mrb[16].mxu0 %vm280_vm0, %v1825_v7 }
 0x106   : > { %6936 = vmatprep.mubr.msk.bf16.mxu0 %vm280_vm0, %v1826_v12 }
 0x10d   : > { %6937 = vmatmul.mubr.msk.bf16.gmra.mrb[20].mxu0 %vm280_vm0, %v1827_v40 }
 0x10e   : > { %6940 = vmatprep.mubr.msk.bf16.mxu0 %vm280_vm0, %v1828_v1 }
 0x115   : > { %6941 = vmatmul.mubr.msk.bf16.gmra.mrb[24].mxu0 %vm280_vm0, %v1829_v6 }
 0x116   : > { %6944 = vmatprep.mubr.msk.bf16.mxu0 %vm280_vm0, %v1830_v55 }
 0x11d   : > { %6945 = vmatmul.mubr.msk.bf16.gmra.mrb[28].mxu0 %vm280_vm0, %v1831_v21 }
 0x11e   : > { %6952 = vmatprep.mubr.msk.bf16.mxu0 %vm280_vm0, %v1817_v38  ;;  %v291_v38 = vadd.s32 40, %v8080_v3 }
 0x125   : > { %6953 = vmatmul.mubr.msk.bf16.vlgmr.msra.gmra.mrb[0].mxu0 %vm280_vm0, %v1818_v22 }
 0x126   : > { %6985 = vmatpush3.bf16.msra.mxu0 %v7983_v63  ;;  %6956 = vmatprep.mubr.msk.bf16.mxu0 %vm280_vm0, %v1819_v8  ;;  %v2588_v63 = vsel %vm2554_vm7, %v2519_v18, %v2520_v62 }
 0x127   : > { %6986 = vmatprep.subr.bf16.mxu0 %v7984_v20 }
 0x12a   : > { %6987 = vmatpush3.bf16.msra.mxu0 %v7984_v20  ;;  %v389_v20 = vand.u32 15, %v295_v46 }
 0x12b   : > { %7020 = vmatprep.subr.bf16.mxu0 %v7985_v5 }
 0x12c   : > { %vm871_vm11 = vcmp.lt.s32.totalorder %v389_v20, 15 }
 0x12d   : > { %6957 = vmatmul.mubr.msk.bf16.gmra.mrb[4].mxu0 %vm280_vm0, %v1820_v43 }
 0x12e   : > { %6960 = vmatprep.mubr.msk.bf16.mxu0 %vm280_vm0, %v1821_v51 }
 0x135   : > { %6961 = vmatmul.mubr.msk.bf16.gmra.mrb[8].mxu0 %vm280_vm0, %v1822_v41 }
 0x136   : > { %6964 = vmatprep.mubr.msk.bf16.mxu0 %vm280_vm0, %v1823_v34 }
 0x13d   : > { %6965 = vmatmul.mubr.msk.bf16.gmra.mrb[12].mxu0 %vm280_vm0, %v1824_v16 }
 0x13e   : > { %6968 = vmatprep.mubr.msk.bf16.mxu0 %vm280_vm0, %v1825_v7 }
 0x145   : > { %6969 = vmatmul.mubr.msk.bf16.gmra.mrb[16].mxu0 %vm280_vm0, %v1826_v12 }
 0x146   : > { %6972 = vmatprep.mubr.msk.bf16.mxu0 %vm280_vm0, %v1827_v40 }
 0x14d   : > { %6973 = vmatmul.mubr.msk.bf16.gmra.mrb[20].mxu0 %vm280_vm0, %v1828_v1 }
 0x14e   : > { %6976 = vmatprep.mubr.msk.bf16.mxu0 %vm280_vm0, %v1829_v6 }
 0x155   : > { %6977 = vmatmul.mubr.msk.bf16.gmra.mrb[24].mxu0 %vm280_vm0, %v1830_v55 }
 0x156   : > { %6980 = vmatprep.mubr.msk.bf16.mxu0 %vm280_vm0, %v1831_v21 }
 0x15d   : > { %6981 = vmatmul.mubr.msk.bf16.gmra.mrb[28].mxu0 %vm280_vm0, %v1832_v35 }
 0x15e   : > { %6988 = vmatprep.mubr.msk.bf16.mxu0 %vm280_vm0, %v1818_v22  ;;  %v2518_v22 = vrot.slane %v8508_v49, 1  ;;  %v7992_v49 = vld [vmem:[%s10267_s3 + $0x38] sm:$0xff]  }
 0x165   : > { %6989 = vmatmul.mubr.msk.bf16.vlgmr.msra.gmra.mrb[0].mxu0 %vm280_vm0, %v1819_v8  ;;  %v347_v8 = vand.u32 15, %v289_v4  ;;  %v2527_v4 = vrot.slane %v8224_v0, 1 }
 0x166   : > { %7021 = vmatpush3.bf16.msra.mxu0 %v7985_v5  ;;  %6992 = vmatprep.mubr.msk.bf16.mxu0 %vm280_vm0, %v1820_v43  ;;  %v361_v43 = vand.u32 15, %v291_v38  ;;  %v2587_v5 = vsel %vm2554_vm7, %v2520_v62, %v2521_v26  ;;  %v2528_v38 = vrot.slane %v8227_v2, 1  ;;  %v297_v62 = vadd.s32 88, %v8080_v3 }
 0x167   : > { %7022 = vmatprep.subr.bf16.mxu0 %v7986_v58  ;;  %vm865_vm8 = vcmp.lt.s32.totalorder %v347_v8, 15 }
 0x168   : > { %vm867_vm9 = vcmp.lt.s32.totalorder %v361_v43, 15  ;;  %v2580_v0 = vsel %vm2554_vm7, %v2527_v4, %v2528_v38  ;;  %v403_v2 = vand.u32 15, %v297_v62  ;;  %v2533_v62 = vrot.slane %v8322_v61, 1 }
 0x16a   : > { %7023 = vmatpush3.bf16.msra.mxu0 %v7986_v58  ;;  %vm873_vm12 = vcmp.lt.s32.totalorder %v403_v2, 15  ;;  %v307_v2 = vadd.s32 168, %v8080_v3 }
 0x16b   : > { %7056 = vmatprep.subr.bf16.mxu0 %v8728_v14 }
 0x16d   : > { %6993 = vmatmul.mubr.msk.bf16.gmra.mrb[4].mxu0 %vm280_vm0, %v1821_v51  ;;  %v2589_v51 = vsel %vm2554_vm7, %v2518_v22, %v2519_v18  ;;  %v2526_v18 = vrot.slane %v8211_v59, 1  ;;  %v8802_v59 = vsel %vm871_vm11, 1.0, %v10352_v50 }
 0x16e   : > { %6996 = vmatprep.mubr.msk.bf16.mxu0 %vm280_vm0, %v1822_v41  ;;  %v2592_v41 = vmul.f32 %v8749_v23, %v2588_v63  ;;  %v299_v63 = vadd.s32 104, %v8080_v3  ;;  %v2600_v46 = vmul.f32 %v8802_v59, %v2580_v0  ;;  %v2536_v0 = vrot.slane %v8349_v17, 1 }
 0x16f   : > { %v2582_v54 = vsel %vm2554_vm7, %v2525_v9, %v2526_v18 }
 0x175   : > { %6997 = vmatmul.mubr.msk.bf16.gmra.mrb[8].mxu0 %vm280_vm0, %v1823_v34  ;;  %v2523_v34 = vrot.slane %v8198_v52, 1 }
 0x176   : > { %7000 = vmatprep.mubr.msk.bf16.mxu0 %vm280_vm0, %v1824_v16  ;;  %v2524_v16 = vrot.slane %v8200_v53, 1 }
 0x177   : > { %v2585_v58 = vsel %vm2554_vm7, %v2522_v45, %v2523_v34 }
 0x178   : > { %v2584_v52 = vsel %vm2554_vm7, %v2523_v34, %v2524_v16 }
 0x17d   : > { %7001 = vmatmul.mubr.msk.bf16.gmra.mrb[12].mxu0 %vm280_vm0, %v1825_v7  ;;  %v293_v7 = vadd.s32 56, %v8080_v3 }
 0x17e   : > { %7004 = vmatprep.mubr.msk.bf16.mxu0 %vm280_vm0, %v1826_v12  ;;  %v10374_v12 = vld [vmem:[#allocation22_spill] sm:$0xff] }
 0x17f   : > { %v375_v53 = vand.u32 15, %v293_v7  ;;  %v2581_v7 = vsel %vm2554_vm7, %v2526_v18, %v2527_v4 }
 0x181   : > { %vm869_vm10 = vcmp.lt.s32.totalorder %v375_v53, 15  ;;  %v303_v53 = vadd.s32 136, %v8080_v3 }
 0x185   : > { %7005 = vmatmul.mubr.msk.bf16.gmra.mrb[16].mxu0 %vm280_vm0, %v1827_v40  ;;  %v1833_v40 = vpack.c.bf16 %v10374_v12, %v10373_v48 }
 0x186   : > { %7008 = vmatprep.mubr.msk.bf16.mxu0 %vm280_vm0, %v1828_v1  ;;  %v2627_v1 = vpack.c.bf16 %v2592_v41, %v2589_v51  ;;  %v417_v51 = vand.u32 15, %v299_v63  ;;  %v2583_v41 = vsel %vm2554_vm7, %v2524_v16, %v2525_v9  ;;  %v2532_v16 = vrot.slane %v8271_v29, 1 }
 0x187   : > { %v2534_v63 = vrot.slane %v8341_v11, 1 }
 0x188   : > { %vm875_vm13 = vcmp.lt.s32.totalorder %v417_v51, 15 }
 0x189   : > { %v2574_v61 = vsel %vm2554_vm7, %v2533_v62, %v2534_v63 }
 0x18d   : > { %7009 = vmatmul.mubr.msk.bf16.gmra.mrb[20].mxu0 %vm280_vm0, %v1829_v6  ;;  %v8769_v6 = vsel %vm865_vm8, 1.0, %v10352_v50 }
 0x18e   : > { %7012 = vmatprep.mubr.msk.bf16.mxu0 %vm280_vm0, %v1830_v55  ;;  %v2586_v55 = vsel %vm2554_vm7, %v2521_v26, %v2522_v45  ;;  %v8797_v26 = vsel %vm869_vm10, 1.0, %v10352_v50  ;;  %v7988_v45 = vld [vmem:[%s10265_s1 + $0x58] sm:$0xff]  }
 0x18f   : > { %v2598_v34 = vmul.f32 %v8797_v26, %v2582_v54  ;;  %v2535_v54 = vrot.slane %v8358_v27, 1 }
 0x191   : > { %v8831_v20 = vpack.c.bf16 %v2598_v34, %v2583_v41  ;;  %v2572_v17 = vsel %vm2554_vm7, %v2535_v54, %v2536_v0  ;;  %v473_v34 = vand.u32 15, %v307_v2  ;;  %v2543_v2 = vrot.slane %v8413_v31, 1 }
 0x193   : > { %vm883_vm2 = vcmp.lt.s32.totalorder %v473_v34, 15 }
 0x195   : > { %7013 = vmatmul.mubr.msk.bf16.gmra.mrb[24].mxu0 %vm280_vm0, %v1831_v21  ;;  %v8774_v21 = vsel %vm867_vm9, 1.0, %v10352_v50 }
 0x196   : > { %7016 = vmatprep.mubr.msk.bf16.mxu0 %vm280_vm0, %v1832_v35  ;;  %v2594_v35 = vmul.f32 %v8769_v6, %v2586_v55  ;;  %v2596_v13 = vmul.f32 %v8774_v21, %v2584_v52  ;;  %v2531_v55 = vrot.slane %v8280_v32, 1  ;;  %v301_v52 = vadd.s32 120, %v8080_v3 }
 0x197   : > { %v8841_v32 = vsel %vm875_vm13, 1.0, %v10352_v50 }
 0x198   : > { %v8792_v8 = vpack.c.bf16 %v2594_v35, %v2587_v5  ;;  %v8794_v43 = vpack.c.bf16 %v2596_v13, %v2585_v58  ;;  %v2576_v5 = vsel %vm2554_vm7, %v2531_v55, %v2532_v16  ;;  %v431_v35 = vand.u32 15, %v301_v52 }
 0x199   : > { %v445_v58 = vand.u32 15, %v303_v53  ;;  %v2604_v4 = vmul.f32 %v8841_v32, %v2576_v5  ;;  %v2538_v52 = vrot.slane %v8371_v42, 1  ;;  %v2539_v53 = vrot.slane %v8390_v57, 1 }
 0x19a   : > { %vm877_vm14 = vcmp.lt.s32.totalorder %v431_v35, 15  ;;  %v311_v5 = vadd.s32 200, %v8080_v3  ;;  %v8902_v42 = vsel %vm883_vm2, 1.0, %v10352_v50 }
 0x19b   : > { %vm879_vm15 = vcmp.lt.s32.totalorder %v445_v58, 15  ;;  %v8867_v41 = vsel %vm877_vm14, 1.0, %v10352_v50 }
 0x19c   : > { %v8872_v11 = vsel %vm879_vm15, 1.0, %v10352_v50 }
 0x19d   : > { %7017 = vmatmul.mubr.msk.bf16.gmra.mrb[28].mxu0 %vm280_vm0, %v1833_v40  ;;  %v2529_v40 = vrot.slane %v8236_v10, 1  ;;  %v8833_v10 = vpack.c.bf16 %v2600_v46, %v2581_v7  ;;  %v2575_v7 = vsel %vm2554_vm7, %v2532_v16, %v2533_v62  ;;  %v2606_v46 = vmul.f32 %v8867_v41, %v2574_v61 }
 0x19e   : > { %7024 = vmatprep.mubr.msk.bf16.mxu0 %vm280_vm0, %v2627_v1  ;;  %v2530_v1 = vrot.slane %v8269_v28, 1  ;;  %v8836_v28 = vsel %vm873_vm12, 1.0, %v10352_v50  ;;  %v309_v16 = vadd.s32 184, %v8080_v3  ;;  %v2569_v62 = vsel %vm2554_vm7, %v2538_v52, %v2539_v53 }
 0x19f   : > { %v2579_v13 = vsel %vm2554_vm7, %v2528_v38, %v2529_v40  ;;  %v305_v38 = vadd.s32 152, %v8080_v3  ;;  %v8892_v35 = vpack.c.bf16 %v2606_v46, %v2575_v7  ;;  %v2544_v61 = vrot.slane %v8416_v37, 1 }
 0x1a0   : > { %v2578_v29 = vsel %vm2554_vm7, %v2529_v40, %v2530_v1  ;;  %v2577_v18 = vsel %vm2554_vm7, %v2530_v1, %v2531_v55  ;;  %v2573_v40 = vsel %vm2554_vm7, %v2534_v63, %v2535_v54  ;;  %v2608_v1 = vmul.f32 %v8872_v11, %v2572_v17 }
 0x1a1   : > { %v2602_v9 = vmul.f32 %v8836_v28, %v2578_v29  ;;  %v8864_v51 = vpack.c.bf16 %v2604_v4, %v2577_v18  ;;  %v459_v27 = vand.u32 15, %v305_v38  ;;  %v2537_v55 = vrot.slane %v8368_v36, 1 }
 0x1a2   : > { %v2540_v29 = vrot.slane %v8392_v60, 1  ;;  %v8894_v58 = vpack.c.bf16 %v2608_v1, %v2573_v40  ;;  %v487_v60 = vand.u32 15, %v309_v16  ;;  %v2541_v54 = vrot.slane %v8401_v15, 1 }
 0x1a3   : > { %vm881_vm1 = vcmp.lt.s32.totalorder %v459_v27, 15  ;;  %v2570_v36 = vsel %vm2554_vm7, %v2537_v55, %v2538_v52  ;;  %v2571_v18 = vsel %vm2554_vm7, %v2536_v0, %v2537_v55  ;;  %v2542_v38 = vrot.slane %v8403_v19, 1 }
 0x1a4   : > { %v2568_v57 = vsel %vm2554_vm7, %v2539_v53, %v2540_v29  ;;  %vm885_vm3 = vcmp.lt.s32.totalorder %v487_v60, 15  ;;  %v313_v0 = vadd.s32 216, %v8080_v3  ;;  %v315_v17 = vadd.s32 232, %v8080_v3 }
 0x1a5   : > { %7025 = vmatmul.mubr.msk.bf16.vlgmr.msra.gmra.mrb[0].mxu0 %vm280_vm0, %v8792_v8  ;;  %v2612_v63 = vmul.f32 %v8902_v42, %v2568_v57  ;;  %v8927_v7 = vsel %vm885_vm3, 1.0, %v10352_v50  ;;  %v2566_v15 = vsel %vm2554_vm7, %v2541_v54, %v2542_v38  ;;  %v2564_v31 = vsel %vm2554_vm7, %v2543_v2, %v2544_v61 }
 0x1a6   : > { %7057 = vmatpush3.bf16.msra.mxu0 %v8728_v14  ;;  %7028 = vmatprep.mubr.msk.bf16.mxu0 %vm280_vm0, %v8794_v43  ;;  %v8828_v14 = vld [vmem:[%s10265_s1 + $0x80] sm:$0xff]   ;;  %v515_v37 = vand.u32 15, %v313_v0  ;;  %v529_v46 = vand.u32 15, %v315_v17  ;;  %v2567_v40 = vsel %vm2554_vm7, %v2540_v29, %v2541_v54  ;;  %v2614_v1 = vmul.f32 %v8927_v7, %v2566_v15 }
 0x1a7   : > { %7058 = vmatprep.subr.bf16.mxu0 %v7988_v45  ;;  %v8924_v34 = vpack.c.bf16 %v2612_v63, %v2569_v62  ;;  %v2565_v55 = vsel %vm2554_vm7, %v2542_v38, %v2543_v2  ;;  %v2545_v53 = vrot.slane %v10367_v44, 1  ;;  %v2546_v16 = vrot.slane %v10368_v47, 1 }
 0x1a8   : > { %vm889_vm6 = vcmp.lt.s32.totalorder %v515_v37, 15  ;;  %v317_v29 = vadd.s32 248, %v8080_v3  ;;  %vm891_vm8 = vcmp.lt.s32.totalorder %v529_v46, 15  ;;  %v8951_v57 = vpack.c.bf16 %v2614_v1, %v2567_v40 }
 0x1a9   : > { %v2562_v44 = vsel %vm2554_vm7, %v2545_v53, %v2546_v16  ;;  %v8961_v47 = vsel %vm891_vm8, 1.0, %v10352_v50  ;;  %v2549_v63 = vrot.slane %v10370_v33, 1  ;;  %v2550_v54 = vrot.slane %v8505_v30, 1 }
 0x1aa   : > { %7059 = vmatpush3.bf16.msra.mxu0 %v7988_v45  ;;  %v8862_v45 = vpack.c.bf16 %v2602_v9, %v2579_v13  ;;  %v8897_v13 = vsel %vm881_vm1, 1.0, %v10352_v50  ;;  %v501_v9 = vand.u32 15, %v311_v5  ;;  %v2547_v5 = vrot.slane %v10369_v25, 1 }
 0x1ab   : > { %7092 = vmatprep.subr.bf16.mxu0 %v8828_v14  ;;  %v2610_v4 = vmul.f32 %v8897_v13, %v2570_v36  ;;  %v2548_v36 = vrot.slane %v8433_v39, 1  ;;  %v543_v39 = vand.u32 15, %v317_v29  ;;  %v2558_v15 = vsel %vm2554_vm7, %v2549_v63, %v2550_v54  ;;  %v3467_v29 = vld [vmem:[#allocation2 + $0x118] sm:$0xff] }
 0x1ac   : > { %vm887_vm5 = vcmp.lt.s32.totalorder %v501_v9, 15  ;;  %v8956_v9 = vsel %vm889_vm6, 1.0, %v10352_v50  ;;  %v2561_v38 = vsel %vm2554_vm7, %v2546_v16, %v2547_v5  ;;  %v2551_v37 = vrot.slane %v10371_v24, 1 }
 0x1ad   : > { %7029 = vmatmul.mubr.msk.bf16.gmra.mrb[4].mxu0 %vm280_vm0, %v8831_v20  ;;  %v8922_v27 = vpack.c.bf16 %v2610_v4, %v2571_v18  ;;  %v8932_v19 = vsel %vm887_vm5, 1.0, %v10352_v50  ;;  %v2560_v25 = vsel %vm2554_vm7, %v2547_v5, %v2548_v36  ;;  %v2618_v18 = vmul.f32 %v8956_v9, %v2562_v44 }
 0x1ae   : > { %7032 = vmatprep.mubr.msk.bf16.mxu0 %vm280_vm0, %v8833_v10  ;;  %v2616_v52 = vmul.f32 %v8932_v19, %v2564_v31  ;;  %v2563_v4 = vsel %vm2554_vm7, %v2544_v61, %v2545_v53  ;;  %v2620_v62 = vmul.f32 %v8961_v47, %v2560_v25  ;;  %vm893_vm9 = vcmp.lt.s32.totalorder %v543_v39, 15  ;;  %v7990_v31 = vld [vmem:[%s10265_s1 + $0x88] sm:$0xff]  }
 0x1af   : > { %v2640_v2 = vpack.c.bf16 %v2618_v18, %v2563_v4  ;;  %v8978_v17 = vsel %vm893_vm9, 1.0, %v10352_v50  ;;  %v2559_v30 = vsel %vm2554_vm7, %v2548_v36, %v2549_v63  ;;  %v2552_v46 = vrot.slane %v10373_v48, 1  ;;  %v9089_v36 = vld [vmem:[#allocation2] sm:$0xff] }
 0x1b0   : > { %v8953_v60 = vpack.c.bf16 %v2616_v52, %v2565_v55  ;;  %v2641_v0 = vpack.c.bf16 %v2620_v62, %v2561_v38  ;;  %v2622_v61 = vmul.f32 %v8978_v17, %v2558_v15  ;;  %v2557_v52 = vsel %vm2554_vm7, %v2550_v54, %v2551_v37  ;;  %v9096_v54 = vld [vmem:[#allocation2 + $0x8] sm:$0xff] }
 0x1b1   : > { %v2556_v1 = vsel %vm2554_vm7, %v2551_v37, %v2552_v46  ;;  %v321_v24 = vadd.s32 280, %v8080_v3  ;;  %v3468_v25 = vrot.slane %v9089_v36, 7  ;;  %v3503_v62 = vrot.slane %v3467_v29, 7 }
 0x1b2   : > { %v2642_v33 = vpack.c.bf16 %v2622_v61, %v2559_v30  ;;  %v3469_v61 = vrot.slane %v9096_v54, 7  ;;  %v9104_v30 = vld [vmem:[#allocation2 + $0x110] sm:$0xff] }
 0x1b3   : > { %v571_v48 = vand.u32 15, %v321_v24  ;;  %v3539_v38 = vsel %vm1106_vm4, %v3503_v62, %v3468_v25 }
 0x1b5   : > { %7033 = vmatmul.mubr.msk.bf16.gmra.mrb[8].mxu0 %vm280_vm0, %v8862_v45  ;;  %vm897_vm11 = vcmp.lt.s32.totalorder %v571_v48, 15  ;;  %v10307_v48 = vrot.slane %v9104_v30, 7 }
 0x1b6   : > { %7036 = vmatprep.mubr.msk.bf16.mxu0 %vm280_vm0, %v8864_v51 }
 0x1bd   : > { %7037 = vmatmul.mubr.msk.bf16.gmra.mrb[12].mxu0 %vm280_vm0, %v8892_v35 }
 0x1be   : > { %7040 = vmatprep.mubr.msk.bf16.mxu0 %vm280_vm0, %v8894_v58 }
 0x1c5   : > { %7041 = vmatmul.mubr.msk.bf16.gmra.mrb[16].mxu0 %vm280_vm0, %v8922_v27 }
 0x1c6   : > { %7044 = vmatprep.mubr.msk.bf16.mxu0 %vm280_vm0, %v8924_v34 }
 0x1cd   : > { %7045 = vmatmul.mubr.msk.bf16.gmra.mrb[20].mxu0 %vm280_vm0, %v8951_v57 }
 0x1ce   : > { %7048 = vmatprep.mubr.msk.bf16.mxu0 %vm280_vm0, %v8953_v60 }
 0x1d5   : > { %7049 = vmatmul.mubr.msk.bf16.gmra.mrb[24].mxu0 %vm280_vm0, %v2640_v2 }
 0x1d6   : > { %7052 = vmatprep.mubr.msk.bf16.mxu0 %vm280_vm0, %v2641_v0 }
 0x1dd   : > { %7053 = vmatmul.mubr.msk.bf16.gmra.mrb[28].mxu0 %vm280_vm0, %v2642_v33 }
 0x1de   : > { %7060 = vmatprep.mubr.msk.bf16.mxu0 %vm280_vm0, %v8792_v8  ;;  %v319_v8 = vadd.s32 264, %v8080_v3 }
 0x1e5   : > { %7061 = vmatmul.mubr.msk.bf16.vlgmr.msra.gmra.mrb[0].mxu0 %vm280_vm0, %v8794_v43 }
 0x1e6   : > { %7093 = vmatpush3.bf16.msra.mxu0 %v8828_v14  ;;  %7064 = vmatprep.mubr.msk.bf16.mxu0 %vm280_vm0, %v8831_v20  ;;  %v557_v14 = vand.u32 15, %v319_v8  ;;  %v10376_v8 = vld [vmem:[#allocation25_spill] sm:$0xff] }
 0x1e7   : > { %7094 = vmatprep.subr.bf16.mxu0 %v7990_v31 }
 0x1e8   : > { %vm895_vm10 = vcmp.lt.s32.totalorder %v557_v14, 15  ;;  %v9108_v14 = vmul.f32 %v10376_v8, %v3539_v38 }
 0x1e9   : > { %v9021_v40 = vsel %vm895_vm10, 1.0, %v10352_v50 }
 0x1ea   : > { %7095 = vmatpush3.bf16.msra.mxu0 %v7990_v31  ;;  %v2624_v55 = vmul.f32 %v9021_v40, %v2556_v1 }
 0x1ec   : > { %v2643_v53 = vpack.c.bf16 %v2624_v55, %v2557_v52  ;;  %v9113_v55 = vsel %vm1106_vm4, %v3468_v25, %v3469_v61 }
 0x1ed   : > { %7065 = vmatmul.mubr.msk.bf16.gmra.mrb[4].mxu0 %vm280_vm0, %v8833_v10 }
 0x1ee   : > { %7068 = vmatprep.mubr.msk.bf16.mxu0 %vm280_vm0, %v8862_v45 }
 0x1f5   : > { %7069 = vmatmul.mubr.msk.bf16.gmra.mrb[8].mxu0 %vm280_vm0, %v8864_v51 }
 0x1f6   : > { %7072 = vmatprep.mubr.msk.bf16.mxu0 %vm280_vm0, %v8892_v35 }
 0x1fd   : > { %7073 = vmatmul.mubr.msk.bf16.gmra.mrb[12].mxu0 %vm280_vm0, %v8894_v58 }
 0x1fe   : > { %7076 = vmatprep.mubr.msk.bf16.mxu0 %vm280_vm0, %v8922_v27 }
 0x205   : > { %7077 = vmatmul.mubr.msk.bf16.gmra.mrb[16].mxu0 %vm280_vm0, %v8924_v34 }
 0x206   : > { %7080 = vmatprep.mubr.msk.bf16.mxu0 %vm280_vm0, %v8951_v57 }
 0x20d   : > { %7081 = vmatmul.mubr.msk.bf16.gmra.mrb[20].mxu0 %vm280_vm0, %v8953_v60 }
 0x20e   : > { %7084 = vmatprep.mubr.msk.bf16.mxu0 %vm280_vm0, %v2640_v2 }
 0x215   : > { %7085 = vmatmul.mubr.msk.bf16.gmra.mrb[24].mxu0 %vm280_vm0, %v2641_v0 }
 0x216   : > { %7088 = vmatprep.mubr.msk.bf16.mxu0 %vm280_vm0, %v2642_v33 }
 0x21d   : > { %7089 = vmatmul.mubr.msk.bf16.gmra.mrb[28].mxu0 %vm280_vm0, %v2643_v53 }
 0x21e   : > { %7096 = vmatprep.mubr.msk.bf16.mxu0 %vm280_vm0, %v8794_v43  ;;  %v2553_v43 = vrot.slane %v10374_v12, 1  ;;  %v9085_v12 = vld [vmem:[%s10266_s2] ss:$0 sm:$0xff] }
 0x225   : > { %7097 = vmatmul.mubr.msk.bf16.vlgmr.msra.gmra.mrb[0].mxu0 %vm280_vm0, %v8831_v20  ;;  %v9058_v20 = vsel %vm897_vm11, 1.0, %v10352_v50  ;;  %v7991_v50 = vld [vmem:[%s10267_s3 + $0x30] sm:$0xff]  }
 0x226   : > { %7100 = vmatprep.mubr.msk.bf16.mxu0 %vm280_vm0, %v8833_v10  ;;  %10375 = vst [vmem:[#allocation14_spill] sm:$0xff] %v9058_v20  ;;  %v2590_v10 = vsel %vm2554_vm7, %v2553_v43, %v2518_v22  ;;  %7128 = vmatprep.subr.bf16.mxu1 %v7991_v50  ;;  %v9079_v22 = vld [vmem:[%s10267_s3] sm:$0xff]  }
 0x227   : > { %7129 = vmatpush3.bf16.msra.mxu1 %v7991_v50 }
 0x228   : > { %7130 = vmatprep.subr.bf16.mxu1 %v7992_v49 }
 0x22b   : > { %7131 = vmatpush3.bf16.msra.mxu1 %v7992_v49  ;;  %v9132_v49 = vsel %vm1106_vm4, %v10307_v48, %v3503_v62 }
 0x22c   : > { %7164 = vmatprep.subr.bf16.mxu1 %v9079_v22 }
 0x22d   : > { %7101 = vmatmul.mubr.msk.bf16.gmra.mrb[4].mxu0 %vm280_vm0, %v8862_v45  ;;  %v2626_v45 = vmul.f32 %v9058_v20, %v2590_v10 }
 0x22e   : > { %7104 = vmatprep.mubr.msk.bf16.mxu0 %vm280_vm0, %v8864_v51  ;;  %v2555_v51 = vsel %vm2554_vm7, %v2552_v46, %v2553_v43 }
 0x235   : > { %7105 = vmatmul.mubr.msk.bf16.gmra.mrb[8].mxu0 %vm280_vm0, %v8892_v35  ;;  %v2644_v35 = vpack.c.bf16 %v2626_v45, %v2555_v51 }
 0x236   : > { %7108 = vmatprep.mubr.msk.bf16.mxu0 %vm280_vm0, %v8894_v58 }
 0x23d   : > { %7109 = vmatmul.mubr.msk.bf16.gmra.mrb[12].mxu0 %vm280_vm0, %v8922_v27 }
 0x23e   : > { %7112 = vmatprep.mubr.msk.bf16.mxu0 %vm280_vm0, %v8924_v34 }
 0x245   : > { %7113 = vmatmul.mubr.msk.bf16.gmra.mrb[16].mxu0 %vm280_vm0, %v8951_v57 }
 0x246   : > { %7116 = vmatprep.mubr.msk.bf16.mxu0 %vm280_vm0, %v8953_v60 }
 0x24d   : > { %7117 = vmatmul.mubr.msk.bf16.gmra.mrb[20].mxu0 %vm280_vm0, %v2640_v2 }
 0x24e   : > { %7120 = vmatprep.mubr.msk.bf16.mxu0 %vm280_vm0, %v2641_v0 }
 0x255   : > { %7121 = vmatmul.mubr.msk.bf16.gmra.mrb[24].mxu0 %vm280_vm0, %v2642_v33 }
 0x256   : > { %7124 = vmatprep.mubr.msk.bf16.mxu0 %vm280_vm0, %v2643_v53 }
 0x25d   : > { %7125 = vmatmul.mubr.msk.bf16.gmra.mrb[28].mxu0 %vm280_vm0, %v2644_v35 }
 0x2f8   : > { %v7098_v58 = vpop.f32.mrb[0].mxu0 }
 0x2f9   : > { %v3338_v27 = vadd.f32 %v7098_v58, %v9085_v12  ;;  %v3170_v34 = vpop.f32.mrb[1].mxu0 }
 0x2fa   : > { %v3336_v16 = vadd.f32 %v9085_v12, %v3170_v34  ;;  %v7099_v5 = vpop.f32.mrb[2].mxu0 }
 0x2fb   : > { %v3370_v57 = vmax.f32 %v3338_v27, 0.0  ;;  %v3339_v60 = vadd.f32 %v7099_v5, %v9085_v12  ;;  %v3173_v44 = vpop.f32.mrb[3].mxu0 }
 0x2fc   : > { %v3368_v39 = vmax.f32 %v3336_v16, 0.0  ;;  %v3337_v18 = vadd.f32 %v9085_v12, %v3173_v44 }
 0x2fd   : > { %3402 = vst.msk [vmem:[#allocation2 + $0x20] sm:$0xff] %vm280_vm0, %v3370_v57  ;;  %v3371_v4 = vmax.f32 %v3339_v60, 0.0 }
 0x2fe   : > { %3400 = vst.msk [vmem:[#allocation2 + $0x10] sm:$0xff] %vm280_vm0, %v3368_v39  ;;  %v3369_v63 = vmax.f32 %v3337_v18, 0.0 }
 0x2ff   : > { %3403 = vst.msk [vmem:[#allocation2 + $0x28] sm:$0xff] %vm280_vm0, %v3371_v4  ;;  %v10378_v4 = vld [vmem:[#allocation3_spill] sm:$0xff] }
 0x300   : > { %3401 = vst.msk [vmem:[#allocation2 + $0x18] sm:$0xff] %vm280_vm0, %v3369_v63  ;;  %v7102_v2 = vpop.f32.mrb[4].mxu0 }
 0x301   : > { %v3342_v0 = vadd.f32 %v7102_v2, %v9085_v12  ;;  %v3186_v15 = vpop.f32.mrb[5].mxu0 }
 0x302   : > { %v3340_v33 = vadd.f32 %v9085_v12, %v3186_v15  ;;  %v7103_v31 = vpop.f32.mrb[6].mxu0 }
 0x303   : > { %v3374_v37 = vmax.f32 %v3342_v0, 0.0  ;;  %v3343_v46 = vadd.f32 %v7103_v31, %v9085_v12  ;;  %v3189_v1 = vpop.f32.mrb[7].mxu0 }
 0x304   : > { %v3372_v52 = vmax.f32 %v3340_v33, 0.0  ;;  %v3341_v53 = vadd.f32 %v9085_v12, %v3189_v1  ;;  %v9116_v24 = vld [vmem:[#allocation2 + $0x20] sm:$0xff]  ;;  %v10379_v1 = vld [vmem:[#allocation4_spill] sm:$0xff] }
 0x305   : > { %3406 = vst.msk [vmem:[#allocation2 + $0x40] sm:$0xff] %vm280_vm0, %v3374_v37  ;;  %v3375_v43 = vmax.f32 %v3343_v46, 0.0  ;;  %v9120_v10 = vld [vmem:[#allocation2 + $0x10] sm:$0xff]  ;;  %v3472_v34 = vrot.slane %v9116_v24, 7  ;;  %v4919_v63 = vrot.slane %v9116_v24, 1 }
 0x306   : > { %10377 = vst [vmem:[#allocation15_spill] sm:$0xff] %v9120_v10  ;;  %3404 = vst.msk [vmem:[#allocation2 + $0x30] sm:$0xff] %vm280_vm0, %v3372_v52  ;;  %v3373_v45 = vmax.f32 %v3341_v53, 0.0  ;;  %v3470_v51 = vrot.slane %v9120_v10, 7  ;;  %v9124_v35 = vld [vmem:[#allocation2 + $0x28] sm:$0xff]  ;;  %v10306_v27 = vrot.slane %v9120_v10, 1 }
 0x307   : > { %3407 = vst.msk [vmem:[#allocation2 + $0x48] sm:$0xff] %vm280_vm0, %v3375_v43  ;;  %v3435_v58 = vld [vmem:[#allocation2 + $0x18] sm:$0xff]  ;;  %v3473_v16 = vrot.slane %v9124_v35, 7  ;;  %v9140_v5 = vpack.c.bf16 %v9124_v35, %v9116_v24  ;;  %v4920_v38 = vrot.slane %v9124_v35, 1 }
 0x308   : > { %3405 = vst.msk [vmem:[#allocation2 + $0x38] sm:$0xff] %vm280_vm0, %v3373_v45  ;;  %v7106_v29 = vpop.f32.mrb[8].mxu0  ;;  %v3471_v57 = vrot.slane %v3435_v58, 7  ;;  %v3537_v60 = vsel %vm1106_vm4, %v3469_v61, %v3470_v51  ;;  %v9146_v44 = vpack.c.bf16 %v3435_v58, %v9120_v10  ;;  %v4918_v25 = vrot.slane %v3435_v58, 1 }
 0x309   : > { %v3346_v39 = vadd.f32 %v7106_v29, %v9085_v12  ;;  %v3202_v18 = vpop.f32.mrb[9].mxu0  ;;  %v3542_v62 = vmul.f32 %v10378_v4, %v3537_v60  ;;  %v3534_v43 = vsel %vm1106_vm4, %v3472_v34, %v3473_v16 }
 0x30a   : > { %v3344_v2 = vadd.f32 %v9085_v12, %v3202_v18  ;;  %v7107_v0 = vpop.f32.mrb[10].mxu0  ;;  %v3536_v15 = vsel %vm1106_vm4, %v3470_v51, %v3471_v57  ;;  %v4983_v61 = vsel %vm2554_vm7, %v10306_v27, %v4918_v25  ;;  %v3535_v33 = vsel %vm1106_vm4, %v3471_v57, %v3472_v34  ;;  %v7994_v57 = vld [vmem:[%s10267_s3 + $0x8] sm:$0xff]   ;;  %v10382_v27 = vld [vmem:[#allocation6_spill] sm:$0xff] }
 0x30b   : > { %v3378_v31 = vmax.f32 %v3346_v39, 0.0  ;;  %v3347_v8 = vadd.f32 %v7107_v0, %v9085_v12  ;;  %v3205_v37 = vpop.f32.mrb[11].mxu0  ;;  %v9162_v46 = vpack.c.bf16 %v3536_v15, %v3542_v62  ;;  %v3544_v52 = vmul.f32 %v10379_v1, %v3535_v33 }
 0x30c   : > { %v3376_v53 = vmax.f32 %v3344_v2, 0.0  ;;  %v3345_v24 = vadd.f32 %v9085_v12, %v3205_v37  ;;  %v9168_v45 = vld [vmem:[#allocation2 + $0x40] sm:$0xff]  ;;  %v4982_v51 = vsel %vm2554_vm7, %v4918_v25, %v4919_v63  ;;  %v4981_v33 = vsel %vm2554_vm7, %v4919_v63, %v4920_v38 }
 0x30d   : > { %3410 = vst.msk [vmem:[#allocation2 + $0x60] sm:$0xff] %vm280_vm0, %v3378_v31  ;;  %v3379_v35 = vmax.f32 %v3347_v8, 0.0  ;;  %7132 = vmatprep.mubr.msk.bf16.mxu1 %vm280_vm0, %v9162_v46  ;;  %v9175_v58 = vpack.c.bf16 %v3534_v43, %v3544_v52  ;;  %v3438_v29 = vld [vmem:[#allocation2 + $0x30] sm:$0xff]  ;;  %v4990_v34 = vmul.f32 %v8769_v6, %v4982_v51  ;;  %v3476_v4 = vrot.slane %v9168_v45, 7 }
 0x30e   : > { %3408 = vst.msk [vmem:[#allocation2 + $0x50] sm:$0xff] %vm280_vm0, %v3376_v53  ;;  %v3377_v25 = vmax.f32 %v3345_v24, 0.0  ;;  %v3474_v39 = vrot.slane %v3438_v29, 7  ;;  %v9183_v18 = vld [vmem:[#allocation2 + $0x48] sm:$0xff]  ;;  %v4921_v62 = vrot.slane %v3438_v29, 1  ;;  %v10381_v24 = vld [vmem:[#allocation5_spill] sm:$0xff] }
 0x30f   : > { %3411 = vst.msk [vmem:[#allocation2 + $0x68] sm:$0xff] %vm280_vm0, %v3379_v35  ;;  %7133 = vmatmul.mubr.msk.bf16.vlgmr.msra.gmra.mrb[0].mxu1 %vm280_vm0, %v9175_v58  ;;  %v3439_v2 = vld [vmem:[#allocation2 + $0x38] sm:$0xff]  ;;  %v3477_v0 = vrot.slane %v9183_v18, 7  ;;  %v9192_v6 = vpack.c.bf16 %v9183_v18, %v9168_v45  ;;  %v9194_v15 = vpack.c.bf16 %v4990_v34, %v4983_v61 }
 0x310   : > { %3409 = vst.msk [vmem:[#allocation2 + $0x58] sm:$0xff] %vm280_vm0, %v3377_v25  ;;  %7165 = vmatpush3.bf16.msra.mxu1 %v9079_v22  ;;  %v7110_v31 = vpop.f32.mrb[12].mxu0  ;;  %v3475_v8 = vrot.slane %v3439_v2, 7  ;;  %v3533_v37 = vsel %vm1106_vm4, %v3473_v16, %v3474_v39  ;;  %v9202_v1 = vpack.c.bf16 %v3439_v2, %v3438_v29  ;;  %v4980_v52 = vsel %vm2554_vm7, %v4920_v38, %v4921_v62  ;;  %v9213_v22 = vld [vmem:[%s10267_s3 + $0x60] sm:$0xff]  }
 0x311   : > { %10380 = vst [vmem:[#allocation19_spill] sm:$0xff] %v9194_v15  ;;  %v3350_v61 = vadd.f32 %v7110_v31, %v9085_v12  ;;  %v3218_v53 = vpop.f32.mrb[13].mxu0  ;;  %v3546_v43 = vmul.f32 %v10381_v24, %v3533_v37  ;;  %v3530_v63 = vsel %vm1106_vm4, %v3476_v4, %v3477_v0  ;;  %7166 = vmatprep.subr.bf16.mxu1 %v7994_v57  ;;  %v4922_v34 = vrot.slane %v3439_v2, 1  ;;  %v10392_v15 = vld [vmem:[#allocation10_spill] sm:$0xff] }
 0x312   : > { %v4992_v16 = vmul.f32 %v8774_v21, %v4980_v52  ;;  %v3348_v51 = vadd.f32 %v9085_v12, %v3218_v53  ;;  %v7111_v35 = vpop.f32.mrb[14].mxu0  ;;  %v3532_v38 = vsel %vm1106_vm4, %v3474_v39, %v3475_v8  ;;  %v3531_v29 = vsel %vm1106_vm4, %v3475_v8, %v3476_v4 }
 0x313   : > { %v3382_v25 = vmax.f32 %v3350_v61, 0.0  ;;  %v3351_v31 = vadd.f32 %v7111_v35, %v9085_v12  ;;  %v3221_v37 = vpop.f32.mrb[15].mxu0  ;;  %v9222_v24 = vpack.c.bf16 %v3532_v38, %v3546_v43  ;;  %v3548_v50 = vmul.f32 %v10382_v27, %v3531_v29 }
 0x314   : > { %v3380_v60 = vmax.f32 %v3348_v51, 0.0  ;;  %v3349_v21 = vadd.f32 %v9085_v12, %v3221_v37  ;;  %v9226_v52 = vld [vmem:[#allocation2 + $0x60] sm:$0xff]  ;;  %7167 = vmatpush3.bf16.msra.mxu1 %v7994_v57  ;;  %v9228_v53 = vpack.c.bf16 %v4992_v16, %v4981_v33  ;;  %v4923_v39 = vrot.slane %v9168_v45, 1 }
 0x315   : > { %3414 = vst.msk [vmem:[#allocation2 + $0x80] sm:$0xff] %vm280_vm0, %v3382_v25  ;;  %v3383_v4 = vmax.f32 %v3351_v31, 0.0  ;;  %7136 = vmatprep.mubr.msk.bf16.mxu1 %vm280_vm0, %v9222_v24  ;;  %v9234_v2 = vpack.c.bf16 %v3530_v63, %v3548_v50  ;;  %v3442_v8 = vld [vmem:[#allocation2 + $0x50] sm:$0xff]  ;;  %v3480_v27 = vrot.slane %v9226_v52, 7  ;;  %7200 = vmatprep.subr.bf16.mxu1 %v9213_v22  ;;  %v4979_v57 = vsel %vm2554_vm7, %v4921_v62, %v4922_v34  ;;  %v10384_v37 = vld [vmem:[#allocation7_spill] sm:$0xff] }
 0x316   : > { %10383 = vst [vmem:[#allocation23_spill] sm:$0xff] %v9228_v53  ;;  %3412 = vst.msk [vmem:[#allocation2 + $0x70] sm:$0xff] %vm280_vm0, %v3380_v60  ;;  %v3381_v33 = vmax.f32 %v3349_v21, 0.0  ;;  %v3478_v45 = vrot.slane %v3442_v8, 7  ;;  %v9241_v61 = vld [vmem:[#allocation2 + $0x68] sm:$0xff]  ;;  %v4978_v43 = vsel %vm2554_vm7, %v4922_v34, %v4923_v39  ;;  %v4924_v50 = vrot.slane %v9183_v18, 1 }
 0x317   : > { %3415 = vst.msk [vmem:[#allocation2 + $0x88] sm:$0xff] %vm280_vm0, %v3383_v4  ;;  %7137 = vmatmul.mubr.msk.bf16.gmra.mrb[4].mxu1 %vm280_vm0, %v9234_v2  ;;  %v3443_v63 = vld [vmem:[#allocation2 + $0x58] sm:$0xff]  ;;  %v3481_v16 = vrot.slane %v9241_v61, 7  ;;  %v9252_v60 = vpack.c.bf16 %v9241_v61, %v9226_v52  ;;  %v4994_v62 = vmul.f32 %v8797_v26, %v4978_v43  ;;  %v4925_v51 = vrot.slane %v3442_v8, 1 }
 0x318   : > { %3413 = vst.msk [vmem:[#allocation2 + $0x78] sm:$0xff] %vm280_vm0, %v3381_v33  ;;  %v7114_v35 = vpop.f32.mrb[16].mxu0  ;;  %v3479_v38 = vrot.slane %v3443_v63, 7  ;;  %v3529_v18 = vsel %vm1106_vm4, %v3477_v0, %v3478_v45  ;;  %v9258_v29 = vpack.c.bf16 %v3443_v63, %v3442_v8  ;;  %v4977_v34 = vsel %vm2554_vm7, %v4923_v39, %v4924_v50 }
 0x319   : > { %v3354_v25 = vadd.f32 %v7114_v35, %v9085_v12  ;;  %v3234_v31 = vpop.f32.mrb[17].mxu0  ;;  %v3550_v21 = vmul.f32 %v10384_v37, %v3529_v18  ;;  %v3526_v26 = vsel %vm1106_vm4, %v3480_v27, %v3481_v16  ;;  %v9266_v4 = vpack.c.bf16 %v4994_v62, %v4979_v57  ;;  %v10386_v57 = vld [vmem:[#allocation8_spill] sm:$0xff] }
 0x31a   : > { %v3352_v33 = vadd.f32 %v9085_v12, %v3234_v31  ;;  %v7115_v43 = vpop.f32.mrb[18].mxu0  ;;  %v3528_v0 = vsel %vm1106_vm4, %v3478_v45, %v3479_v38  ;;  %v3527_v8 = vsel %vm1106_vm4, %v3479_v38, %v3480_v27  ;;  %v4976_v39 = vsel %vm2554_vm7, %v4924_v50, %v4925_v51 }
 0x31b   : > { %10385 = vst [vmem:[#allocation26_spill] sm:$0xff] %v9266_v4  ;;  %v3386_v35 = vmax.f32 %v3354_v25, 0.0  ;;  %v3355_v18 = vadd.f32 %v7115_v43, %v9085_v12  ;;  %v3237_v37 = vpop.f32.mrb[19].mxu0  ;;  %v9276_v48 = vpack.c.bf16 %v3528_v0, %v3550_v21  ;;  %v3552_v62 = vmul.f32 %v10386_v57, %v3527_v8 }
 0x31c   : > { %v3384_v20 = vmax.f32 %v3352_v33, 0.0  ;;  %v3353_v31 = vadd.f32 %v9085_v12, %v3237_v37  ;;  %v9280_v4 = vld [vmem:[#allocation2 + $0x80] sm:$0xff]  ;;  %v4996_v45 = vmul.f32 %v8802_v59, %v4976_v39  ;;  %v4926_v53 = vrot.slane %v3443_v63, 1 }
 0x31d   : > { %3418 = vst.msk [vmem:[#allocation2 + $0xa0] sm:$0xff] %vm280_vm0, %v3386_v35  ;;  %v3387_v27 = vmax.f32 %v3355_v18, 0.0  ;;  %7140 = vmatprep.mubr.msk.bf16.mxu1 %vm280_vm0, %v9276_v48  ;;  %v9286_v50 = vpack.c.bf16 %v3526_v26, %v3552_v62  ;;  %v9288_v38 = vld [vmem:[#allocation2 + $0x70] sm:$0xff]  ;;  %v3484_v25 = vrot.slane %v9280_v4, 7  ;;  %v4927_v21 = vrot.slane %v9226_v52, 1 }
 0x31e   : > { %3416 = vst.msk [vmem:[#allocation2 + $0x90] sm:$0xff] %vm280_vm0, %v3384_v20  ;;  %v3385_v33 = vmax.f32 %v3353_v31, 0.0  ;;  %v3482_v59 = vrot.slane %v9288_v38, 7  ;;  %v9294_v63 = vld [vmem:[#allocation2 + $0x88] sm:$0xff]  ;;  %v9296_v43 = vpack.c.bf16 %v4996_v45, %v4977_v34  ;;  %v4975_v0 = vsel %vm2554_vm7, %v4925_v51, %v4926_v53 }
 0x31f   : > { %3419 = vst.msk [vmem:[#allocation2 + $0xa8] sm:$0xff] %vm280_vm0, %v3387_v27  ;;  %7141 = vmatmul.mubr.msk.bf16.gmra.mrb[8].mxu1 %vm280_vm0, %v9286_v50  ;;  %v9303_v26 = vld [vmem:[#allocation2 + $0x78] sm:$0xff]  ;;  %v3485_v52 = vrot.slane %v9294_v63, 7  ;;  %v9308_v20 = vpack.c.bf16 %v9294_v63, %v9280_v4  ;;  %v4974_v34 = vsel %vm2554_vm7, %v4926_v53, %v4927_v21  ;;  %v4928_v8 = vrot.slane %v9241_v61, 1  ;;  %v10390_v53 = vld [vmem:[#allocation9_spill] sm:$0xff] }
 0x320   : > { %10387 = vst [vmem:[#allocation22_spill] sm:$0xff] %v9296_v43  ;;  %3417 = vst.msk [vmem:[#allocation2 + $0x98] sm:$0xff] %vm280_vm0, %v3385_v33  ;;  %v7118_v51 = vpop.f32.mrb[20].mxu0  ;;  %v3483_v39 = vrot.slane %v9303_v26, 7  ;;  %v3525_v35 = vsel %vm1106_vm4, %v3481_v16, %v3482_v59  ;;  %v9319_v18 = vpack.c.bf16 %v9303_v26, %v9288_v38  ;;  %v4998_v37 = vmul.f32 %v8836_v28, %v4974_v34 }
 0x321   : > { %10388 = vst [vmem:[#allocation25_spill] sm:$0xff] %v9308_v20  ;;  %v3358_v57 = vadd.f32 %v7118_v51, %v9085_v12  ;;  %v3250_v62 = vpop.f32.mrb[21].mxu0  ;;  %v3554_v31 = vmul.f32 %v10390_v53, %v3525_v35  ;;  %v3522_v61 = vsel %vm1106_vm4, %v3484_v25, %v3485_v52  ;;  %v4929_v45 = vrot.slane %v9288_v38, 1 }
 0x322   : > { %10389 = vst [vmem:[#allocation3_spill] sm:$0xff] %v9319_v18  ;;  %v3356_v27 = vadd.f32 %v9085_v12, %v3250_v62  ;;  %v7119_v33 = vpop.f32.mrb[22].mxu0  ;;  %v3524_v16 = vsel %vm1106_vm4, %v3482_v59, %v3483_v39  ;;  %v3523_v43 = vsel %vm1106_vm4, %v3483_v39, %v3484_v25  ;;  %v9332_v28 = vpack.c.bf16 %v4998_v37, %v4975_v0 }
 0x323   : > { %v3390_v34 = vmax.f32 %v3358_v57, 0.0  ;;  %v3359_v51 = vadd.f32 %v7119_v33, %v9085_v12  ;;  %v3253_v35 = vpop.f32.mrb[23].mxu0  ;;  %v9335_v53 = vpack.c.bf16 %v3524_v16, %v3554_v31  ;;  %v3556_v23 = vmul.f32 %v10392_v15, %v3523_v43 }
 0x324   : > { %10391 = vst [vmem:[#allocation4_spill] sm:$0xff] %v9332_v28  ;;  %v3388_v38 = vmax.f32 %v3356_v27, 0.0  ;;  %v3357_v62 = vadd.f32 %v9085_v12, %v3253_v35  ;;  %v9339_v10 = vld [vmem:[#allocation2 + $0xa0] sm:$0xff]  ;;  %v4972_v59 = vsel %vm2554_vm7, %v4928_v8, %v4929_v45  ;;  %v4973_v25 = vsel %vm2554_vm7, %v4927_v21, %v4928_v8 }
 0x325   : > { %3422 = vst.msk [vmem:[#allocation2 + $0xc0] sm:$0xff] %vm280_vm0, %v3390_v34  ;;  %v3391_v0 = vmax.f32 %v3359_v51, 0.0  ;;  %7144 = vmatprep.mubr.msk.bf16.mxu1 %vm280_vm0, %v9335_v53  ;;  %v9348_v39 = vpack.c.bf16 %v3522_v61, %v3556_v23  ;;  %v9350_v15 = vld [vmem:[#allocation2 + $0x90] sm:$0xff]  ;;  %v3488_v43 = vrot.slane %v9339_v10, 7  ;;  %v5000_v37 = vmul.f32 %v8841_v32, %v4972_v59  ;;  %v10396_v59 = vld [vmem:[#allocation11_spill] sm:$0xff] }
 0x326   : > { %3420 = vst.msk [vmem:[#allocation2 + $0xb0] sm:$0xff] %vm280_vm0, %v3388_v38  ;;  %v3389_v57 = vmax.f32 %v3357_v62, 0.0  ;;  %v3486_v31 = vrot.slane %v9350_v15, 7  ;;  %v9356_v21 = vld [vmem:[#allocation2 + $0xa8] sm:$0xff]  ;;  %v4930_v8 = vrot.slane %v9303_v26, 1  ;;  %v4931_v27 = vrot.slane %v9280_v4, 1 }
 0x327   : > { %3423 = vst.msk [vmem:[#allocation2 + $0xc8] sm:$0xff] %vm280_vm0, %v3391_v0  ;;  %7145 = vmatmul.mubr.msk.bf16.gmra.mrb[12].mxu1 %vm280_vm0, %v9348_v39  ;;  %v9363_v23 = vld [vmem:[#allocation2 + $0x98] sm:$0xff]  ;;  %v3489_v32 = vrot.slane %v9356_v21, 7  ;;  %v9368_v61 = vpack.c.bf16 %v9356_v21, %v9339_v10  ;;  %v9370_v33 = vpack.c.bf16 %v5000_v37, %v4973_v25  ;;  %v4932_v16 = vrot.slane %v9294_v63, 1 }
 0x328   : > { %3421 = vst.msk [vmem:[#allocation2 + $0xb8] sm:$0xff] %vm280_vm0, %v3389_v57  ;;  %v7122_v4 = vpop.f32.mrb[24].mxu0  ;;  %v3487_v26 = vrot.slane %v9363_v23, 7  ;;  %v3521_v34 = vsel %vm1106_vm4, %v3485_v52, %v3486_v31  ;;  %v9379_v51 = vpack.c.bf16 %v9363_v23, %v9350_v15  ;;  %v4970_v35 = vsel %vm2554_vm7, %v4930_v8, %v4931_v27 }
 0x329   : > { %10393 = vst [vmem:[#allocation5_spill] sm:$0xff] %v9368_v61  ;;  %10394 = vst [vmem:[#allocation6_spill] sm:$0xff] %v9370_v33  ;;  %v3362_v38 = vadd.f32 %v7122_v4, %v9085_v12  ;;  %v3266_v62 = vpop.f32.mrb[25].mxu0  ;;  %v3558_v63 = vmul.f32 %v10396_v59, %v3521_v34  ;;  %v3518_v25 = vsel %vm1106_vm4, %v3488_v43, %v3489_v32 }
 0x32a   : > { %10395 = vst [vmem:[#allocation7_spill] sm:$0xff] %v9379_v51  ;;  %v4971_v0 = vsel %vm2554_vm7, %v4929_v45, %v4930_v8  ;;  %v3360_v52 = vadd.f32 %v9085_v12, %v3266_v62  ;;  %v7123_v37 = vpop.f32.mrb[26].mxu0  ;;  %v3520_v57 = vsel %vm1106_vm4, %v3486_v31, %v3487_v26  ;;  %v3519_v33 = vsel %vm1106_vm4, %v3487_v26, %v3488_v43  ;;  %v10397_v51 = vld [vmem:[#allocation12_spill] sm:$0xff] }
 0x32b   : > { %v5002_v4 = vmul.f32 %v8867_v41, %v4970_v35  ;;  %v3394_v28 = vmax.f32 %v3362_v38, 0.0  ;;  %v3363_v34 = vadd.f32 %v7123_v37, %v9085_v12  ;;  %v3269_v59 = vpop.f32.mrb[27].mxu0  ;;  %v9396_v61 = vpack.c.bf16 %v3520_v57, %v3558_v63 }
 0x32c   : > { %v3560_v20 = vmul.f32 %v10397_v51, %v3519_v33  ;;  %v3392_v45 = vmax.f32 %v3360_v52, 0.0  ;;  %v3361_v8 = vadd.f32 %v9085_v12, %v3269_v59  ;;  %v9400_v62 = vld [vmem:[#allocation2 + $0xc0] sm:$0xff]  ;;  %v4933_v31 = vrot.slane %v9350_v15, 1  ;;  %v10400_v59 = vld [vmem:[#allocation16_spill] sm:$0xff] }
 0x32d   : > { %v9402_v18 = vpack.c.bf16 %v5002_v4, %v4971_v0  ;;  %3426 = vst.msk [vmem:[#allocation2 + $0xe0] sm:$0xff] %vm280_vm0, %v3394_v28  ;;  %v3395_v41 = vmax.f32 %v3363_v34, 0.0  ;;  %7148 = vmatprep.mubr.msk.bf16.mxu1 %vm280_vm0, %v9396_v61  ;;  %v9410_v26 = vld [vmem:[#allocation2 + $0xb0] sm:$0xff]  ;;  %v3492_v33 = vrot.slane %v9400_v62, 7  ;;  %v4969_v51 = vsel %vm2554_vm7, %v4931_v27, %v4932_v16 }
 0x32e   : > { %v9408_v43 = vpack.c.bf16 %v3518_v25, %v3560_v20  ;;  %3424 = vst.msk [vmem:[#allocation2 + $0xd0] sm:$0xff] %vm280_vm0, %v3392_v45  ;;  %v3393_v35 = vmax.f32 %v3361_v8, 0.0  ;;  %v3490_v15 = vrot.slane %v9410_v26, 7  ;;  %v9417_v38 = vld [vmem:[#allocation2 + $0xc8] sm:$0xff]  ;;  %v4968_v28 = vsel %vm2554_vm7, %v4932_v16, %v4933_v31 }
 0x32f   : > { %10398 = vst [vmem:[#allocation8_spill] sm:$0xff] %v9402_v18  ;;  %v4934_v20 = vrot.slane %v9363_v23, 1  ;;  %3427 = vst.msk [vmem:[#allocation2 + $0xe8] sm:$0xff] %vm280_vm0, %v3395_v41  ;;  %v9425_v63 = vld [vmem:[#allocation2 + $0xb8] sm:$0xff]  ;;  %v3493_v27 = vrot.slane %v9417_v38, 7  ;;  %v9430_v25 = vpack.c.bf16 %v9417_v38, %v9400_v62  ;;  %v5004_v0 = vmul.f32 %v8872_v11, %v4968_v28 }
 0x330   : > { %7149 = vmatmul.mubr.msk.bf16.gmra.mrb[16].mxu1 %vm280_vm0, %v9408_v43  ;;  %v4935_v52 = vrot.slane %v9339_v10, 1  ;;  %3425 = vst.msk [vmem:[#allocation2 + $0xd8] sm:$0xff] %vm280_vm0, %v3393_v35  ;;  %v7126_v23 = vpop.f32.mrb[28].mxu0  ;;  %v3491_v16 = vrot.slane %v9425_v63, 7  ;;  %v3517_v37 = vsel %vm1106_vm4, %v3489_v32, %v3490_v15  ;;  %v9440_v57 = vpack.c.bf16 %v9425_v63, %v9410_v26 }
 0x331   : > { %10399 = vst [vmem:[#allocation9_spill] sm:$0xff] %v9430_v25  ;;  %v4967_v4 = vsel %vm2554_vm7, %v4933_v31, %v4934_v20  ;;  %v3366_v34 = vadd.f32 %v7126_v23, %v9085_v12  ;;  %v3282_v11 = vpop.f32.mrb[29].mxu0  ;;  %v3562_v10 = vmul.f32 %v10400_v59, %v3517_v37  ;;  %v3514_v45 = vsel %vm1106_vm4, %v3492_v33, %v3493_v27 }
 0x332   : > { %v9448_v8 = vpack.c.bf16 %v5004_v0, %v4969_v51  ;;  %v3364_v41 = vadd.f32 %v9085_v12, %v3282_v11  ;;  %v7127_v32 = vpop.f32.mrb[30].mxu0  ;;  %v3516_v35 = vsel %vm1106_vm4, %v3490_v15, %v3491_v16  ;;  %v3515_v28 = vsel %vm1106_vm4, %v3491_v16, %v3492_v33  ;;  %v10402_v51 = vld [vmem:[#allocation17_spill] sm:$0xff] }
 0x333   : > { %v4966_v31 = vsel %vm2554_vm7, %v4934_v20, %v4935_v52  ;;  %v3398_v23 = vmax.f32 %v3366_v34, 0.0  ;;  %v3367_v37 = vadd.f32 %v7127_v32, %v9085_v12  ;;  %v3285_v59 = vpop.f32.mrb[31].mxu0  ;;  %v9458_v18 = vpack.c.bf16 %v3516_v35, %v3562_v10 }
 0x334   : > { %10401 = vst [vmem:[#allocation10_spill] sm:$0xff] %v9448_v8  ;;  %v3564_v0 = vmul.f32 %v10402_v51, %v3515_v28  ;;  %v3396_v8 = vmax.f32 %v3364_v41, 0.0  ;;  %v3365_v11 = vadd.f32 %v9085_v12, %v3285_v59  ;;  %v9462_v25 = vld [vmem:[#allocation2 + $0xe0] sm:$0xff]  ;;  %v5006_v15 = vmul.f32 %v8897_v13, %v4966_v31  ;;  %v10404_v59 = vld [vmem:[#allocation18_spill] sm:$0xff] }
 0x335   : > { %v4936_v33 = vrot.slane %v9356_v21, 1  ;;  %3430 = vst.msk [vmem:[#allocation2 + $0x100] sm:$0xff] %vm280_vm0, %v3398_v23  ;;  %v3399_v20 = vmax.f32 %v3367_v37, 0.0  ;;  %7152 = vmatprep.mubr.msk.bf16.mxu1 %vm280_vm0, %v9458_v18  ;;  %v3458_v34 = vld [vmem:[#allocation2 + $0xd0] sm:$0xff]  ;;  %v3496_v10 = vrot.slane %v9462_v25, 7  ;;  %v4937_v41 = vrot.slane %v9410_v26, 1 }
 0x336   : > { %v9469_v16 = vpack.c.bf16 %v3514_v45, %v3564_v0  ;;  %3428 = vst.msk [vmem:[#allocation2 + $0xf0] sm:$0xff] %vm280_vm0, %v3396_v8  ;;  %v3397_v12 = vmax.f32 %v3365_v11, 0.0  ;;  %v3494_v32 = vrot.slane %v3458_v34, 7  ;;  %v9474_v13 = vld [vmem:[#allocation2 + $0xe8] sm:$0xff]  ;;  %v9476_v21 = vpack.c.bf16 %v5006_v15, %v4967_v4 }
 0x337   : > { %v4965_v35 = vsel %vm2554_vm7, %v4935_v52, %v4936_v33  ;;  %3431 = vst.msk [vmem:[#allocation2 + $0x108] sm:$0xff] %vm280_vm0, %v3399_v20  ;;  %v3459_v45 = vld [vmem:[#allocation2 + $0xd8] sm:$0xff]  ;;  %v3497_v28 = vrot.slane %v9474_v13, 7  ;;  %v9486_v26 = vpack.c.bf16 %v9474_v13, %v9462_v25  ;;  %v4964_v8 = vsel %vm2554_vm7, %v4936_v33, %v4937_v41 }
 0x338   : > { %10403 = vst [vmem:[#allocation11_spill] sm:$0xff] %v9476_v21  ;;  %7153 = vmatmul.mubr.msk.bf16.gmra.mrb[20].mxu1 %vm280_vm0, %v9469_v16  ;;  %v4938_v4 = vrot.slane %v9425_v63, 1  ;;  %3429 = vst.msk [vmem:[#allocation2 + $0xf8] sm:$0xff] %vm280_vm0, %v3397_v12  ;;  %v3495_v52 = vrot.slane %v3459_v45, 7  ;;  %v3513_v31 = vsel %vm1106_vm4, %v3493_v27, %v3494_v32  ;;  %v9494_v23 = vpack.c.bf16 %v3459_v45, %v3458_v34  ;;  %v10405_v12 = vld [vmem:[#allocation20_spill] sm:$0xff] }
 0x339   : > { %v5008_v37 = vmul.f32 %v8902_v42, %v4964_v8  ;;  %v3566_v51 = vmul.f32 %v10404_v59, %v3513_v31  ;;  %v3510_v0 = vsel %vm1106_vm4, %v3496_v10, %v3497_v28  ;;  %v4939_v11 = vrot.slane %v9400_v62, 1 }
 0x33a   : > { %v4963_v63 = vsel %vm2554_vm7, %v4937_v41, %v4938_v4  ;;  %v3512_v15 = vsel %vm1106_vm4, %v3494_v32, %v3495_v52  ;;  %v3511_v27 = vsel %vm1106_vm4, %v3495_v52, %v3496_v10  ;;  %v4940_v42 = vrot.slane %v9417_v38, 1 }
 0x33b   : > { %v9507_v33 = vpack.c.bf16 %v5008_v37, %v4965_v35  ;;  %v9510_v20 = vpack.c.bf16 %v3512_v15, %v3566_v51  ;;  %v3568_v8 = vmul.f32 %v10405_v12, %v3511_v27  ;;  %v4962_v62 = vsel %vm2554_vm7, %v4938_v4, %v4939_v11 }
 0x33c   : > { %v4941_v31 = vrot.slane %v3458_v34, 1  ;;  %v3464_v59 = vld [vmem:[#allocation2 + $0x100] sm:$0xff]  ;;  %v5010_v41 = vmul.f32 %v8927_v7, %v4962_v62  ;;  %v4961_v32 = vsel %vm2554_vm7, %v4939_v11, %v4940_v42  ;;  %v4942_v21 = vrot.slane %v3459_v45, 1 }
 0x33d   : > { %v4943_v10 = vrot.slane %v9462_v25, 1  ;;  %7156 = vmatprep.mubr.msk.bf16.mxu1 %vm280_vm0, %v9510_v20  ;;  %v9521_v38 = vpack.c.bf16 %v3510_v0, %v3568_v8  ;;  %v3462_v35 = vld [vmem:[#allocation2 + $0xf0] sm:$0xff]  ;;  %v3500_v52 = vrot.slane %v3464_v59, 7  ;;  %v4944_v34 = vrot.slane %v9474_v13, 1 }
 0x33e   : > { %v4960_v4 = vsel %vm2554_vm7, %v4940_v42, %v4941_v31  ;;  %v3498_v37 = vrot.slane %v3462_v35, 7  ;;  %v3465_v7 = vld [vmem:[#allocation2 + $0x108] sm:$0xff]  ;;  %v9526_v51 = vpack.c.bf16 %v5010_v41, %v4963_v63  ;;  %v4959_v27 = vsel %vm2554_vm7, %v4941_v31, %v4942_v21  ;;  %v10408_v8 = vld [vmem:[#allocation21_spill] sm:$0xff] }
 0x33f   : > { %v5012_v45 = vmul.f32 %v8932_v19, %v4960_v4  ;;  %v4958_v25 = vsel %vm2554_vm7, %v4942_v21, %v4943_v10  ;;  %v3463_v0 = vld [vmem:[#allocation2 + $0xf8] sm:$0xff]  ;;  %v3501_v11 = vrot.slane %v3465_v7, 7  ;;  %v9533_v15 = vpack.c.bf16 %v3465_v7, %v3464_v59 }
 0x340   : > { %10406 = vst [vmem:[#allocation12_spill] sm:$0xff] %v9526_v51  ;;  %7157 = vmatmul.mubr.msk.bf16.gmra.mrb[24].mxu1 %vm280_vm0, %v9521_v38  ;;  %v5014_v13 = vmul.f32 %v8956_v9, %v4958_v25  ;;  %v3499_v42 = vrot.slane %v3463_v0, 7  ;;  %v3509_v63 = vsel %vm1106_vm4, %v3497_v28, %v3498_v37  ;;  %v9540_v19 = vpack.c.bf16 %v3463_v0, %v3462_v35 }
 0x341   : > { %v9542_v12 = vpack.c.bf16 %v5012_v45, %v4961_v32  ;;  %v3570_v62 = vmul.f32 %v10408_v8, %v3509_v63  ;;  %v3506_v41 = vsel %vm1106_vm4, %v3500_v52, %v3501_v11  ;;  %v10409_v4 = vrot.slane %v9104_v30, 7  ;;  %v10410_v63 = vld [vmem:[#allocation24_spill] sm:$0xff] }
 0x342   : > { %v9551_v31 = vpack.c.bf16 %v5014_v13, %v4959_v27  ;;  %v3508_v9 = vsel %vm1106_vm4, %v3498_v37, %v3499_v42  ;;  %v3507_v28 = vsel %vm1106_vm4, %v3499_v42, %v3500_v52  ;;  %v4945_v45 = vrot.slane %v3462_v35, 1 }
 0x343   : > { %10407 = vst [vmem:[#allocation16_spill] sm:$0xff] %v9542_v12  ;;  %v3505_v21 = vsel %vm1106_vm4, %v3501_v11, %v10409_v4  ;;  %v3591_v25 = vpack.c.bf16 %v3508_v9, %v3570_v62  ;;  %v3572_v8 = vmul.f32 %v10410_v63, %v3507_v28  ;;  %v4957_v12 = vsel %vm2554_vm7, %v4943_v10, %v4944_v34  ;;  %v10425_v4 = vld [vmem:[#allocation4_spill] sm:$0xff]  ;;  %v10428_v28 = vld [vmem:[#allocation10_spill] sm:$0xff] }
 0x344   : > { %v9558_v32 = vmul.f32 %v8559_v56, %v3505_v21  ;;  %v4946_v51 = vrot.slane %v3463_v0, 1  ;;  %v4956_v37 = vsel %vm2554_vm7, %v4944_v34, %v4945_v45  ;;  %v4947_v27 = vrot.slane %v3464_v59, 1  ;;  %v10426_v21 = vld [vmem:[#allocation6_spill] sm:$0xff]  ;;  %v10427_v9 = vld [vmem:[#allocation8_spill] sm:$0xff] }
 0x345   : > { %v4948_v13 = vrot.slane %v3465_v7, 1  ;;  %7160 = vmatprep.mubr.msk.bf16.mxu1 %vm280_vm0, %v3591_v25  ;;  %v3592_v56 = vpack.c.bf16 %v3506_v41, %v3572_v8  ;;  %v5016_v35 = vmul.f32 %v8961_v47, %v4956_v37  ;;  %v10411_v0 = vrot.slane %v9104_v30, 1  ;;  %v7996_v41 = vld [vmem:[%s10267_s3 + $0x68] sm:$0xff]  }
 0x346   : > { %v3593_v11 = vpack.c.bf16 %v9132_v49, %v9558_v32  ;;  %v4955_v52 = vsel %vm2554_vm7, %v4945_v45, %v4946_v51  ;;  %v4954_v10 = vsel %vm2554_vm7, %v4946_v51, %v4947_v27  ;;  %v10412_v42 = vpack.c.bf16 %v9113_v55, %v9108_v14  ;;  %v7999_v14 = vld [vmem:[%s10267_s3 + $0x40] sm:$0xff]   ;;  %v8008_v63 = vld [vmem:[%s10267_s3 + $0x88] sm:$0xff]  }
 0x347   : > { %v4952_v49 = vsel %vm2554_vm7, %v4948_v13, %v10411_v0  ;;  %v4953_v59 = vsel %vm2554_vm7, %v4947_v27, %v4948_v13  ;;  %v9580_v34 = vpack.c.bf16 %v5016_v35, %v4957_v12  ;;  %v5018_v47 = vmul.f32 %v8978_v17, %v4954_v10  ;;  %v7997_v17 = vld [vmem:[%s10267_s3 + $0x10] sm:$0xff]   ;;  %v10424_v12 = vld [vmem:[#allocation22_spill] sm:$0xff]  ;;  %v10429_v32 = vld [vmem:[#allocation11_spill] sm:$0xff] }
 0x348   : > { %7161 = vmatmul.mubr.msk.bf16.gmra.mrb[28].mxu1 %vm280_vm0, %v3592_v56  ;;  %v5020_v7 = vmul.f32 %v9021_v40, %v4952_v49  ;;  %v7998_v40 = vld [vmem:[%s10267_s3 + $0x18] sm:$0xff]   ;;  %v4213_v55 = vpack.c.bf16 %v9096_v54, %v9089_v36  ;;  %v8001_v36 = vld [vmem:[%s10267_s3 + $0x70] sm:$0xff]   ;;  %v10430_v45 = vld [vmem:[#allocation12_spill] sm:$0xff]  ;;  %vm5837_vm4 = vcmask 254976  }
 0x349   : > { %7168 = vmatprep.mubr.msk.bf16.mxu1 %vm280_vm0, %v10412_v42  ;;  %v9588_v51 = vpack.c.bf16 %v5018_v47, %v4955_v52 }
 0x34a   : > { %v9590_v62 = vpack.c.bf16 %v5020_v7, %v4953_v59 }
 0x350   : > { %7169 = vmatmul.mubr.msk.bf16.vlgmr.msra.gmra.mrb[0].mxu1 %vm280_vm0, %v9162_v46  ;;  %v10413_v46 = vld [vmem:[#allocation3_spill] sm:$0xff] }
 0x351   : > { %7201 = vmatpush3.bf16.msra.mxu1 %v9213_v22  ;;  %7172 = vmatprep.mubr.msk.bf16.mxu1 %vm280_vm0, %v9175_v58  ;;  %v10415_v22 = vld [vmem:[#allocation7_spill] sm:$0xff] }
 0x352   : > { %7202 = vmatprep.subr.bf16.mxu1 %v7996_v41 }
 0x355   : > { %7203 = vmatpush3.bf16.msra.mxu1 %v7996_v41 }
 0x356   : > { %7236 = vmatprep.subr.bf16.mxu1 %v7997_v17 }
 0x358   : > { %7173 = vmatmul.mubr.msk.bf16.gmra.mrb[4].mxu1 %vm280_vm0, %v9222_v24 }
 0x359   : > { %7176 = vmatprep.mubr.msk.bf16.mxu1 %vm280_vm0, %v9234_v2 }
 0x360   : > { %7177 = vmatmul.mubr.msk.bf16.gmra.mrb[8].mxu1 %vm280_vm0, %v9276_v48 }
 0x361   : > { %7180 = vmatprep.mubr.msk.bf16.mxu1 %vm280_vm0, %v9286_v50 }
 0x368   : > { %7181 = vmatmul.mubr.msk.bf16.gmra.mrb[12].mxu1 %vm280_vm0, %v9335_v53 }
 0x369   : > { %7184 = vmatprep.mubr.msk.bf16.mxu1 %vm280_vm0, %v9348_v39 }
 0x370   : > { %7185 = vmatmul.mubr.msk.bf16.gmra.mrb[16].mxu1 %vm280_vm0, %v9396_v61 }
 0x371   : > { %7188 = vmatprep.mubr.msk.bf16.mxu1 %vm280_vm0, %v9408_v43 }
 0x378   : > { %7189 = vmatmul.mubr.msk.bf16.gmra.mrb[20].mxu1 %vm280_vm0, %v9458_v18 }
 0x379   : > { %7192 = vmatprep.mubr.msk.bf16.mxu1 %vm280_vm0, %v9469_v16 }
 0x380   : > { %7193 = vmatmul.mubr.msk.bf16.gmra.mrb[24].mxu1 %vm280_vm0, %v9510_v20 }
 0x381   : > { %7196 = vmatprep.mubr.msk.bf16.mxu1 %vm280_vm0, %v9521_v38 }
 0x388   : > { %7197 = vmatmul.mubr.msk.bf16.gmra.mrb[28].mxu1 %vm280_vm0, %v3591_v25 }
 0x389   : > { %7204 = vmatprep.mubr.msk.bf16.mxu1 %vm280_vm0, %v9175_v58  ;;  %v10414_v58 = vld [vmem:[#allocation25_spill] sm:$0xff] }
 0x390   : > { %7205 = vmatmul.mubr.msk.bf16.vlgmr.msra.gmra.mrb[0].mxu1 %vm280_vm0, %v9222_v24  ;;  %v10416_v24 = vld [vmem:[#allocation5_spill] sm:$0xff] }
 0x391   : > { %7237 = vmatpush3.bf16.msra.mxu1 %v7997_v17  ;;  %7208 = vmatprep.mubr.msk.bf16.mxu1 %vm280_vm0, %v9234_v2  ;;  %v10417_v2 = vld [vmem:[#allocation9_spill] sm:$0xff] }
 0x392   : > { %7238 = vmatprep.subr.bf16.mxu1 %v7998_v40 }
 0x395   : > { %7239 = vmatpush3.bf16.msra.mxu1 %v7998_v40 }
 0x396   : > { %7272 = vmatprep.subr.bf16.mxu1 %v7999_v14 }
 0x398   : > { %7209 = vmatmul.mubr.msk.bf16.gmra.mrb[4].mxu1 %vm280_vm0, %v9276_v48  ;;  %v8000_v48 = vld [vmem:[%s10267_s3 + $0x48] sm:$0xff]  }
 0x399   : > { %7212 = vmatprep.mubr.msk.bf16.mxu1 %vm280_vm0, %v9286_v50  ;;  %v8002_v50 = vld [vmem:[%s10267_s3 + $0x78] sm:$0xff]  }
 0x3a0   : > { %7213 = vmatmul.mubr.msk.bf16.gmra.mrb[8].mxu1 %vm280_vm0, %v9335_v53  ;;  %v8005_v53 = vld [vmem:[%s10267_s3 + $0x50] sm:$0xff]  }
 0x3a1   : > { %7216 = vmatprep.mubr.msk.bf16.mxu1 %vm280_vm0, %v9348_v39 }
 0x3a8   : > { %7217 = vmatmul.mubr.msk.bf16.gmra.mrb[12].mxu1 %vm280_vm0, %v9396_v61  ;;  %v10420_v61 = vld [vmem:[#allocation13_spill] sm:$0xff] }
 0x3a9   : > { %7220 = vmatprep.mubr.msk.bf16.mxu1 %vm280_vm0, %v9408_v43 }
 0x3b0   : > { %7221 = vmatmul.mubr.msk.bf16.gmra.mrb[16].mxu1 %vm280_vm0, %v9458_v18  ;;  %v8003_v18 = vld [vmem:[%s10267_s3 + $0x20] sm:$0xff]  }
 0x3b1   : > { %7224 = vmatprep.mubr.msk.bf16.mxu1 %vm280_vm0, %v9469_v16 }
 0x3b8   : > { %7225 = vmatmul.mubr.msk.bf16.gmra.mrb[20].mxu1 %vm280_vm0, %v9510_v20  ;;  %v10421_v20 = vld [vmem:[#allocation19_spill] sm:$0xff] }
 0x3b9   : > { %7228 = vmatprep.mubr.msk.bf16.mxu1 %vm280_vm0, %v9521_v38  ;;  %v10422_v38 = vld [vmem:[#allocation23_spill] sm:$0xff] }
 0x3c0   : > { %7229 = vmatmul.mubr.msk.bf16.gmra.mrb[24].mxu1 %vm280_vm0, %v3591_v25  ;;  %v10431_v25 = vld [vmem:[#allocation16_spill] sm:$0xff] }
 0x3c1   : > { %7232 = vmatprep.mubr.msk.bf16.mxu1 %vm280_vm0, %v3592_v56  ;;  %v9910_v56 = vld [vmem:[%s10268_s4] ss:$0 sm:$0xff] }
 0x3c8   : > { %7233 = vmatmul.mubr.msk.bf16.gmra.mrb[28].mxu1 %vm280_vm0, %v3593_v11 }
 0x3c9   : > { %7240 = vmatprep.mubr.msk.bf16.mxu1 %vm280_vm0, %v4213_v55 }
 0x3d0   : > { %7241 = vmatmul.mubr.msk.bf16.vlgmr.msra.gmra.mrb[0].mxu1 %vm280_vm0, %v9146_v44 }
 0x3d1   : > { %7273 = vmatpush3.bf16.msra.mxu1 %v7999_v14  ;;  %7244 = vmatprep.mubr.msk.bf16.mxu1 %vm280_vm0, %v9140_v5 }
 0x3d2   : > { %7274 = vmatprep.subr.bf16.mxu1 %v8000_v48 }
 0x3d5   : > { %7275 = vmatpush3.bf16.msra.mxu1 %v8000_v48 }
 0x3d6   : > { %7308 = vmatprep.subr.bf16.mxu1 %v8001_v36 }
 0x3d8   : > { %7245 = vmatmul.mubr.msk.bf16.gmra.mrb[4].mxu1 %vm280_vm0, %v9202_v1 }
 0x3d9   : > { %7248 = vmatprep.mubr.msk.bf16.mxu1 %vm280_vm0, %v9192_v6 }
 0x3e0   : > { %7249 = vmatmul.mubr.msk.bf16.gmra.mrb[8].mxu1 %vm280_vm0, %v9258_v29 }
 0x3e1   : > { %7252 = vmatprep.mubr.msk.bf16.mxu1 %vm280_vm0, %v9252_v60 }
 0x3e8   : > { %7253 = vmatmul.mubr.msk.bf16.gmra.mrb[12].mxu1 %vm280_vm0, %v10413_v46 }
 0x3e9   : > { %7256 = vmatprep.mubr.msk.bf16.mxu1 %vm280_vm0, %v10414_v58 }
 0x3f0   : > { %7257 = vmatmul.mubr.msk.bf16.gmra.mrb[16].mxu1 %vm280_vm0, %v10415_v22 }
 0x3f1   : > { %7260 = vmatprep.mubr.msk.bf16.mxu1 %vm280_vm0, %v10416_v24 }
 0x3f8   : > { %7261 = vmatmul.mubr.msk.bf16.gmra.mrb[20].mxu1 %vm280_vm0, %v9440_v57 }
 0x3f9   : > { %7264 = vmatprep.mubr.msk.bf16.mxu1 %vm280_vm0, %v10417_v2 }
 0x400   : > { %7265 = vmatmul.mubr.msk.bf16.gmra.mrb[24].mxu1 %vm280_vm0, %v9494_v23 }
 0x401   : > { %7268 = vmatprep.mubr.msk.bf16.mxu1 %vm280_vm0, %v9486_v26 }
 0x408   : > { %7269 = vmatmul.mubr.msk.bf16.gmra.mrb[28].mxu1 %vm280_vm0, %v9540_v19 }
 0x409   : > { %7276 = vmatprep.mubr.msk.bf16.mxu1 %vm280_vm0, %v9146_v44  ;;  %v8004_v44 = vld [vmem:[%s10267_s3 + $0x28] sm:$0xff]  }
 0x410   : > { %7277 = vmatmul.mubr.msk.bf16.vlgmr.msra.gmra.mrb[0].mxu1 %vm280_vm0, %v9140_v5 }
 0x411   : > { %7309 = vmatpush3.bf16.msra.mxu1 %v8001_v36  ;;  %7280 = vmatprep.mubr.msk.bf16.mxu1 %vm280_vm0, %v9202_v1 }
 0x412   : > { %7310 = vmatprep.subr.bf16.mxu1 %v8002_v50 }
 0x415   : > { %7311 = vmatpush3.bf16.msra.mxu1 %v8002_v50 }
 0x416   : > { %7344 = vmatprep.subr.bf16.mxu1 %v8003_v18 }
 0x418   : > { %7281 = vmatmul.mubr.msk.bf16.gmra.mrb[4].mxu1 %vm280_vm0, %v9192_v6 }
 0x419   : > { %7284 = vmatprep.mubr.msk.bf16.mxu1 %vm280_vm0, %v9258_v29 }
 0x420   : > { %7285 = vmatmul.mubr.msk.bf16.gmra.mrb[8].mxu1 %vm280_vm0, %v9252_v60 }
 0x421   : > { %7288 = vmatprep.mubr.msk.bf16.mxu1 %vm280_vm0, %v10413_v46 }
 0x428   : > { %7289 = vmatmul.mubr.msk.bf16.gmra.mrb[12].mxu1 %vm280_vm0, %v10414_v58 }
 0x429   : > { %7292 = vmatprep.mubr.msk.bf16.mxu1 %vm280_vm0, %v10415_v22 }
 0x430   : > { %7293 = vmatmul.mubr.msk.bf16.gmra.mrb[16].mxu1 %vm280_vm0, %v10416_v24 }
 0x431   : > { %7296 = vmatprep.mubr.msk.bf16.mxu1 %vm280_vm0, %v9440_v57 }
 0x438   : > { %7297 = vmatmul.mubr.msk.bf16.gmra.mrb[20].mxu1 %vm280_vm0, %v10417_v2 }
 0x439   : > { %7300 = vmatprep.mubr.msk.bf16.mxu1 %vm280_vm0, %v9494_v23 }
 0x440   : > { %7301 = vmatmul.mubr.msk.bf16.gmra.mrb[24].mxu1 %vm280_vm0, %v9486_v26 }
 0x441   : > { %7304 = vmatprep.mubr.msk.bf16.mxu1 %vm280_vm0, %v9540_v19 }
 0x448   : > { %7305 = vmatmul.mubr.msk.bf16.gmra.mrb[28].mxu1 %vm280_vm0, %v9533_v15 }
 0x449   : > { %7312 = vmatprep.mubr.msk.bf16.mxu1 %vm280_vm0, %v9140_v5  ;;  %v4916_v5 = vrot.slane %v9096_v54, 1 }
 0x450   : > { %7313 = vmatmul.mubr.msk.bf16.vlgmr.msra.gmra.mrb[0].mxu1 %vm280_vm0, %v9202_v1 }
 0x451   : > { %7345 = vmatpush3.bf16.msra.mxu1 %v8003_v18  ;;  %7316 = vmatprep.mubr.msk.bf16.mxu1 %vm280_vm0, %v9192_v6  ;;  %v9775_v6 = vld [vmem:[#allocation2] sm:$0xff] }
 0x452   : > { %7346 = vmatprep.subr.bf16.mxu1 %v8004_v44  ;;  %v4915_v1 = vrot.slane %v9775_v6, 1 }
 0x454   : > { %v4985_v16 = vsel %vm2554_vm7, %v4915_v1, %v4916_v5 }
 0x455   : > { %7347 = vmatpush3.bf16.msra.mxu1 %v8004_v44 }
 0x456   : > { %7380 = vmatprep.subr.bf16.mxu1 %v8005_v53 }
 0x458   : > { %7317 = vmatmul.mubr.msk.bf16.gmra.mrb[4].mxu1 %vm280_vm0, %v9258_v29 }
 0x459   : > { %7320 = vmatprep.mubr.msk.bf16.mxu1 %vm280_vm0, %v9252_v60  ;;  %v10418_v60 = vld [vmem:[#allocation15_spill] sm:$0xff] }
 0x45a   : > { %v10419_v29 = vrot.slane %v10418_v60, 1 }
 0x45c   : > { %v4984_v39 = vsel %vm2554_vm7, %v4916_v5, %v10419_v29 }
 0x45d   : > { %v4988_v43 = vmul.f32 %v10420_v61, %v4984_v39 }
 0x460   : > { %7321 = vmatmul.mubr.msk.bf16.gmra.mrb[8].mxu1 %vm280_vm0, %v10413_v46 }
 0x461   : > { %7324 = vmatprep.mubr.msk.bf16.mxu1 %vm280_vm0, %v10414_v58 }
 0x468   : > { %7325 = vmatmul.mubr.msk.bf16.gmra.mrb[12].mxu1 %vm280_vm0, %v10415_v22 }
 0x469   : > { %7328 = vmatprep.mubr.msk.bf16.mxu1 %vm280_vm0, %v10416_v24 }
 0x470   : > { %7329 = vmatmul.mubr.msk.bf16.gmra.mrb[16].mxu1 %vm280_vm0, %v9440_v57  ;;  %v9785_v57 = vld [vmem:[#allocation2 + $0x118] sm:$0xff] }
 0x471   : > { %7332 = vmatprep.mubr.msk.bf16.mxu1 %vm280_vm0, %v10417_v2  ;;  %v4230_v54 = vpack.c.bf16 %v9785_v57, %v9104_v30  ;;  %v4950_v8 = vrot.slane %v9785_v57, 1 }
 0x473   : > { %v4986_v11 = vsel %vm2554_vm7, %v4950_v8, %v4915_v1 }
 0x478   : > { %7333 = vmatmul.mubr.msk.bf16.gmra.mrb[20].mxu1 %vm280_vm0, %v9494_v23  ;;  %v8006_v23 = vld [vmem:[%s10267_s3 + $0x58] sm:$0xff]  }
 0x479   : > { %7336 = vmatprep.mubr.msk.bf16.mxu1 %vm280_vm0, %v9486_v26  ;;  %v5023_v26 = vpack.c.bf16 %v4988_v43, %v4985_v16 }
 0x480   : > { %7337 = vmatmul.mubr.msk.bf16.gmra.mrb[24].mxu1 %vm280_vm0, %v9540_v19  ;;  %v10423_v19 = vld [vmem:[#allocation26_spill] sm:$0xff] }
 0x481   : > { %7340 = vmatprep.mubr.msk.bf16.mxu1 %vm280_vm0, %v9533_v15  ;;  %v8007_v15 = vld [vmem:[%s10267_s3 + $0x80] sm:$0xff]  }
 0x488   : > { %7341 = vmatmul.mubr.msk.bf16.gmra.mrb[28].mxu1 %vm280_vm0, %v4230_v54 }
 0x489   : > { %7348 = vmatprep.mubr.msk.bf16.mxu1 %vm280_vm0, %v5023_v26 }
 0x490   : > { %7349 = vmatmul.mubr.msk.bf16.vlgmr.msra.gmra.mrb[0].mxu1 %vm280_vm0, %v10421_v20 }
 0x491   : > { %7381 = vmatpush3.bf16.msra.mxu1 %v8005_v53  ;;  %7352 = vmatprep.mubr.msk.bf16.mxu1 %vm280_vm0, %v10422_v38 }
 0x492   : > { %7382 = vmatprep.subr.bf16.mxu1 %v8006_v23 }
 0x495   : > { %7383 = vmatpush3.bf16.msra.mxu1 %v8006_v23 }
 0x496   : > { %7416 = vmatprep.subr.bf16.mxu1 %v8007_v15 }
 0x498   : > { %7353 = vmatmul.mubr.msk.bf16.gmra.mrb[4].mxu1 %vm280_vm0, %v10423_v19 }
 0x499   : > { %7356 = vmatprep.mubr.msk.bf16.mxu1 %vm280_vm0, %v10424_v12 }
 0x4a0   : > { %7357 = vmatmul.mubr.msk.bf16.gmra.mrb[8].mxu1 %vm280_vm0, %v10425_v4 }
 0x4a1   : > { %7360 = vmatprep.mubr.msk.bf16.mxu1 %vm280_vm0, %v10426_v21 }
 0x4a8   : > { %7361 = vmatmul.mubr.msk.bf16.gmra.mrb[12].mxu1 %vm280_vm0, %v10427_v9 }
 0x4a9   : > { %7364 = vmatprep.mubr.msk.bf16.mxu1 %vm280_vm0, %v10428_v28 }
 0x4b0   : > { %7365 = vmatmul.mubr.msk.bf16.gmra.mrb[16].mxu1 %vm280_vm0, %v10429_v32 }
 0x4b1   : > { %7368 = vmatprep.mubr.msk.bf16.mxu1 %vm280_vm0, %v9507_v33 }
 0x4b8   : > { %7369 = vmatmul.mubr.msk.bf16.gmra.mrb[20].mxu1 %vm280_vm0, %v10430_v45 }
 0x4b9   : > { %7372 = vmatprep.mubr.msk.bf16.mxu1 %vm280_vm0, %v10431_v25 }
 0x4c0   : > { %7373 = vmatmul.mubr.msk.bf16.gmra.mrb[24].mxu1 %vm280_vm0, %v9551_v31 }
 0x4c1   : > { %7376 = vmatprep.mubr.msk.bf16.mxu1 %vm280_vm0, %v9580_v34 }
 0x4c8   : > { %7377 = vmatmul.mubr.msk.bf16.gmra.mrb[28].mxu1 %vm280_vm0, %v9588_v51 }
 0x4c9   : > { %7384 = vmatprep.mubr.msk.bf16.mxu1 %vm280_vm0, %v10421_v20 }
 0x4d0   : > { %7385 = vmatmul.mubr.msk.bf16.vlgmr.msra.gmra.mrb[0].mxu1 %vm280_vm0, %v10422_v38 }
 0x4d1   : > { %7417 = vmatpush3.bf16.msra.mxu1 %v8007_v15  ;;  %7388 = vmatprep.mubr.msk.bf16.mxu1 %vm280_vm0, %v10423_v19 }
 0x4d2   : > { %7418 = vmatprep.subr.bf16.mxu1 %v8008_v63 }
 0x4d5   : > { %7419 = vmatpush3.bf16.msra.mxu1 %v8008_v63 }
 0x4d8   : > { %7389 = vmatmul.mubr.msk.bf16.gmra.mrb[4].mxu1 %vm280_vm0, %v10424_v12 }
 0x4d9   : > { %7392 = vmatprep.mubr.msk.bf16.mxu1 %vm280_vm0, %v10425_v4 }
 0x4e0   : > { %7393 = vmatmul.mubr.msk.bf16.gmra.mrb[8].mxu1 %vm280_vm0, %v10426_v21 }
 0x4e1   : > { %7396 = vmatprep.mubr.msk.bf16.mxu1 %vm280_vm0, %v10427_v9 }
 0x4e8   : > { %7397 = vmatmul.mubr.msk.bf16.gmra.mrb[12].mxu1 %vm280_vm0, %v10428_v28 }
 0x4e9   : > { %7400 = vmatprep.mubr.msk.bf16.mxu1 %vm280_vm0, %v10429_v32 }
 0x4f0   : > { %7401 = vmatmul.mubr.msk.bf16.gmra.mrb[16].mxu1 %vm280_vm0, %v9507_v33 }
 0x4f1   : > { %7404 = vmatprep.mubr.msk.bf16.mxu1 %vm280_vm0, %v10430_v45 }
 0x4f8   : > { %7405 = vmatmul.mubr.msk.bf16.gmra.mrb[20].mxu1 %vm280_vm0, %v10431_v25 }
 0x4f9   : > { %7408 = vmatprep.mubr.msk.bf16.mxu1 %vm280_vm0, %v9551_v31 }
 0x500   : > { %7409 = vmatmul.mubr.msk.bf16.gmra.mrb[24].mxu1 %vm280_vm0, %v9580_v34 }
 0x501   : > { %7412 = vmatprep.mubr.msk.bf16.mxu1 %vm280_vm0, %v9588_v51 }
 0x508   : > { %7413 = vmatmul.mubr.msk.bf16.gmra.mrb[28].mxu1 %vm280_vm0, %v9590_v62 }
 0x509   : > { %7420 = vmatprep.mubr.msk.bf16.mxu1 %vm280_vm0, %v10422_v38 }
 0x510   : > { %7421 = vmatmul.mubr.msk.bf16.vlgmr.msra.gmra.mrb[0].mxu1 %vm280_vm0, %v10423_v19 }
 0x511   : > { %7424 = vmatprep.mubr.msk.bf16.mxu1 %vm280_vm0, %v10424_v12 }
 0x518   : > { %7425 = vmatmul.mubr.msk.bf16.gmra.mrb[4].mxu1 %vm280_vm0, %v10425_v4 }
 0x519   : > { %7428 = vmatprep.mubr.msk.bf16.mxu1 %vm280_vm0, %v10426_v21 }
 0x520   : > { %7429 = vmatmul.mubr.msk.bf16.gmra.mrb[8].mxu1 %vm280_vm0, %v10427_v9 }
 0x521   : > { %7432 = vmatprep.mubr.msk.bf16.mxu1 %vm280_vm0, %v10428_v28 }
 0x528   : > { %7433 = vmatmul.mubr.msk.bf16.gmra.mrb[12].mxu1 %vm280_vm0, %v10429_v32 }
 0x529   : > { %7436 = vmatprep.mubr.msk.bf16.mxu1 %vm280_vm0, %v9507_v33  ;;  %v10432_v33 = vld [vmem:[#allocation14_spill] sm:$0xff] }
 0x52a   : > { %v5022_v37 = vmul.f32 %v10432_v33, %v4986_v11 }
 0x530   : > { %7437 = vmatmul.mubr.msk.bf16.gmra.mrb[16].mxu1 %vm280_vm0, %v10430_v45 }
 0x531   : > { %7440 = vmatprep.mubr.msk.bf16.mxu1 %vm280_vm0, %v10431_v25 }
 0x538   : > { %7441 = vmatmul.mubr.msk.bf16.gmra.mrb[20].mxu1 %vm280_vm0, %v9551_v31  ;;  %v10433_v31 = vmov %v10411_v0 }
 0x539   : > { %7444 = vmatprep.mubr.msk.bf16.mxu1 %vm280_vm0, %v9580_v34  ;;  %v4951_v27 = vsel %vm2554_vm7, %v10433_v31, %v4950_v8 }
 0x53a   : > { %v5040_v13 = vpack.c.bf16 %v5022_v37, %v4951_v27 }
 0x540   : > { %7445 = vmatmul.mubr.msk.bf16.gmra.mrb[24].mxu1 %vm280_vm0, %v9588_v51 }
 0x541   : > { %7448 = vmatprep.mubr.msk.bf16.mxu1 %vm280_vm0, %v9590_v62 }
 0x548   : > { %7449 = vmatmul.mubr.msk.bf16.gmra.mrb[28].mxu1 %vm280_vm0, %v5040_v13 }
 0x5e3   : > { %v7422_v35 = vpop.f32.mrb[0].mxu1 }
 0x5e4   : > { %v5566_v52 = vpop.f32.mrb[1].mxu1  ;;  %v9916_v30 = vadd.f32 %v7422_v35, %v9910_v56 }
 0x5e5   : > { %v9913_v10 = vadd.f32 %v9910_v56, %v5566_v52  ;;  %v7423_v0 = vpop.f32.mrb[2].mxu1 }
 0x5e6   : > { %v5569_v49 = vpop.f32.mrb[3].mxu1  ;;  %v9924_v34 = vadd.f32 %v7423_v0, %v9910_v56  ;;  %v5767_v42 = vsel %vm280_vm0, %v9916_v30, 0.0 }
 0x5e7   : > { %v9919_v3 = vadd.f32 %v9910_v56, %v5569_v49  ;;  %v5764_v59 = vsel %vm280_vm0, %v9913_v10, 0.0 }
 0x5e8   : > { %v5769_v17 = vsel %vm280_vm0, %v9924_v34, 0.0 }
 0x5e9   : > { %v5765_v47 = vsel %vm280_vm0, %v9919_v3, 0.0 }
 0x5ea   : > { %v5766_v7 = vadd.f32 %v5765_v47, %v5764_v59 }
 0x5eb   : > { %v7426_v51 = vpop.f32.mrb[4].mxu1 }
 0x5ec   : > { %v5768_v62 = vadd.f32 %v5767_v42, %v5766_v7  ;;  %v5582_v41 = vpop.f32.mrb[5].mxu1  ;;  %v9936_v36 = vadd.f32 %v7426_v51, %v9910_v56 }
 0x5ed   : > { %v9933_v40 = vadd.f32 %v9910_v56, %v5582_v41  ;;  %v7427_v14 = vpop.f32.mrb[6].mxu1 }
 0x5ee   : > { %v5770_v55 = vadd.f32 %v5769_v17, %v5768_v62  ;;  %v5585_v48 = vpop.f32.mrb[7].mxu1  ;;  %v9944_v24 = vadd.f32 %v7427_v14, %v9910_v56  ;;  %v5775_v18 = vsel %vm280_vm0, %v9936_v36, 0.0 }
 0x5ef   : > { %v5771_v46 = vsel %vm280_vm0, %v9933_v40, 0.0  ;;  %v9941_v58 = vadd.f32 %v9910_v56, %v5585_v48 }
 0x5f0   : > { %v5772_v22 = vadd.f32 %v5771_v46, %v5770_v55  ;;  %v5777_v6 = vsel %vm280_vm0, %v9944_v24, 0.0 }
 0x5f1   : > { %v5773_v2 = vsel %vm280_vm0, %v9941_v58, 0.0 }
 0x5f2   : > { %v5774_v50 = vadd.f32 %v5773_v2, %v5772_v22 }
 0x5f3   : > { %v7430_v44 = vpop.f32.mrb[8].mxu1 }
 0x5f4   : > { %v5776_v53 = vadd.f32 %v5775_v18, %v5774_v50  ;;  %v5598_v5 = vpop.f32.mrb[9].mxu1  ;;  %v9956_v61 = vadd.f32 %v7430_v44, %v9910_v56 }
 0x5f5   : > { %v9953_v1 = vadd.f32 %v9910_v56, %v5598_v5  ;;  %v7431_v60 = vpop.f32.mrb[10].mxu1 }
 0x5f6   : > { %v5778_v29 = vadd.f32 %v5777_v6, %v5776_v53  ;;  %v5601_v39 = vpop.f32.mrb[11].mxu1  ;;  %v9964_v16 = vadd.f32 %v7431_v60, %v9910_v56  ;;  %v5783_v20 = vsel %vm280_vm0, %v9956_v61, 0.0 }
 0x5f7   : > { %v5779_v43 = vsel %vm280_vm0, %v9953_v1, 0.0  ;;  %v9961_v57 = vadd.f32 %v9910_v56, %v5601_v39 }
 0x5f8   : > { %v5780_v54 = vadd.f32 %v5779_v43, %v5778_v29  ;;  %v5785_v12 = vsel %vm280_vm0, %v9964_v16, 0.0 }
 0x5f9   : > { %v5781_v26 = vsel %vm280_vm0, %v9961_v57, 0.0 }
 0x5fa   : > { %v5782_v23 = vadd.f32 %v5781_v26, %v5780_v54 }
 0x5fb   : > { %v7434_v38 = vpop.f32.mrb[12].mxu1 }
 0x5fc   : > { %v5784_v15 = vadd.f32 %v5783_v20, %v5782_v23  ;;  %v5614_v19 = vpop.f32.mrb[13].mxu1  ;;  %v9976_v32 = vadd.f32 %v7434_v38, %v9910_v56 }
 0x5fd   : > { %v9973_v4 = vadd.f32 %v9910_v56, %v5614_v19  ;;  %v7435_v21 = vpop.f32.mrb[14].mxu1 }
 0x5fe   : > { %v5786_v9 = vadd.f32 %v5785_v12, %v5784_v15  ;;  %v5617_v28 = vpop.f32.mrb[15].mxu1  ;;  %v9984_v8 = vadd.f32 %v7435_v21, %v9910_v56  ;;  %v5791_v37 = vsel %vm280_vm0, %v9976_v32, 0.0 }
 0x5ff   : > { %v5787_v45 = vsel %vm280_vm0, %v9973_v4, 0.0  ;;  %v9981_v25 = vadd.f32 %v9910_v56, %v5617_v28 }
 0x600   : > { %v5788_v63 = vadd.f32 %v5787_v45, %v5786_v9  ;;  %v5793_v35 = vsel %vm280_vm0, %v9984_v8, 0.0 }
 0x601   : > { %v5789_v11 = vsel %vm280_vm0, %v9981_v25, 0.0 }
 0x602   : > { %v5790_v33 = vadd.f32 %v5789_v11, %v5788_v63 }
 0x603   : > { %v7438_v31 = vpop.f32.mrb[16].mxu1 }
 0x604   : > { %v5792_v27 = vadd.f32 %v5791_v37, %v5790_v33  ;;  %v5630_v13 = vpop.f32.mrb[17].mxu1  ;;  %v9996_v47 = vadd.f32 %v7438_v31, %v9910_v56 }
 0x605   : > { %v9993_v52 = vadd.f32 %v9910_v56, %v5630_v13  ;;  %v7439_v0 = vpop.f32.mrb[18].mxu1 }
 0x606   : > { %v5794_v49 = vadd.f32 %v5793_v35, %v5792_v27  ;;  %v5633_v59 = vpop.f32.mrb[19].mxu1  ;;  %v10004_v62 = vadd.f32 %v7439_v0, %v9910_v56  ;;  %v5799_v14 = vsel %vm280_vm0, %v9996_v47, 0.0 }
 0x607   : > { %v5795_v7 = vsel %vm280_vm0, %v9993_v52, 0.0  ;;  %v10001_v42 = vadd.f32 %v9910_v56, %v5633_v59 }
 0x608   : > { %v5796_v51 = vadd.f32 %v5795_v7, %v5794_v49  ;;  %v5801_v22 = vsel %vm280_vm0, %v10004_v62, 0.0 }
 0x609   : > { %v5797_v41 = vsel %vm280_vm0, %v10001_v42, 0.0 }
 0x60a   : > { %v5798_v17 = vadd.f32 %v5797_v41, %v5796_v51 }
 0x60b   : > { %v7442_v55 = vpop.f32.mrb[20].mxu1 }
 0x60c   : > { %v5800_v48 = vadd.f32 %v5799_v14, %v5798_v17  ;;  %v5646_v46 = vpop.f32.mrb[21].mxu1  ;;  %v10016_v53 = vadd.f32 %v7442_v55, %v9910_v56 }
 0x60d   : > { %v10013_v2 = vadd.f32 %v9910_v56, %v5646_v46  ;;  %v7443_v50 = vpop.f32.mrb[22].mxu1 }
 0x60e   : > { %v5802_v18 = vadd.f32 %v5801_v22, %v5800_v48  ;;  %v5649_v44 = vpop.f32.mrb[23].mxu1  ;;  %v10024_v29 = vadd.f32 %v7443_v50, %v9910_v56  ;;  %v5807_v54 = vsel %vm280_vm0, %v10016_v53, 0.0 }
 0x60f   : > { %v5803_v5 = vsel %vm280_vm0, %v10013_v2, 0.0  ;;  %v10021_v6 = vadd.f32 %v9910_v56, %v5649_v44 }
 0x610   : > { %v5804_v60 = vadd.f32 %v5803_v5, %v5802_v18  ;;  %v5809_v38 = vsel %vm280_vm0, %v10024_v29, 0.0 }
 0x611   : > { %v5805_v39 = vsel %vm280_vm0, %v10021_v6, 0.0 }
 0x612   : > { %v5806_v43 = vadd.f32 %v5805_v39, %v5804_v60 }
 0x613   : > { %v7446_v26 = vpop.f32.mrb[24].mxu1 }
 0x614   : > { %v5808_v23 = vadd.f32 %v5807_v54, %v5806_v43  ;;  %v5662_v20 = vpop.f32.mrb[25].mxu1  ;;  %v10036_v9 = vadd.f32 %v7446_v26, %v9910_v56 }
 0x615   : > { %v10033_v15 = vadd.f32 %v9910_v56, %v5662_v20  ;;  %v7447_v19 = vpop.f32.mrb[26].mxu1 }
 0x616   : > { %v5810_v12 = vadd.f32 %v5809_v38, %v5808_v23  ;;  %v5665_v21 = vpop.f32.mrb[27].mxu1  ;;  %v10044_v11 = vadd.f32 %v7447_v19, %v9910_v56  ;;  %v5815_v31 = vsel %vm280_vm0, %v10036_v9, 0.0 }
 0x617   : > { %v5811_v28 = vsel %vm280_vm0, %v10033_v15, 0.0  ;;  %v10041_v45 = vadd.f32 %v9910_v56, %v5665_v21  ;;  %v5842_v21 = vld [vmem:[%s10270_s6] sm:$0x3] }
 0x618   : > { %v5812_v63 = vadd.f32 %v5811_v28, %v5810_v12  ;;  %v5817_v0 = vsel %vm280_vm0, %v10044_v11, 0.0 }
 0x619   : > { %v5813_v33 = vsel %vm280_vm0, %v10041_v45, 0.0 }
 0x61a   : > { %v5814_v37 = vadd.f32 %v5813_v33, %v5812_v63 }
 0x61b   : > { %v7450_v27 = vpop.f32.mrb[28].mxu1 }
 0x61c   : > { %v5816_v13 = vadd.f32 %v5815_v31, %v5814_v37  ;;  %v5678_v35 = vpop.f32.mrb[29].mxu1  ;;  %v10056_v41 = vadd.f32 %v7450_v27, %v9910_v56 }
 0x61d   : > { %v10053_v49 = vadd.f32 %v9910_v56, %v5678_v35  ;;  %v7451_v59 = vpop.f32.mrb[30].mxu1 }
 0x61e   : > { %v5818_v7 = vadd.f32 %v5817_v0, %v5816_v13  ;;  %v5681_v51 = vpop.f32.mrb[31].mxu1  ;;  %v10064_v48 = vadd.f32 %v7451_v59, %v9910_v56  ;;  %v5823_v50 = vsel %vm280_vm0, %v10056_v41, 0.0 }
 0x61f   : > { %v5819_v17 = vsel %vm280_vm0, %v10053_v49, 0.0  ;;  %v10061_v14 = vadd.f32 %v9910_v56, %v5681_v51  ;;  %v5835_v56 = vld [vmem:[%s10269_s5] sm:$0x3] }
 0x620   : > { %v5820_v55 = vadd.f32 %v5819_v17, %v5818_v7  ;;  %v5825_v44 = vsel %vm280_vm0, %v10064_v48, 0.0 }
 0x621   : > { %v5821_v46 = vsel %vm280_vm0, %v10061_v14, 0.0 }
 0x622   : > { %v5822_v22 = vadd.f32 %v5821_v46, %v5820_v55 }
 0x624   : > { %v5824_v18 = vadd.f32 %v5823_v50, %v5822_v22 }
 0x626   : > { %v5826_v5 = vadd.f32 %v5825_v44, %v5824_v18 }
 0x628   : > { %v5827_v60 = vrot.slane %v5826_v5, 4 }
 0x62a   : > { %v5828_v39 = vadd.f32 %v5827_v60, %v5826_v5 }
 0x62c   : > { %v5829_v43 = vrot.slane %v5828_v39, 2 }
 0x62e   : > { %v5830_v54 = vadd.f32 %v5829_v43, %v5828_v39  ;;  %v5857_v39 = vld [vmem:[%s8104_s12] sm:$0xff]  ;;  %v5860_v43 = vld [vmem:[%s8104_s12 + $0x18] sm:$0xff] }
 0x630   : > { %v5831_v26 = vrot.slane %v5830_v54, 1 }
 0x632   : > { %v5832_v23 = vadd.f32 %v5831_v26, %v5830_v54  ;;  %v5864_v26 = vld [vmem:[%s8104_s12 + $0x38] sm:$0xff] }
 0x634   : > { %v5834_v20 = vmul.f32 0.00390625, %v5832_v23 }
 0x636   : > { %v5836_v38 = vmul.f32 %v5835_v56, %v5834_v20  ;;  %v5867_v20 = vld [vmem:[%s8104_s12 + $0x50] sm:$0xff] }
 0x638   : > { %v5838_v19 = vsel %vm5837_vm4, %v5836_v38, 0.0 }
 0x639   : > { %5839 = vadd.xlane.f32.xlu0 %v5838_v19  ;;  %v5869_v19 = vld [vmem:[%s8104_s12 + $0x60] sm:$0xff] }
 0x6c6   : > { %v5840_v12 = vpop.xlane.xlu0 %5839 }
 0x6c7   : > { %v5841_v28 = vmax.f32 %v5840_v12, 0.0  ;;  %v5870_v12 = vld [vmem:[%s8104_s12 + $0x68] sm:$0xff] }
 0x6c9   : > { %v5843_v63 = vmul.f32 %v5842_v21, %v5841_v28  ;;  %v5873_v28 = vld [vmem:[%s8104_s12 + $0x80] sm:$0xff] }
 0x6cb   : > { %v5844_v33 = vsel %vm5837_vm4, %v5843_v63, 0.0 }
 0x6cc   : > { %v5845_v37 = vrot.slane %v5844_v33, 4 }
 0x6ce   : > { %v5846_v31 = vadd.f32 %v5845_v37, %v5844_v33  ;;  %v5874_v33 = vld [vmem:[%s8104_s12 + $0x88] sm:$0xff]  ;;  %v5875_v37 = vld [vmem:[%s8104_s12 + $0x90] sm:$0xff] }
 0x6d0   : > { %v5847_v27 = vrot.slane %v5846_v31, 2 }
 0x6d2   : > { %v5848_v13 = vadd.f32 %v5847_v27, %v5846_v31  ;;  %v5876_v31 = vld [vmem:[%s8104_s12 + $0x98] sm:$0xff] }
 0x6d4   : > { %v5849_v35 = vrot.slane %v5848_v13, 1 }
 0x6d6   : > { %v5850_v0 = vadd.f32 %v5849_v35, %v5848_v13 }
 0x6d8   : > { %v6475_v59 = vmul.f32 -1.442695, %v5850_v0  ;;  %v5878_v0 = vld [vmem:[%s8104_s12 + $0xa8] sm:$0xff] }
 0x6da   : > { %8009 = vpow2.f32 %v6475_v59 }
 0x6e4   : > { %v8010_v7 = vpop.eup %8009 }
 0x6e5   : > { %v5854_v51 = vadd.f32 1.0, %v8010_v7 }
 0x6e7   : > { %8011 = vrcp.f32 %v5854_v51 }
 0x6f1   : > { %v8012_v17 = vpop.eup %8011 }
 0x6f2   : > { %v5889_v55 = vmul.f32 %v8012_v17, %v9913_v10  ;;  %v5890_v46 = vmul.f32 %v8012_v17, %v9919_v3  ;;  %v5891_v22 = vmul.f32 %v8012_v17, %v9916_v30  ;;  %v5892_v50 = vmul.f32 %v8012_v17, %v9924_v34 }
 0x6f3   : > { %v5893_v18 = vmul.f32 %v8012_v17, %v9933_v40  ;;  %v5894_v44 = vmul.f32 %v8012_v17, %v9941_v58  ;;  %v5895_v5 = vmul.f32 %v8012_v17, %v9936_v36  ;;  %v5896_v60 = vmul.f32 %v8012_v17, %v9944_v24  ;;  %v5858_v40 = vld [vmem:[%s8104_s12 + $0x8] sm:$0xff]  ;;  %v5859_v58 = vld [vmem:[%s8104_s12 + $0x10] sm:$0xff] }
 0x6f4   : > { %v5897_v10 = vmul.f32 %v8012_v17, %v9953_v1  ;;  %v5898_v3 = vmul.f32 %v8012_v17, %v9961_v57  ;;  %v5899_v30 = vmul.f32 %v8012_v17, %v9956_v61  ;;  %v5900_v34 = vmul.f32 %v8012_v17, %v9964_v16  ;;  %v5861_v57 = vld [vmem:[%s8104_s12 + $0x20] sm:$0xff]  ;;  %v5862_v61 = vld [vmem:[%s8104_s12 + $0x28] sm:$0xff]  ;;  %v5863_v16 = vld [vmem:[%s8104_s12 + $0x30] sm:$0xff] }
 0x6f5   : > { %v5901_v36 = vmul.f32 %v8012_v17, %v9973_v4  ;;  %v5902_v24 = vmul.f32 %v8012_v17, %v9981_v25  ;;  %v5903_v54 = vmul.f32 %v8012_v17, %v9976_v32  ;;  %v5904_v1 = vmul.f32 %v8012_v17, %v9984_v8  ;;  %v5865_v25 = vld [vmem:[%s8104_s12 + $0x40] sm:$0xff]  ;;  %v5866_v8 = vld [vmem:[%s8104_s12 + $0x48] sm:$0xff] }
 0x6f6   : > { %v10103_v23 = vmul.f32 %v8012_v17, %v9993_v52  ;;  %v10106_v56 = vmul.f32 %v8012_v17, %v10001_v42  ;;  %v10109_v4 = vmul.f32 %v8012_v17, %v9996_v47  ;;  %v10112_v32 = vmul.f32 %v8012_v17, %v10004_v62  ;;  %v5868_v62 = vld [vmem:[%s8104_s12 + $0x58] sm:$0xff] }
 0x6f7   : > { %v10118_v38 = vmul.f32 %v8012_v17, %v10013_v2  ;;  %v10121_v52 = vmul.f32 %v8012_v17, %v10021_v6  ;;  %v10124_v42 = vmul.f32 %v8012_v17, %v10016_v53  ;;  %v10127_v47 = vmul.f32 %v8012_v17, %v10024_v29  ;;  %v5871_v29 = vld [vmem:[%s8104_s12 + $0x70] sm:$0xff] }
 0x6f8   : > { %v10133_v21 = vmul.f32 %v8012_v17, %v10033_v15  ;;  %v10136_v2 = vmul.f32 %v8012_v17, %v10041_v45  ;;  %v10139_v6 = vmul.f32 %v8012_v17, %v10036_v9  ;;  %v10142_v53 = vmul.f32 %v8012_v17, %v10044_v11  ;;  %v5872_v15 = vld [vmem:[%s8104_s12 + $0x78] sm:$0xff] }
 0x6f9   : > { %v10155_v45 = vmul.f32 %v8012_v17, %v10053_v49  ;;  %v10158_v9 = vmul.f32 %v8012_v17, %v10061_v14  ;;  %v10161_v11 = vmul.f32 %v8012_v17, %v10056_v41  ;;  %v10164_v63 = vmul.f32 %v8012_v17, %v10064_v48  ;;  %v5877_v14 = vld [vmem:[%s8104_s12 + $0xa0] sm:$0xff]  ;;  %v5879_v41 = vld [vmem:[%s8104_s12 + $0xb0] sm:$0xff]  ;;  %v5880_v17 = vld [vmem:[%s8104_s12 + $0xb8] sm:$0xff] }
 0x6fa   : > { %v5921_v27 = vadd.f32 %v5889_v55, %v5857_v39  ;;  %v5922_v13 = vadd.f32 %v5890_v46, %v5858_v40  ;;  %v5923_v35 = vadd.f32 %v5891_v22, %v5859_v58  ;;  %v5924_v49 = vadd.f32 %v5892_v50, %v5860_v43  ;;  %v5882_v55 = vld [vmem:[%s8104_s12 + $0xc8] sm:$0xff]  ;;  %v5887_v40 = vld [vmem:[%s8104_s12 + $0xf0] sm:$0xff]  ;;  %v5888_v58 = vld [vmem:[%s8104_s12 + $0xf8] sm:$0xff] }
 0x6fb   : > { %10434 = vst [vmem:[#allocation17_spill] sm:$0xff] %v10164_v63  ;;  %v5925_v59 = vadd.f32 %v5893_v18, %v5861_v57  ;;  %v5926_v48 = vadd.f32 %v5894_v44, %v5862_v61  ;;  %v5927_v7 = vadd.f32 %v5895_v5, %v5863_v16  ;;  %v5928_v51 = vadd.f32 %v5896_v60, %v5864_v26  ;;  %v5881_v63 = vld [vmem:[%s8104_s12 + $0xc0] sm:$0xff]  ;;  %v5883_v18 = vld [vmem:[%s8104_s12 + $0xd0] sm:$0xff]  ;;  %v5884_v44 = vld [vmem:[%s8104_s12 + $0xd8] sm:$0xff] }
 0x6fc   : > { %v5929_v46 = vadd.f32 %v5897_v10, %v5865_v25  ;;  %v5930_v22 = vadd.f32 %v5898_v3, %v5866_v8  ;;  %v5931_v50 = vadd.f32 %v5899_v30, %v5867_v20  ;;  %v5932_v39 = vadd.f32 %v5900_v34, %v5868_v62  ;;  %5953 = vst.msk [vmem:[%s10149_s13] sm:$0xff] %vm280_vm0, %v5921_v27  ;;  %v5885_v5 = vld [vmem:[%s8104_s12 + $0xe0] sm:$0xff]  ;;  %v5886_v34 = vld [vmem:[%s8104_s12 + $0xe8] sm:$0xff] }
 0x6fd   : > { %5954 = vst.msk [vmem:[%s10149_s13 + $0x8] sm:$0xff] %vm280_vm0, %v5922_v13  ;;  %5955 = vst.msk [vmem:[%s10149_s13 + $0x10] sm:$0xff] %vm280_vm0, %v5923_v35  ;;  %v5933_v60 = vadd.f32 %v5901_v36, %v5869_v19  ;;  %v5934_v10 = vadd.f32 %v5902_v24, %v5870_v12  ;;  %v5935_v3 = vadd.f32 %v5903_v54, %v5871_v29 }
 0x6fe   : > { %5956 = vst.msk [vmem:[%s10149_s13 + $0x18] sm:$0xff] %vm280_vm0, %v5924_v49  ;;  %v5936_v30 = vadd.f32 %v5904_v1, %v5872_v15  ;;  %5957 = vst.msk [vmem:[%s10149_s13 + $0x20] sm:$0xff] %vm280_vm0, %v5925_v59  ;;  %v5937_v43 = vadd.f32 %v10103_v23, %v5873_v28  ;;  %v5938_v36 = vadd.f32 %v10106_v56, %v5874_v33 }
 0x6ff   : > { %5958 = vst.msk [vmem:[%s10149_s13 + $0x28] sm:$0xff] %vm280_vm0, %v5926_v48  ;;  %5959 = vst.msk [vmem:[%s10149_s13 + $0x30] sm:$0xff] %vm280_vm0, %v5927_v7  ;;  %v5939_v24 = vadd.f32 %v10109_v4, %v5875_v37  ;;  %v5940_v54 = vadd.f32 %v10112_v32, %v5876_v31  ;;  %v5941_v1 = vadd.f32 %v10118_v38, %v5877_v14 }
 0x700   : > { %5960 = vst.msk [vmem:[%s10149_s13 + $0x38] sm:$0xff] %vm280_vm0, %v5928_v51  ;;  %5961 = vst.msk [vmem:[%s10149_s13 + $0x40] sm:$0xff] %vm280_vm0, %v5929_v46  ;;  %v5942_v57 = vadd.f32 %v10121_v52, %v5878_v0  ;;  %v5943_v61 = vadd.f32 %v10124_v42, %v5879_v41  ;;  %v5944_v16 = vadd.f32 %v10127_v47, %v5880_v17 }
 0x701   : > { %5962 = vst.msk [vmem:[%s10149_s13 + $0x48] sm:$0xff] %vm280_vm0, %v5930_v22  ;;  %5963 = vst.msk [vmem:[%s10149_s13 + $0x50] sm:$0xff] %vm280_vm0, %v5931_v50  ;;  %v5945_v26 = vadd.f32 %v10133_v21, %v5881_v63  ;;  %v5946_v23 = vadd.f32 %v10136_v2, %v5882_v55  ;;  %v5947_v56 = vadd.f32 %v10139_v6, %v5883_v18 }
 0x702   : > { %5964 = vst.msk [vmem:[%s10149_s13 + $0x58] sm:$0xff] %vm280_vm0, %v5932_v39  ;;  %5965 = vst.msk [vmem:[%s10149_s13 + $0x60] sm:$0xff] %vm280_vm0, %v5933_v60  ;;  %v5948_v4 = vadd.f32 %v10142_v53, %v5884_v44  ;;  %v5949_v32 = vadd.f32 %v10155_v45, %v5885_v5  ;;  %v5950_v25 = vadd.f32 %v10158_v9, %v5886_v34  ;;  %v10435_v20 = vld [vmem:[#allocation17_spill] sm:$0xff] }
 0x703   : > { %5966 = vst.msk [vmem:[%s10149_s13 + $0x68] sm:$0xff] %vm280_vm0, %v5934_v10  ;;  %5967 = vst.msk [vmem:[%s10149_s13 + $0x70] sm:$0xff] %vm280_vm0, %v5935_v3  ;;  %v5951_v8 = vadd.f32 %v10161_v11, %v5887_v40  ;;  %v5952_v38 = vadd.f32 %v10435_v20, %v5888_v58 }
 0x704   : > { %5968 = vst.msk [vmem:[%s10149_s13 + $0x78] sm:$0xff] %vm280_vm0, %v5936_v30  ;;  %5969 = vst.msk [vmem:[%s10149_s13 + $0x80] sm:$0xff] %vm280_vm0, %v5937_v43 }
 0x705   : > { %5970 = vst.msk [vmem:[%s10149_s13 + $0x88] sm:$0xff] %vm280_vm0, %v5938_v36  ;;  %5971 = vst.msk [vmem:[%s10149_s13 + $0x90] sm:$0xff] %vm280_vm0, %v5939_v24 }
 0x706   : > { %5972 = vst.msk [vmem:[%s10149_s13 + $0x98] sm:$0xff] %vm280_vm0, %v5940_v54  ;;  %5973 = vst.msk [vmem:[%s10149_s13 + $0xa0] sm:$0xff] %vm280_vm0, %v5941_v1 }
 0x707   : > { %5974 = vst.msk [vmem:[%s10149_s13 + $0xa8] sm:$0xff] %vm280_vm0, %v5942_v57  ;;  %5975 = vst.msk [vmem:[%s10149_s13 + $0xb0] sm:$0xff] %vm280_vm0, %v5943_v61 }
 0x708   : > { %5976 = vst.msk [vmem:[%s10149_s13 + $0xb8] sm:$0xff] %vm280_vm0, %v5944_v16  ;;  %5977 = vst.msk [vmem:[%s10149_s13 + $0xc0] sm:$0xff] %vm280_vm0, %v5945_v26 }
 0x709   : > { %5978 = vst.msk [vmem:[%s10149_s13 + $0xc8] sm:$0xff] %vm280_vm0, %v5946_v23  ;;  %5979 = vst.msk [vmem:[%s10149_s13 + $0xd0] sm:$0xff] %vm280_vm0, %v5947_v56 }
 0x70a   : > { %5980 = vst.msk [vmem:[%s10149_s13 + $0xd8] sm:$0xff] %vm280_vm0, %v5948_v4  ;;  %5981 = vst.msk [vmem:[%s10149_s13 + $0xe0] sm:$0xff] %vm280_vm0, %v5949_v32 }
 0x70b   : > { %5982 = vst.msk [vmem:[%s10149_s13 + $0xe8] sm:$0xff] %vm280_vm0, %v5950_v25  ;;  %5983 = vst.msk [vmem:[%s10149_s13 + $0xf0] sm:$0xff] %vm280_vm0, %v5951_v8 }
 0x70c   : > { %5984 = vst.msk [vmem:[%s10149_s13 + $0xf8] sm:$0xff] %vm280_vm0, %v5952_v38 }
 0x70d PF: > { %s17_s24 = sadd.s32 1, %s8021_s24  }
 0x70e   : > { %p14_p4 = scmp.ge.s32.totalorder %s17_s24, 4  }
 0x710   :  { %16 = sbr.rel (!%p14_p4) target bundleno = 1 (0x1), region = 94 }

</bundles_post_ra>
